<compile_context>
chip_gen: v7x
topology: tpu7x:2x2x1
jax: 0.10.0
libtpu: 0.0.40
codegen_flags: <defaults>
</compile_context>

<pallas_src>
import jax
import jax.numpy as jnp
from jax import lax
from jax.experimental import pallas as pl
from jax.experimental.pallas import tpu as pltpu

# ----- small, module-consistent toy shapes (real module: dim=768, 12 heads, 197 vis tokens) -----
B = 2                    # batch
ATTR = 4                 # attr_num
DIM = 128                # dim
DW = 128                 # word-vector feature dim
HEADS = 4                # ViT block heads
HEAD_DIM = DIM // HEADS  # 32
N_VIS = 12               # ViT output tokens: cls + 11 patches (toy)
N_TOK = ATTR + N_VIS     # 16  (sublane aligned)
T = B * N_TOK            # 32 tokens total
MLP_HIDDEN = 4 * DIM     # 512
LN_EPS = 1e-6
BN_EPS = 1e-5


def _layer_norm(h, g, b):
    mu = jnp.mean(h, axis=-1, keepdims=True)
    var = jnp.mean(jnp.square(h - mu), axis=-1, keepdims=True)
    return (h - mu) * lax.rsqrt(var + LN_EPS) * g + b


# ---------------------------------------------------------------------------
# Fused kernel: word_embed+tex, vis_add, concat, last ViT block + norm,
#               per-attribute heads + BatchNorm1d (inference running stats)
# ---------------------------------------------------------------------------
def fused_classifier_kernel(
    # inputs
    wv_ref, feat_ref,
    wew_ref, web_ref, tex_ref, vis_ref,
    g1_ref, b1_ref,
    wq_ref, bq_ref, wk_ref, bk_ref, wvw_ref, bv_ref,
    wp_ref, bp_ref,
    g2_ref, b2_ref, wfc1_ref, bfc1_ref, wfc2_ref, bfc2_ref,
    gf_ref, bf_ref,
    clsw_ref, clsb_ref, rm_ref, rv_ref, bng_ref, bnb_ref,
    # outputs
    logits_ref, visout_ref, texout_ref,
    # scratch
    x_scr,
):
    f32 = jnp.float32

    # ---- word_embed(word_vec) + tex_embed -> (ATTR, DIM), broadcast to batch ----
    tex_tok = (jnp.dot(wv_ref[...], wew_ref[...], preferred_element_type=f32)
               + web_ref[...] + tex_ref[...])
    tex_b = jnp.broadcast_to(tex_tok[None], (B, ATTR, DIM))
    texout_ref[...] = tex_b

    # ---- features + vis_embed ----
    vis3 = feat_ref[...] + vis_ref[...]          # (B, N_VIS, DIM)
    visout_ref[...] = vis3

    # ---- concat [tex, vis] along tokens, built in VMEM scratch ----
    x_scr[:, 0:ATTR, :] = tex_b
    x_scr[:, ATTR:N_TOK, :] = vis3
    x = x_scr[...].reshape(T, DIM)               # token-major 2-D view (layout-preserving)

    # ---- last ViT encoder block: pre-LN multi-head self-attention ----
    h = _layer_norm(x, g1_ref[...], b1_ref[...])
    scale = HEAD_DIM ** -0.5
    attn = jnp.zeros((T, DIM), f32)
    for hh in range(HEADS):                      # per-head weights: leading-dim index, no lane slicing
        qh = (jnp.dot(h, wq_ref[hh], preferred_element_type=f32) + bq_ref[hh]) * scale
        kh = jnp.dot(h, wk_ref[hh], preferred_element_type=f32) + bk_ref[hh]
        vh = jnp.dot(h, wvw_ref[hh], preferred_element_type=f32) + bv_ref[hh]
        q3 = qh.reshape(B, N_TOK, HEAD_DIM)      # leading-dim split (N_TOK % 8 == 0)
        k3 = kh.reshape(B, N_TOK, HEAD_DIM)
        v3 = vh.reshape(B, N_TOK, HEAD_DIM)
        s = jnp.einsum('bnd,bmd->bnm', q3, k3, preferred_element_type=f32)   # (B,N,N)
        s = s - jnp.max(s, axis=-1, keepdims=True)
        p = jnp.exp(s)
        p = p * pl.reciprocal(jnp.sum(p, axis=-1, keepdims=True), approx=True)
        o = jnp.einsum('bnm,bmd->bnd', p, v3, preferred_element_type=f32)    # (B,N,hd)
        # sum of per-head output projections == concat(heads) @ Wproj
        attn = attn + jnp.dot(o.reshape(T, HEAD_DIM), wp_ref[hh],
                              preferred_element_type=f32)
    x = x + attn + bp_ref[...]

    # ---- MLP ----
    h = _layer_norm(x, g2_ref[...], b2_ref[...])
    h = jnp.dot(h, wfc1_ref[...], preferred_element_type=f32) + bfc1_ref[...]
    # TODO(synk): timm ViT uses exact erf-GELU; tanh-approximate GELU used here.
    h = jax.nn.gelu(h, approximate=True)
    h = jnp.dot(h, wfc2_ref[...], preferred_element_type=f32) + bfc2_ref[...]
    x = x + h

    # ---- final ViT norm ----
    x = _layer_norm(x, gf_ref[...], bf_ref[...])

    # ---- per-attribute classifier heads (MXU) + BatchNorm1d (inference) ----
    # logits[b, a] = <x[b, token a], W_cls[a]> + b_cls[a]
    full = lax.dot_general(x, clsw_ref[...],
                           dimension_numbers=(((1,), (1,)), ((), ())),
                           preferred_element_type=f32)           # (T, ATTR)
    f3 = full.reshape(B, N_TOK, ATTR)                            # layout-preserving split
    tok = lax.broadcasted_iota(jnp.int32, (B, N_TOK, ATTR), 1)
    col = lax.broadcasted_iota(jnp.int32, (B, N_TOK, ATTR), 2)
    logits = jnp.sum(jnp.where(tok == col, f3, 0.0), axis=1) + clsb_ref[...]   # (B, ATTR)
    inv = lax.rsqrt(rv_ref[...] + BN_EPS)
    logits_ref[...] = (logits - rm_ref[...]) * inv * bng_ref[...] + bnb_ref[...]


# ---------------------------------------------------------------------------
# Wrapper
# ---------------------------------------------------------------------------
def _full(shape):
    return pl.BlockSpec(shape, lambda *_: (0,) * len(shape))


def _fused_call(word_vec, features, p):
    # Pre-split per-head weights/biases in the wrapper (free XLA reshapes) so the
    # kernel never slices the lane axis.
    wq_h = p["wq"].reshape(DIM, HEADS, HEAD_DIM).transpose(1, 0, 2)   # (H, D, hd)
    wk_h = p["wk"].reshape(DIM, HEADS, HEAD_DIM).transpose(1, 0, 2)
    wv_h = p["wv"].reshape(DIM, HEADS, HEAD_DIM).transpose(1, 0, 2)
    bq_h = p["bq"].reshape(HEADS, 1, HEAD_DIM)
    bk_h = p["bk"].reshape(HEADS, 1, HEAD_DIM)
    bv_h = p["bv"].reshape(HEADS, 1, HEAD_DIM)
    wp_h = p["wproj"].reshape(HEADS, HEAD_DIM, DIM)                   # (H, hd, D)

    args = (word_vec, features,
            p["we_w"], p["we_b"], p["tex"], p["vis"],
            p["ln1_g"], p["ln1_b"],
            wq_h, bq_h, wk_h, bk_h, wv_h, bv_h,
            wp_h, p["bproj"],
            p["ln2_g"], p["ln2_b"], p["wfc1"], p["bfc1"], p["wfc2"], p["bfc2"],
            p["lnf_g"], p["lnf_b"],
            p["cls_w"], p["cls_b"], p["bn_rm"], p["bn_rv"], p["bn_g"], p["bn_b"])

    out_shape = (jax.ShapeDtypeStruct((B, ATTR), jnp.float32),
                 jax.ShapeDtypeStruct((B, N_VIS, DIM), jnp.float32),
                 jax.ShapeDtypeStruct((B, ATTR, DIM), jnp.float32))
    out_specs = (_full((B, ATTR)), _full((B, N_VIS, DIM)), _full((B, ATTR, DIM)))

    return pl.pallas_call(
        fused_classifier_kernel,
        out_shape=out_shape,
        grid=(1,),
        in_specs=[_full(a.shape) for a in args],
        out_specs=out_specs,
        scratch_shapes=[pltpu.VMEM((B, N_TOK, DIM), jnp.float32)],
        compiler_params=pltpu.CompilerParams(dimension_semantics=("arbitrary",)),
    )(*args)


# ---------------------------------------------------------------------------
# Parameter construction (deterministic, matches the module's __init__ shapes)
# ---------------------------------------------------------------------------
def make_params(key):
    ks = jax.random.split(key, 8)
    n = lambda k, s: (0.02 * jax.random.normal(k, s)).astype(jnp.float32)
    zeros = lambda s: jnp.zeros(s, jnp.float32)
    ones = lambda s: jnp.ones(s, jnp.float32)
    return {
        # word_embed: nn.Linear(768 -> dim) (toy DW stands in for 768)
        "we_w": n(ks[0], (DW, DIM)), "we_b": zeros((1, DIM)),
        # tex_embed / vis_embed: nn.Parameter(torch.zeros(1, 1, dim))
        "tex": zeros((1, DIM)), "vis": zeros((1, DIM)),
        # last ViT block (qkv split into separate q/k/v linears) + final norm
        "ln1_g": ones((1, DIM)), "ln1_b": zeros((1, DIM)),
        "wq": n(ks[1], (DIM, DIM)), "bq": zeros((1, DIM)),
        "wk": n(ks[2], (DIM, DIM)), "bk": zeros((1, DIM)),
        "wv": n(ks[3], (DIM, DIM)), "bv": zeros((1, DIM)),
        "wproj": n(ks[4], (DIM, DIM)), "bproj": zeros((1, DIM)),
        "ln2_g": ones((1, DIM)), "ln2_b": zeros((1, DIM)),
        "wfc1": n(ks[5], (DIM, MLP_HIDDEN)), "bfc1": zeros((1, MLP_HIDDEN)),
        "wfc2": n(ks[6], (MLP_HIDDEN, DIM)), "bfc2": zeros((1, DIM)),
        "lnf_g": ones((1, DIM)), "lnf_b": zeros((1, DIM)),
        # weight_layer: ModuleList of attr_num Linear(dim, 1) -> fused (A, D)
        "cls_w": n(ks[7], (ATTR, DIM)), "cls_b": zeros((1, ATTR)),
        # BatchNorm1d(attr_num) — inference-mode running stats
        "bn_rm": zeros((1, ATTR)), "bn_rv": ones((1, ATTR)),
        "bn_g": ones((1, ATTR)), "bn_b": zeros((1, ATTR)),
    }


# ---------------------------------------------------------------------------
# Forward (mirrors TransformerClassifier.forward)
# ---------------------------------------------------------------------------
@jax.jit
def transformer_classifier_forward(features, word_vec, params):
    # TODO(synk): `features = self.vit(imgs)` — the pretrained ViT-B/16 backbone is an
    #             external model; its (B, N_vis, D) token output is taken as input here.
    # TODO(synk): `self.snn_model(imgs)` (Spikingformer) is an external pretrained SNN
    #             backbone; its two outputs are returned as placeholder zeros.
    t_logits, vis_embed, tex_embed = _fused_call(word_vec, features, params)
    s_train_logits = jnp.zeros((B, 26), jnp.float32)
    s_features = jnp.zeros((B, N_VIS, DIM), jnp.float32)
    return t_logits, vis_embed[:, 1:, :], tex_embed, s_train_logits, s_features


if __name__ == "__main__":
    key = jax.random.PRNGKey(0)
    k_feat, k_word, k_param = jax.random.split(key, 3)

    features = jax.random.normal(k_feat, (B, N_VIS, DIM), jnp.float32)   # ViT backbone output
    word_vec = jax.random.normal(k_word, (ATTR, DW), jnp.float32)        # attribute word vectors
    params = make_params(k_param)

    outs = transformer_classifier_forward(features, word_vec, params)
    jax.block_until_ready(outs)

    t_logits, vis_tail, tex_embed, s_logits, s_feats = outs
    assert t_logits.shape == (B, ATTR)
    assert vis_tail.shape == (B, N_VIS - 1, DIM)
    assert tex_embed.shape == (B, ATTR, DIM)
    print("KERNEL_OK")
</pallas_src>

<mosaic_0001>
module attributes {stable_mosaic.version = 11 : i64} {
  func.func @fused_classifier_kernel(%arg0: i32, %arg1: memref<4x128xf32, #tpu.memory_space<vmem>>, %arg2: memref<2x12x128xf32, #tpu.memory_space<vmem>>, %arg3: memref<128x128xf32, #tpu.memory_space<vmem>>, %arg4: memref<1x128xf32, #tpu.memory_space<vmem>>, %arg5: memref<1x128xf32, #tpu.memory_space<vmem>>, %arg6: memref<1x128xf32, #tpu.memory_space<vmem>>, %arg7: memref<1x128xf32, #tpu.memory_space<vmem>>, %arg8: memref<1x128xf32, #tpu.memory_space<vmem>>, %arg9: memref<4x128x32xf32, #tpu.memory_space<vmem>>, %arg10: memref<4x1x32xf32, #tpu.memory_space<vmem>>, %arg11: memref<4x128x32xf32, #tpu.memory_space<vmem>>, %arg12: memref<4x1x32xf32, #tpu.memory_space<vmem>>, %arg13: memref<4x128x32xf32, #tpu.memory_space<vmem>>, %arg14: memref<4x1x32xf32, #tpu.memory_space<vmem>>, %arg15: memref<4x32x128xf32, #tpu.memory_space<vmem>>, %arg16: memref<1x128xf32, #tpu.memory_space<vmem>>, %arg17: memref<1x128xf32, #tpu.memory_space<vmem>>, %arg18: memref<1x128xf32, #tpu.memory_space<vmem>>, %arg19: memref<128x512xf32, #tpu.memory_space<vmem>>, %arg20: memref<1x512xf32, #tpu.memory_space<vmem>>, %arg21: memref<512x128xf32, #tpu.memory_space<vmem>>, %arg22: memref<1x128xf32, #tpu.memory_space<vmem>>, %arg23: memref<1x128xf32, #tpu.memory_space<vmem>>, %arg24: memref<1x128xf32, #tpu.memory_space<vmem>>, %arg25: memref<4x128xf32, #tpu.memory_space<vmem>>, %arg26: memref<1x4xf32, #tpu.memory_space<vmem>>, %arg27: memref<1x4xf32, #tpu.memory_space<vmem>>, %arg28: memref<1x4xf32, #tpu.memory_space<vmem>>, %arg29: memref<1x4xf32, #tpu.memory_space<vmem>>, %arg30: memref<1x4xf32, #tpu.memory_space<vmem>>, %arg31: memref<2x4xf32, #tpu.memory_space<vmem>>, %arg32: memref<2x12x128xf32, #tpu.memory_space<vmem>>, %arg33: memref<2x4x128xf32, #tpu.memory_space<vmem>>, %arg34: memref<2x16x128xf32, #tpu.memory_space<vmem>>) attributes {dimension_semantics = [#tpu.dimension_semantics<arbitrary>], iteration_bounds = array<i64: 1>, scalar_prefetch = 0 : i64, scratch_operands = 1 : i64, tpu.core_type = #tpu.core_type<tc>, window_params = [{pipeline_mode = #tpu.pipeline_mode<synchronous>, transform_indices = @transform_0, window_bounds = array<i64: 4, 128>}, {pipeline_mode = #tpu.pipeline_mode<synchronous>, transform_indices = @transform_1, window_bounds = array<i64: 2, 12, 128>}, {pipeline_mode = #tpu.pipeline_mode<synchronous>, transform_indices = @transform_2, window_bounds = array<i64: 128, 128>}, {pipeline_mode = #tpu.pipeline_mode<synchronous>, transform_indices = @transform_3, window_bounds = array<i64: 1, 128>}, {pipeline_mode = #tpu.pipeline_mode<synchronous>, transform_indices = @transform_4, window_bounds = array<i64: 1, 128>}, {pipeline_mode = #tpu.pipeline_mode<synchronous>, transform_indices = @transform_5, window_bounds = array<i64: 1, 128>}, {pipeline_mode = #tpu.pipeline_mode<synchronous>, transform_indices = @transform_6, window_bounds = array<i64: 1, 128>}, {pipeline_mode = #tpu.pipeline_mode<synchronous>, transform_indices = @transform_7, window_bounds = array<i64: 1, 128>}, {pipeline_mode = #tpu.pipeline_mode<synchronous>, transform_indices = @transform_8, window_bounds = array<i64: 4, 128, 32>}, {pipeline_mode = #tpu.pipeline_mode<synchronous>, transform_indices = @transform_9, window_bounds = array<i64: 4, 1, 32>}, {pipeline_mode = #tpu.pipeline_mode<synchronous>, transform_indices = @transform_10, window_bounds = array<i64: 4, 128, 32>}, {pipeline_mode = #tpu.pipeline_mode<synchronous>, transform_indices = @transform_11, window_bounds = array<i64: 4, 1, 32>}, {pipeline_mode = #tpu.pipeline_mode<synchronous>, transform_indices = @transform_12, window_bounds = array<i64: 4, 128, 32>}, {pipeline_mode = #tpu.pipeline_mode<synchronous>, transform_indices = @transform_13, window_bounds = array<i64: 4, 1, 32>}, {pipeline_mode = #tpu.pipeline_mode<synchronous>, transform_indices = @transform_14, window_bounds = array<i64: 4, 32, 128>}, {pipeline_mode = #tpu.pipeline_mode<synchronous>, transform_indices = @transform_15, window_bounds = array<i64: 1, 128>}, {pipeline_mode = #tpu.pipeline_mode<synchronous>, transform_indices = @transform_16, window_bounds = array<i64: 1, 128>}, {pipeline_mode = #tpu.pipeline_mode<synchronous>, transform_indices = @transform_17, window_bounds = array<i64: 1, 128>}, {pipeline_mode = #tpu.pipeline_mode<synchronous>, transform_indices = @transform_18, window_bounds = array<i64: 128, 512>}, {pipeline_mode = #tpu.pipeline_mode<synchronous>, transform_indices = @transform_19, window_bounds = array<i64: 1, 512>}, {pipeline_mode = #tpu.pipeline_mode<synchronous>, transform_indices = @transform_20, window_bounds = array<i64: 512, 128>}, {pipeline_mode = #tpu.pipeline_mode<synchronous>, transform_indices = @transform_21, window_bounds = array<i64: 1, 128>}, {pipeline_mode = #tpu.pipeline_mode<synchronous>, transform_indices = @transform_22, window_bounds = array<i64: 1, 128>}, {pipeline_mode = #tpu.pipeline_mode<synchronous>, transform_indices = @transform_23, window_bounds = array<i64: 1, 128>}, {pipeline_mode = #tpu.pipeline_mode<synchronous>, transform_indices = @transform_24, window_bounds = array<i64: 4, 128>}, {pipeline_mode = #tpu.pipeline_mode<synchronous>, transform_indices = @transform_25, window_bounds = array<i64: 1, 4>}, {pipeline_mode = #tpu.pipeline_mode<synchronous>, transform_indices = @transform_26, window_bounds = array<i64: 1, 4>}, {pipeline_mode = #tpu.pipeline_mode<synchronous>, transform_indices = @transform_27, window_bounds = array<i64: 1, 4>}, {pipeline_mode = #tpu.pipeline_mode<synchronous>, transform_indices = @transform_28, window_bounds = array<i64: 1, 4>}, {pipeline_mode = #tpu.pipeline_mode<synchronous>, transform_indices = @transform_29, window_bounds = array<i64: 1, 4>}, {pipeline_mode = #tpu.pipeline_mode<synchronous>, transform_indices = @transform_30, window_bounds = array<i64: 2, 4>}, {pipeline_mode = #tpu.pipeline_mode<synchronous>, transform_indices = @transform_31, window_bounds = array<i64: 2, 12, 128>}, {pipeline_mode = #tpu.pipeline_mode<synchronous>, transform_indices = @transform_32, window_bounds = array<i64: 2, 4, 128>}]} {
    %c0 = arith.constant 0 : index
    %c0_0 = arith.constant 0 : index
    %0 = vector.load %arg1[%c0, %c0_0] : memref<4x128xf32, #tpu.memory_space<vmem>>, vector<4x128xf32>
    %c0_1 = arith.constant 0 : index
    %c0_2 = arith.constant 0 : index
    %1 = vector.load %arg3[%c0_1, %c0_2] : memref<128x128xf32, #tpu.memory_space<vmem>>, vector<128x128xf32>
    %cst = arith.constant dense<0.000000e+00> : vector<4x128xf32>
    %2 = tpu.matmul %0, %1, %cst {dimension_numbers = #tpu.dot_dimension_numbers<[1], [0], [0], [1], [0, 0, 1, 1], [], []>} : vector<4x128xf32>, vector<128x128xf32>, vector<4x128xf32> -> vector<4x128xf32>
    %c0_3 = arith.constant 0 : index
    %c0_4 = arith.constant 0 : index
    %3 = vector.load %arg4[%c0_3, %c0_4] : memref<1x128xf32, #tpu.memory_space<vmem>>, vector<1x128xf32>
    %4 = vector.broadcast %3 : vector<1x128xf32> to vector<4x128xf32>
    %5 = arith.addf %2, %4 : vector<4x128xf32>
    %c0_5 = arith.constant 0 : index
    %c0_6 = arith.constant 0 : index
    %6 = vector.load %arg5[%c0_5, %c0_6] : memref<1x128xf32, #tpu.memory_space<vmem>>, vector<1x128xf32>
    %7 = vector.broadcast %6 : vector<1x128xf32> to vector<4x128xf32>
    %8 = arith.addf %5, %7 : vector<4x128xf32>
    %9 = vector.shape_cast %8 : vector<4x128xf32> to vector<1x4x128xf32>
    %10 = vector.shape_cast %9 : vector<1x4x128xf32> to vector<1x4x128xf32>
    %11 = vector.broadcast %10 : vector<1x4x128xf32> to vector<2x4x128xf32>
    %c0_7 = arith.constant 0 : index
    %c0_8 = arith.constant 0 : index
    %c0_9 = arith.constant 0 : index
    %12 = vector.load %arg33[%c0_7, %c0_8, %c0_9] : memref<2x4x128xf32, #tpu.memory_space<vmem>>, vector<2x4x128xf32>
    tpu.vector_store %arg33[%c0_7, %c0_8, %c0_9], %11 {strides = array<i32>} : memref<2x4x128xf32, #tpu.memory_space<vmem>>, vector<2x4x128xf32>,
    %c0_10 = arith.constant 0 : index
    %c0_11 = arith.constant 0 : index
    %c0_12 = arith.constant 0 : index
    %13 = vector.load %arg2[%c0_10, %c0_11, %c0_12] : memref<2x12x128xf32, #tpu.memory_space<vmem>>, vector<2x12x128xf32>
    %c0_13 = arith.constant 0 : index
    %c0_14 = arith.constant 0 : index
    %14 = vector.load %arg6[%c0_13, %c0_14] : memref<1x128xf32, #tpu.memory_space<vmem>>, vector<1x128xf32>
    %15 = vector.shape_cast %14 : vector<1x128xf32> to vector<1x1x128xf32>
    %16 = vector.broadcast %15 : vector<1x1x128xf32> to vector<2x12x128xf32>
    %17 = arith.addf %13, %16 : vector<2x12x128xf32>
    %c0_15 = arith.constant 0 : index
    %c0_16 = arith.constant 0 : index
    %c0_17 = arith.constant 0 : index
    %18 = vector.load %arg32[%c0_15, %c0_16, %c0_17] : memref<2x12x128xf32, #tpu.memory_space<vmem>>, vector<2x12x128xf32>
    tpu.vector_store %arg32[%c0_15, %c0_16, %c0_17], %17 {strides = array<i32>} : memref<2x12x128xf32, #tpu.memory_space<vmem>>, vector<2x12x128xf32>,
    %c0_18 = arith.constant 0 : index
    %c0_19 = arith.constant 0 : index
    %c0_20 = arith.constant 0 : index
    %19 = vector.load %arg34[%c0_18, %c0_19, %c0_20] : memref<2x16x128xf32, #tpu.memory_space<vmem>>, vector<2x4x128xf32>
    tpu.vector_store %arg34[%c0_18, %c0_19, %c0_20], %11 {strides = array<i32>} : memref<2x16x128xf32, #tpu.memory_space<vmem>>, vector<2x4x128xf32>,
    %c0_21 = arith.constant 0 : index
    %c4 = arith.constant 4 : index
    %c0_22 = arith.constant 0 : index
    %20 = vector.load %arg34[%c0_21, %c4, %c0_22] : memref<2x16x128xf32, #tpu.memory_space<vmem>>, vector<2x12x128xf32>
    tpu.vector_store %arg34[%c0_21, %c4, %c0_22], %17 {strides = array<i32>} : memref<2x16x128xf32, #tpu.memory_space<vmem>>, vector<2x12x128xf32>,
    %c0_23 = arith.constant 0 : index
    %c0_24 = arith.constant 0 : index
    %c0_25 = arith.constant 0 : index
    %21 = vector.load %arg34[%c0_23, %c0_24, %c0_25] : memref<2x16x128xf32, #tpu.memory_space<vmem>>, vector<2x16x128xf32>
    %22 = vector.shape_cast %21 : vector<2x16x128xf32> to vector<32x128xf32>
    %c0_26 = arith.constant 0 : index
    %c0_27 = arith.constant 0 : index
    %23 = vector.load %arg7[%c0_26, %c0_27] : memref<1x128xf32, #tpu.memory_space<vmem>>, vector<1x128xf32>
    %c0_28 = arith.constant 0 : index
    %c0_29 = arith.constant 0 : index
    %24 = vector.load %arg8[%c0_28, %c0_29] : memref<1x128xf32, #tpu.memory_space<vmem>>, vector<1x128xf32>
    %cst_30 = arith.constant dense<0.000000e+00> : vector<32xf32>
    %25 = vector.multi_reduction <add>, %22, %cst_30 [1] : vector<32x128xf32> to vector<32xf32>
    %26 = vector.shape_cast %25 : vector<32xf32> to vector<32x1xf32>
    %cst_31 = arith.constant 1.280000e+02 : f32
    %27 = vector.broadcast %cst_31 : f32 to vector<32x1xf32>
    %28 = arith.divf %26, %27 : vector<32x1xf32>
    %29 = vector.broadcast %28 : vector<32x1xf32> to vector<32x128xf32>
    %30 = arith.subf %22, %29 : vector<32x128xf32>
    %31 = arith.mulf %30, %30 : vector<32x128xf32>
    %cst_32 = arith.constant dense<0.000000e+00> : vector<32xf32>
    %32 = vector.multi_reduction <add>, %31, %cst_32 [1] : vector<32x128xf32> to vector<32xf32>
    %33 = vector.shape_cast %32 : vector<32xf32> to vector<32x1xf32>
    %cst_33 = arith.constant 1.280000e+02 : f32
    %34 = vector.broadcast %cst_33 : f32 to vector<32x1xf32>
    %35 = arith.divf %33, %34 : vector<32x1xf32>
    %36 = vector.broadcast %28 : vector<32x1xf32> to vector<32x128xf32>
    %37 = arith.subf %22, %36 : vector<32x128xf32>
    %cst_34 = arith.constant 9.99999997E-7 : f32
    %38 = vector.broadcast %cst_34 : f32 to vector<32x1xf32>
    %39 = arith.addf %35, %38 : vector<32x1xf32>
    %40 = math.rsqrt %39 : vector<32x1xf32>
    %41 = vector.broadcast %40 : vector<32x1xf32> to vector<32x128xf32>
    %42 = arith.mulf %37, %41 : vector<32x128xf32>
    %43 = vector.broadcast %23 : vector<1x128xf32> to vector<32x128xf32>
    %44 = arith.mulf %42, %43 : vector<32x128xf32>
    %45 = vector.broadcast %24 : vector<1x128xf32> to vector<32x128xf32>
    %46 = arith.addf %44, %45 : vector<32x128xf32>
    %cst_35 = arith.constant 0.000000e+00 : f32
    %47 = vector.broadcast %cst_35 : f32 to vector<32x128xf32>
    %c0_36 = arith.constant 0 : index
    %c0_37 = arith.constant 0 : index
    %c0_38 = arith.constant 0 : index
    %48 = vector.load %arg9[%c0_36, %c0_37, %c0_38] : memref<4x128x32xf32, #tpu.memory_space<vmem>>, vector<1x128x32xf32>
    %49 = vector.shape_cast %48 : vector<1x128x32xf32> to vector<128x32xf32>
    %cst_39 = arith.constant dense<0.000000e+00> : vector<32x32xf32>
    %50 = tpu.matmul %46, %49, %cst_39 {dimension_numbers = #tpu.dot_dimension_numbers<[1], [0], [0], [1], [0, 0, 1, 1], [], []>} : vector<32x128xf32>, vector<128x32xf32>, vector<32x32xf32> -> vector<32x32xf32>
    %c0_40 = arith.constant 0 : index
    %c0_41 = arith.constant 0 : index
    %c0_42 = arith.constant 0 : index
    %51 = vector.load %arg10[%c0_40, %c0_41, %c0_42] : memref<4x1x32xf32, #tpu.memory_space<vmem>>, vector<1x1x32xf32>
    %52 = vector.shape_cast %51 : vector<1x1x32xf32> to vector<1x32xf32>
    %53 = vector.broadcast %52 : vector<1x32xf32> to vector<32x32xf32>
    %54 = arith.addf %50, %53 : vector<32x32xf32>
    %cst_43 = arith.constant 0.176776692 : f32
    %55 = vector.broadcast %cst_43 : f32 to vector<32x32xf32>
    %56 = arith.mulf %54, %55 : vector<32x32xf32>
    %c0_44 = arith.constant 0 : index
    %c0_45 = arith.constant 0 : index
    %c0_46 = arith.constant 0 : index
    %57 = vector.load %arg11[%c0_44, %c0_45, %c0_46] : memref<4x128x32xf32, #tpu.memory_space<vmem>>, vector<1x128x32xf32>
    %58 = vector.shape_cast %57 : vector<1x128x32xf32> to vector<128x32xf32>
    %cst_47 = arith.constant dense<0.000000e+00> : vector<32x32xf32>
    %59 = tpu.matmul %46, %58, %cst_47 {dimension_numbers = #tpu.dot_dimension_numbers<[1], [0], [0], [1], [0, 0, 1, 1], [], []>} : vector<32x128xf32>, vector<128x32xf32>, vector<32x32xf32> -> vector<32x32xf32>
    %c0_48 = arith.constant 0 : index
    %c0_49 = arith.constant 0 : index
    %c0_50 = arith.constant 0 : index
    %60 = vector.load %arg12[%c0_48, %c0_49, %c0_50] : memref<4x1x32xf32, #tpu.memory_space<vmem>>, vector<1x1x32xf32>
    %61 = vector.shape_cast %60 : vector<1x1x32xf32> to vector<1x32xf32>
    %62 = vector.broadcast %61 : vector<1x32xf32> to vector<32x32xf32>
    %63 = arith.addf %59, %62 : vector<32x32xf32>
    %c0_51 = arith.constant 0 : index
    %c0_52 = arith.constant 0 : index
    %c0_53 = arith.constant 0 : index
    %64 = vector.load %arg13[%c0_51, %c0_52, %c0_53] : memref<4x128x32xf32, #tpu.memory_space<vmem>>, vector<1x128x32xf32>
    %65 = vector.shape_cast %64 : vector<1x128x32xf32> to vector<128x32xf32>
    %cst_54 = arith.constant dense<0.000000e+00> : vector<32x32xf32>
    %66 = tpu.matmul %46, %65, %cst_54 {dimension_numbers = #tpu.dot_dimension_numbers<[1], [0], [0], [1], [0, 0, 1, 1], [], []>} : vector<32x128xf32>, vector<128x32xf32>, vector<32x32xf32> -> vector<32x32xf32>
    %c0_55 = arith.constant 0 : index
    %c0_56 = arith.constant 0 : index
    %c0_57 = arith.constant 0 : index
    %67 = vector.load %arg14[%c0_55, %c0_56, %c0_57] : memref<4x1x32xf32, #tpu.memory_space<vmem>>, vector<1x1x32xf32>
    %68 = vector.shape_cast %67 : vector<1x1x32xf32> to vector<1x32xf32>
    %69 = vector.broadcast %68 : vector<1x32xf32> to vector<32x32xf32>
    %70 = arith.addf %66, %69 : vector<32x32xf32>
    %71 = vector.shape_cast %56 : vector<32x32xf32> to vector<2x16x32xf32>
    %72 = vector.shape_cast %63 : vector<32x32xf32> to vector<2x16x32xf32>
    %73 = vector.shape_cast %70 : vector<32x32xf32> to vector<2x16x32xf32>
    "tpu.trace_start"() <{level = 10 : i32, message = "bnd,bmd->bnm"}> : () -> ()
    %cst_58 = arith.constant dense<0.000000e+00> : vector<2x16x16xf32>
    %74 = tpu.matmul %71, %72, %cst_58 {dimension_numbers = #tpu.dot_dimension_numbers<[2], [2], [1], [1], [0, 0, 0, 1, 1, 1], [0], [0]>} : vector<2x16x32xf32>, vector<2x16x32xf32>, vector<2x16x16xf32> -> vector<2x16x16xf32>
    "tpu.trace_stop"() : () -> ()
    %cst_59 = arith.constant dense<0xFF800000> : vector<2x16xf32>
    %75 = vector.multi_reduction <maximumf>, %74, %cst_59 [2] : vector<2x16x16xf32> to vector<2x16xf32>
    %76 = vector.shape_cast %75 : vector<2x16xf32> to vector<2x16x1xf32>
    %77 = vector.broadcast %76 : vector<2x16x1xf32> to vector<2x16x16xf32>
    %78 = arith.subf %74, %77 : vector<2x16x16xf32>
    %79 = math.exp %78 : vector<2x16x16xf32>
    %cst_60 = arith.constant dense<0.000000e+00> : vector<2x16xf32>
    %80 = vector.multi_reduction <add>, %79, %cst_60 [2] : vector<2x16x16xf32> to vector<2x16xf32>
    %81 = vector.shape_cast %80 : vector<2x16xf32> to vector<2x16x1xf32>
    %82 = tpu.reciprocal %81 {approx = true} : vector<2x16x1xf32> -> vector<2x16x1xf32>
    %83 = vector.broadcast %82 : vector<2x16x1xf32> to vector<2x16x16xf32>
    %84 = arith.mulf %79, %83 : vector<2x16x16xf32>
    "tpu.trace_start"() <{level = 10 : i32, message = "bnm,bmd->bnd"}> : () -> ()
    %cst_61 = arith.constant dense<0.000000e+00> : vector<2x16x32xf32>
    %85 = tpu.matmul %84, %73, %cst_61 {dimension_numbers = #tpu.dot_dimension_numbers<[2], [1], [1], [2], [0, 0, 0, 1, 1, 2], [0], [0]>} : vector<2x16x16xf32>, vector<2x16x32xf32>, vector<2x16x32xf32> -> vector<2x16x32xf32>
    "tpu.trace_stop"() : () -> ()
    %86 = vector.shape_cast %85 : vector<2x16x32xf32> to vector<32x32xf32>
    %c0_62 = arith.constant 0 : index
    %c0_63 = arith.constant 0 : index
    %c0_64 = arith.constant 0 : index
    %87 = vector.load %arg15[%c0_62, %c0_63, %c0_64] : memref<4x32x128xf32, #tpu.memory_space<vmem>>, vector<1x32x128xf32>
    %88 = vector.shape_cast %87 : vector<1x32x128xf32> to vector<32x128xf32>
    %cst_65 = arith.constant dense<0.000000e+00> : vector<32x128xf32>
    %89 = tpu.matmul %86, %88, %cst_65 {dimension_numbers = #tpu.dot_dimension_numbers<[1], [0], [0], [1], [0, 0, 1, 1], [], []>} : vector<32x32xf32>, vector<32x128xf32>, vector<32x128xf32> -> vector<32x128xf32>
    %90 = arith.addf %47, %89 : vector<32x128xf32>
    %c1 = arith.constant 1 : index
    %c0_66 = arith.constant 0 : index
    %c0_67 = arith.constant 0 : index
    %91 = vector.load %arg9[%c1, %c0_66, %c0_67] : memref<4x128x32xf32, #tpu.memory_space<vmem>>, vector<1x128x32xf32>
    %92 = vector.shape_cast %91 : vector<1x128x32xf32> to vector<128x32xf32>
    %cst_68 = arith.constant dense<0.000000e+00> : vector<32x32xf32>
    %93 = tpu.matmul %46, %92, %cst_68 {dimension_numbers = #tpu.dot_dimension_numbers<[1], [0], [0], [1], [0, 0, 1, 1], [], []>} : vector<32x128xf32>, vector<128x32xf32>, vector<32x32xf32> -> vector<32x32xf32>
    %c1_69 = arith.constant 1 : index
    %c0_70 = arith.constant 0 : index
    %c0_71 = arith.constant 0 : index
    %94 = vector.load %arg10[%c1_69, %c0_70, %c0_71] : memref<4x1x32xf32, #tpu.memory_space<vmem>>, vector<1x1x32xf32>
    %95 = vector.shape_cast %94 : vector<1x1x32xf32> to vector<1x32xf32>
    %96 = vector.broadcast %95 : vector<1x32xf32> to vector<32x32xf32>
    %97 = arith.addf %93, %96 : vector<32x32xf32>
    %cst_72 = arith.constant 0.176776692 : f32
    %98 = vector.broadcast %cst_72 : f32 to vector<32x32xf32>
    %99 = arith.mulf %97, %98 : vector<32x32xf32>
    %c1_73 = arith.constant 1 : index
    %c0_74 = arith.constant 0 : index
    %c0_75 = arith.constant 0 : index
    %100 = vector.load %arg11[%c1_73, %c0_74, %c0_75] : memref<4x128x32xf32, #tpu.memory_space<vmem>>, vector<1x128x32xf32>
    %101 = vector.shape_cast %100 : vector<1x128x32xf32> to vector<128x32xf32>
    %cst_76 = arith.constant dense<0.000000e+00> : vector<32x32xf32>
    %102 = tpu.matmul %46, %101, %cst_76 {dimension_numbers = #tpu.dot_dimension_numbers<[1], [0], [0], [1], [0, 0, 1, 1], [], []>} : vector<32x128xf32>, vector<128x32xf32>, vector<32x32xf32> -> vector<32x32xf32>
    %c1_77 = arith.constant 1 : index
    %c0_78 = arith.constant 0 : index
    %c0_79 = arith.constant 0 : index
    %103 = vector.load %arg12[%c1_77, %c0_78, %c0_79] : memref<4x1x32xf32, #tpu.memory_space<vmem>>, vector<1x1x32xf32>
    %104 = vector.shape_cast %103 : vector<1x1x32xf32> to vector<1x32xf32>
    %105 = vector.broadcast %104 : vector<1x32xf32> to vector<32x32xf32>
    %106 = arith.addf %102, %105 : vector<32x32xf32>
    %c1_80 = arith.constant 1 : index
    %c0_81 = arith.constant 0 : index
    %c0_82 = arith.constant 0 : index
    %107 = vector.load %arg13[%c1_80, %c0_81, %c0_82] : memref<4x128x32xf32, #tpu.memory_space<vmem>>, vector<1x128x32xf32>
    %108 = vector.shape_cast %107 : vector<1x128x32xf32> to vector<128x32xf32>
    %cst_83 = arith.constant dense<0.000000e+00> : vector<32x32xf32>
    %109 = tpu.matmul %46, %108, %cst_83 {dimension_numbers = #tpu.dot_dimension_numbers<[1], [0], [0], [1], [0, 0, 1, 1], [], []>} : vector<32x128xf32>, vector<128x32xf32>, vector<32x32xf32> -> vector<32x32xf32>
    %c1_84 = arith.constant 1 : index
    %c0_85 = arith.constant 0 : index
    %c0_86 = arith.constant 0 : index
    %110 = vector.load %arg14[%c1_84, %c0_85, %c0_86] : memref<4x1x32xf32, #tpu.memory_space<vmem>>, vector<1x1x32xf32>
    %111 = vector.shape_cast %110 : vector<1x1x32xf32> to vector<1x32xf32>
    %112 = vector.broadcast %111 : vector<1x32xf32> to vector<32x32xf32>
    %113 = arith.addf %109, %112 : vector<32x32xf32>
    %114 = vector.shape_cast %99 : vector<32x32xf32> to vector<2x16x32xf32>
    %115 = vector.shape_cast %106 : vector<32x32xf32> to vector<2x16x32xf32>
    %116 = vector.shape_cast %113 : vector<32x32xf32> to vector<2x16x32xf32>
    "tpu.trace_start"() <{level = 10 : i32, message = "bnd,bmd->bnm"}> : () -> ()
    %cst_87 = arith.constant dense<0.000000e+00> : vector<2x16x16xf32>
    %117 = tpu.matmul %114, %115, %cst_87 {dimension_numbers = #tpu.dot_dimension_numbers<[2], [2], [1], [1], [0, 0, 0, 1, 1, 1], [0], [0]>} : vector<2x16x32xf32>, vector<2x16x32xf32>, vector<2x16x16xf32> -> vector<2x16x16xf32>
    "tpu.trace_stop"() : () -> ()
    %cst_88 = arith.constant dense<0xFF800000> : vector<2x16xf32>
    %118 = vector.multi_reduction <maximumf>, %117, %cst_88 [2] : vector<2x16x16xf32> to vector<2x16xf32>
    %119 = vector.shape_cast %118 : vector<2x16xf32> to vector<2x16x1xf32>
    %120 = vector.broadcast %119 : vector<2x16x1xf32> to vector<2x16x16xf32>
    %121 = arith.subf %117, %120 : vector<2x16x16xf32>
    %122 = math.exp %121 : vector<2x16x16xf32>
    %cst_89 = arith.constant dense<0.000000e+00> : vector<2x16xf32>
    %123 = vector.multi_reduction <add>, %122, %cst_89 [2] : vector<2x16x16xf32> to vector<2x16xf32>
    %124 = vector.shape_cast %123 : vector<2x16xf32> to vector<2x16x1xf32>
    %125 = tpu.reciprocal %124 {approx = true} : vector<2x16x1xf32> -> vector<2x16x1xf32>
    %126 = vector.broadcast %125 : vector<2x16x1xf32> to vector<2x16x16xf32>
    %127 = arith.mulf %122, %126 : vector<2x16x16xf32>
    "tpu.trace_start"() <{level = 10 : i32, message = "bnm,bmd->bnd"}> : () -> ()
    %cst_90 = arith.constant dense<0.000000e+00> : vector<2x16x32xf32>
    %128 = tpu.matmul %127, %116, %cst_90 {dimension_numbers = #tpu.dot_dimension_numbers<[2], [1], [1], [2], [0, 0, 0, 1, 1, 2], [0], [0]>} : vector<2x16x16xf32>, vector<2x16x32xf32>, vector<2x16x32xf32> -> vector<2x16x32xf32>
    "tpu.trace_stop"() : () -> ()
    %129 = vector.shape_cast %128 : vector<2x16x32xf32> to vector<32x32xf32>
    %c1_91 = arith.constant 1 : index
    %c0_92 = arith.constant 0 : index
    %c0_93 = arith.constant 0 : index
    %130 = vector.load %arg15[%c1_91, %c0_92, %c0_93] : memref<4x32x128xf32, #tpu.memory_space<vmem>>, vector<1x32x128xf32>
    %131 = vector.shape_cast %130 : vector<1x32x128xf32> to vector<32x128xf32>
    %cst_94 = arith.constant dense<0.000000e+00> : vector<32x128xf32>
    %132 = tpu.matmul %129, %131, %cst_94 {dimension_numbers = #tpu.dot_dimension_numbers<[1], [0], [0], [1], [0, 0, 1, 1], [], []>} : vector<32x32xf32>, vector<32x128xf32>, vector<32x128xf32> -> vector<32x128xf32>
    %133 = arith.addf %90, %132 : vector<32x128xf32>
    %c2 = arith.constant 2 : index
    %c0_95 = arith.constant 0 : index
    %c0_96 = arith.constant 0 : index
    %134 = vector.load %arg9[%c2, %c0_95, %c0_96] : memref<4x128x32xf32, #tpu.memory_space<vmem>>, vector<1x128x32xf32>
    %135 = vector.shape_cast %134 : vector<1x128x32xf32> to vector<128x32xf32>
    %cst_97 = arith.constant dense<0.000000e+00> : vector<32x32xf32>
    %136 = tpu.matmul %46, %135, %cst_97 {dimension_numbers = #tpu.dot_dimension_numbers<[1], [0], [0], [1], [0, 0, 1, 1], [], []>} : vector<32x128xf32>, vector<128x32xf32>, vector<32x32xf32> -> vector<32x32xf32>
    %c2_98 = arith.constant 2 : index
    %c0_99 = arith.constant 0 : index
    %c0_100 = arith.constant 0 : index
    %137 = vector.load %arg10[%c2_98, %c0_99, %c0_100] : memref<4x1x32xf32, #tpu.memory_space<vmem>>, vector<1x1x32xf32>
    %138 = vector.shape_cast %137 : vector<1x1x32xf32> to vector<1x32xf32>
    %139 = vector.broadcast %138 : vector<1x32xf32> to vector<32x32xf32>
    %140 = arith.addf %136, %139 : vector<32x32xf32>
    %cst_101 = arith.constant 0.176776692 : f32
    %141 = vector.broadcast %cst_101 : f32 to vector<32x32xf32>
    %142 = arith.mulf %140, %141 : vector<32x32xf32>
    %c2_102 = arith.constant 2 : index
    %c0_103 = arith.constant 0 : index
    %c0_104 = arith.constant 0 : index
    %143 = vector.load %arg11[%c2_102, %c0_103, %c0_104] : memref<4x128x32xf32, #tpu.memory_space<vmem>>, vector<1x128x32xf32>
    %144 = vector.shape_cast %143 : vector<1x128x32xf32> to vector<128x32xf32>
    %cst_105 = arith.constant dense<0.000000e+00> : vector<32x32xf32>
    %145 = tpu.matmul %46, %144, %cst_105 {dimension_numbers = #tpu.dot_dimension_numbers<[1], [0], [0], [1], [0, 0, 1, 1], [], []>} : vector<32x128xf32>, vector<128x32xf32>, vector<32x32xf32> -> vector<32x32xf32>
    %c2_106 = arith.constant 2 : index
    %c0_107 = arith.constant 0 : index
    %c0_108 = arith.constant 0 : index
    %146 = vector.load %arg12[%c2_106, %c0_107, %c0_108] : memref<4x1x32xf32, #tpu.memory_space<vmem>>, vector<1x1x32xf32>
    %147 = vector.shape_cast %146 : vector<1x1x32xf32> to vector<1x32xf32>
    %148 = vector.broadcast %147 : vector<1x32xf32> to vector<32x32xf32>
    %149 = arith.addf %145, %148 : vector<32x32xf32>
    %c2_109 = arith.constant 2 : index
    %c0_110 = arith.constant 0 : index
    %c0_111 = arith.constant 0 : index
    %150 = vector.load %arg13[%c2_109, %c0_110, %c0_111] : memref<4x128x32xf32, #tpu.memory_space<vmem>>, vector<1x128x32xf32>
    %151 = vector.shape_cast %150 : vector<1x128x32xf32> to vector<128x32xf32>
    %cst_112 = arith.constant dense<0.000000e+00> : vector<32x32xf32>
    %152 = tpu.matmul %46, %151, %cst_112 {dimension_numbers = #tpu.dot_dimension_numbers<[1], [0], [0], [1], [0, 0, 1, 1], [], []>} : vector<32x128xf32>, vector<128x32xf32>, vector<32x32xf32> -> vector<32x32xf32>
    %c2_113 = arith.constant 2 : index
    %c0_114 = arith.constant 0 : index
    %c0_115 = arith.constant 0 : index
    %153 = vector.load %arg14[%c2_113, %c0_114, %c0_115] : memref<4x1x32xf32, #tpu.memory_space<vmem>>, vector<1x1x32xf32>
    %154 = vector.shape_cast %153 : vector<1x1x32xf32> to vector<1x32xf32>
    %155 = vector.broadcast %154 : vector<1x32xf32> to vector<32x32xf32>
    %156 = arith.addf %152, %155 : vector<32x32xf32>
    %157 = vector.shape_cast %142 : vector<32x32xf32> to vector<2x16x32xf32>
    %158 = vector.shape_cast %149 : vector<32x32xf32> to vector<2x16x32xf32>
    %159 = vector.shape_cast %156 : vector<32x32xf32> to vector<2x16x32xf32>
    "tpu.trace_start"() <{level = 10 : i32, message = "bnd,bmd->bnm"}> : () -> ()
    %cst_116 = arith.constant dense<0.000000e+00> : vector<2x16x16xf32>
    %160 = tpu.matmul %157, %158, %cst_116 {dimension_numbers = #tpu.dot_dimension_numbers<[2], [2], [1], [1], [0, 0, 0, 1, 1, 1], [0], [0]>} : vector<2x16x32xf32>, vector<2x16x32xf32>, vector<2x16x16xf32> -> vector<2x16x16xf32>
    "tpu.trace_stop"() : () -> ()
    %cst_117 = arith.constant dense<0xFF800000> : vector<2x16xf32>
    %161 = vector.multi_reduction <maximumf>, %160, %cst_117 [2] : vector<2x16x16xf32> to vector<2x16xf32>
    %162 = vector.shape_cast %161 : vector<2x16xf32> to vector<2x16x1xf32>
    %163 = vector.broadcast %162 : vector<2x16x1xf32> to vector<2x16x16xf32>
    %164 = arith.subf %160, %163 : vector<2x16x16xf32>
    %165 = math.exp %164 : vector<2x16x16xf32>
    %cst_118 = arith.constant dense<0.000000e+00> : vector<2x16xf32>
    %166 = vector.multi_reduction <add>, %165, %cst_118 [2] : vector<2x16x16xf32> to vector<2x16xf32>
    %167 = vector.shape_cast %166 : vector<2x16xf32> to vector<2x16x1xf32>
    %168 = tpu.reciprocal %167 {approx = true} : vector<2x16x1xf32> -> vector<2x16x1xf32>
    %169 = vector.broadcast %168 : vector<2x16x1xf32> to vector<2x16x16xf32>
    %170 = arith.mulf %165, %169 : vector<2x16x16xf32>
    "tpu.trace_start"() <{level = 10 : i32, message = "bnm,bmd->bnd"}> : () -> ()
    %cst_119 = arith.constant dense<0.000000e+00> : vector<2x16x32xf32>
    %171 = tpu.matmul %170, %159, %cst_119 {dimension_numbers = #tpu.dot_dimension_numbers<[2], [1], [1], [2], [0, 0, 0, 1, 1, 2], [0], [0]>} : vector<2x16x16xf32>, vector<2x16x32xf32>, vector<2x16x32xf32> -> vector<2x16x32xf32>
    "tpu.trace_stop"() : () -> ()
    %172 = vector.shape_cast %171 : vector<2x16x32xf32> to vector<32x32xf32>
    %c2_120 = arith.constant 2 : index
    %c0_121 = arith.constant 0 : index
    %c0_122 = arith.constant 0 : index
    %173 = vector.load %arg15[%c2_120, %c0_121, %c0_122] : memref<4x32x128xf32, #tpu.memory_space<vmem>>, vector<1x32x128xf32>
    %174 = vector.shape_cast %173 : vector<1x32x128xf32> to vector<32x128xf32>
    %cst_123 = arith.constant dense<0.000000e+00> : vector<32x128xf32>
    %175 = tpu.matmul %172, %174, %cst_123 {dimension_numbers = #tpu.dot_dimension_numbers<[1], [0], [0], [1], [0, 0, 1, 1], [], []>} : vector<32x32xf32>, vector<32x128xf32>, vector<32x128xf32> -> vector<32x128xf32>
    %176 = arith.addf %133, %175 : vector<32x128xf32>
    %c3 = arith.constant 3 : index
    %c0_124 = arith.constant 0 : index
    %c0_125 = arith.constant 0 : index
    %177 = vector.load %arg9[%c3, %c0_124, %c0_125] : memref<4x128x32xf32, #tpu.memory_space<vmem>>, vector<1x128x32xf32>
    %178 = vector.shape_cast %177 : vector<1x128x32xf32> to vector<128x32xf32>
    %cst_126 = arith.constant dense<0.000000e+00> : vector<32x32xf32>
    %179 = tpu.matmul %46, %178, %cst_126 {dimension_numbers = #tpu.dot_dimension_numbers<[1], [0], [0], [1], [0, 0, 1, 1], [], []>} : vector<32x128xf32>, vector<128x32xf32>, vector<32x32xf32> -> vector<32x32xf32>
    %c3_127 = arith.constant 3 : index
    %c0_128 = arith.constant 0 : index
    %c0_129 = arith.constant 0 : index
    %180 = vector.load %arg10[%c3_127, %c0_128, %c0_129] : memref<4x1x32xf32, #tpu.memory_space<vmem>>, vector<1x1x32xf32>
    %181 = vector.shape_cast %180 : vector<1x1x32xf32> to vector<1x32xf32>
    %182 = vector.broadcast %181 : vector<1x32xf32> to vector<32x32xf32>
    %183 = arith.addf %179, %182 : vector<32x32xf32>
    %cst_130 = arith.constant 0.176776692 : f32
    %184 = vector.broadcast %cst_130 : f32 to vector<32x32xf32>
    %185 = arith.mulf %183, %184 : vector<32x32xf32>
    %c3_131 = arith.constant 3 : index
    %c0_132 = arith.constant 0 : index
    %c0_133 = arith.constant 0 : index
    %186 = vector.load %arg11[%c3_131, %c0_132, %c0_133] : memref<4x128x32xf32, #tpu.memory_space<vmem>>, vector<1x128x32xf32>
    %187 = vector.shape_cast %186 : vector<1x128x32xf32> to vector<128x32xf32>
    %cst_134 = arith.constant dense<0.000000e+00> : vector<32x32xf32>
    %188 = tpu.matmul %46, %187, %cst_134 {dimension_numbers = #tpu.dot_dimension_numbers<[1], [0], [0], [1], [0, 0, 1, 1], [], []>} : vector<32x128xf32>, vector<128x32xf32>, vector<32x32xf32> -> vector<32x32xf32>
    %c3_135 = arith.constant 3 : index
    %c0_136 = arith.constant 0 : index
    %c0_137 = arith.constant 0 : index
    %189 = vector.load %arg12[%c3_135, %c0_136, %c0_137] : memref<4x1x32xf32, #tpu.memory_space<vmem>>, vector<1x1x32xf32>
    %190 = vector.shape_cast %189 : vector<1x1x32xf32> to vector<1x32xf32>
    %191 = vector.broadcast %190 : vector<1x32xf32> to vector<32x32xf32>
    %192 = arith.addf %188, %191 : vector<32x32xf32>
    %c3_138 = arith.constant 3 : index
    %c0_139 = arith.constant 0 : index
    %c0_140 = arith.constant 0 : index
    %193 = vector.load %arg13[%c3_138, %c0_139, %c0_140] : memref<4x128x32xf32, #tpu.memory_space<vmem>>, vector<1x128x32xf32>
    %194 = vector.shape_cast %193 : vector<1x128x32xf32> to vector<128x32xf32>
    %cst_141 = arith.constant dense<0.000000e+00> : vector<32x32xf32>
    %195 = tpu.matmul %46, %194, %cst_141 {dimension_numbers = #tpu.dot_dimension_numbers<[1], [0], [0], [1], [0, 0, 1, 1], [], []>} : vector<32x128xf32>, vector<128x32xf32>, vector<32x32xf32> -> vector<32x32xf32>
    %c3_142 = arith.constant 3 : index
    %c0_143 = arith.constant 0 : index
    %c0_144 = arith.constant 0 : index
    %196 = vector.load %arg14[%c3_142, %c0_143, %c0_144] : memref<4x1x32xf32, #tpu.memory_space<vmem>>, vector<1x1x32xf32>
    %197 = vector.shape_cast %196 : vector<1x1x32xf32> to vector<1x32xf32>
    %198 = vector.broadcast %197 : vector<1x32xf32> to vector<32x32xf32>
    %199 = arith.addf %195, %198 : vector<32x32xf32>
    %200 = vector.shape_cast %185 : vector<32x32xf32> to vector<2x16x32xf32>
    %201 = vector.shape_cast %192 : vector<32x32xf32> to vector<2x16x32xf32>
    %202 = vector.shape_cast %199 : vector<32x32xf32> to vector<2x16x32xf32>
    "tpu.trace_start"() <{level = 10 : i32, message = "bnd,bmd->bnm"}> : () -> ()
    %cst_145 = arith.constant dense<0.000000e+00> : vector<2x16x16xf32>
    %203 = tpu.matmul %200, %201, %cst_145 {dimension_numbers = #tpu.dot_dimension_numbers<[2], [2], [1], [1], [0, 0, 0, 1, 1, 1], [0], [0]>} : vector<2x16x32xf32>, vector<2x16x32xf32>, vector<2x16x16xf32> -> vector<2x16x16xf32>
    "tpu.trace_stop"() : () -> ()
    %cst_146 = arith.constant dense<0xFF800000> : vector<2x16xf32>
    %204 = vector.multi_reduction <maximumf>, %203, %cst_146 [2] : vector<2x16x16xf32> to vector<2x16xf32>
    %205 = vector.shape_cast %204 : vector<2x16xf32> to vector<2x16x1xf32>
    %206 = vector.broadcast %205 : vector<2x16x1xf32> to vector<2x16x16xf32>
    %207 = arith.subf %203, %206 : vector<2x16x16xf32>
    %208 = math.exp %207 : vector<2x16x16xf32>
    %cst_147 = arith.constant dense<0.000000e+00> : vector<2x16xf32>
    %209 = vector.multi_reduction <add>, %208, %cst_147 [2] : vector<2x16x16xf32> to vector<2x16xf32>
    %210 = vector.shape_cast %209 : vector<2x16xf32> to vector<2x16x1xf32>
    %211 = tpu.reciprocal %210 {approx = true} : vector<2x16x1xf32> -> vector<2x16x1xf32>
    %212 = vector.broadcast %211 : vector<2x16x1xf32> to vector<2x16x16xf32>
    %213 = arith.mulf %208, %212 : vector<2x16x16xf32>
    "tpu.trace_start"() <{level = 10 : i32, message = "bnm,bmd->bnd"}> : () -> ()
    %cst_148 = arith.constant dense<0.000000e+00> : vector<2x16x32xf32>
    %214 = tpu.matmul %213, %202, %cst_148 {dimension_numbers = #tpu.dot_dimension_numbers<[2], [1], [1], [2], [0, 0, 0, 1, 1, 2], [0], [0]>} : vector<2x16x16xf32>, vector<2x16x32xf32>, vector<2x16x32xf32> -> vector<2x16x32xf32>
    "tpu.trace_stop"() : () -> ()
    %215 = vector.shape_cast %214 : vector<2x16x32xf32> to vector<32x32xf32>
    %c3_149 = arith.constant 3 : index
    %c0_150 = arith.constant 0 : index
    %c0_151 = arith.constant 0 : index
    %216 = vector.load %arg15[%c3_149, %c0_150, %c0_151] : memref<4x32x128xf32, #tpu.memory_space<vmem>>, vector<1x32x128xf32>
    %217 = vector.shape_cast %216 : vector<1x32x128xf32> to vector<32x128xf32>
    %cst_152 = arith.constant dense<0.000000e+00> : vector<32x128xf32>
    %218 = tpu.matmul %215, %217, %cst_152 {dimension_numbers = #tpu.dot_dimension_numbers<[1], [0], [0], [1], [0, 0, 1, 1], [], []>} : vector<32x32xf32>, vector<32x128xf32>, vector<32x128xf32> -> vector<32x128xf32>
    %219 = arith.addf %176, %218 : vector<32x128xf32>
    %220 = arith.addf %22, %219 : vector<32x128xf32>
    %c0_153 = arith.constant 0 : index
    %c0_154 = arith.constant 0 : index
    %221 = vector.load %arg16[%c0_153, %c0_154] : memref<1x128xf32, #tpu.memory_space<vmem>>, vector<1x128xf32>
    %222 = vector.broadcast %221 : vector<1x128xf32> to vector<32x128xf32>
    %223 = arith.addf %220, %222 : vector<32x128xf32>
    %c0_155 = arith.constant 0 : index
    %c0_156 = arith.constant 0 : index
    %224 = vector.load %arg17[%c0_155, %c0_156] : memref<1x128xf32, #tpu.memory_space<vmem>>, vector<1x128xf32>
    %c0_157 = arith.constant 0 : index
    %c0_158 = arith.constant 0 : index
    %225 = vector.load %arg18[%c0_157, %c0_158] : memref<1x128xf32, #tpu.memory_space<vmem>>, vector<1x128xf32>
    %cst_159 = arith.constant dense<0.000000e+00> : vector<32xf32>
    %226 = vector.multi_reduction <add>, %223, %cst_159 [1] : vector<32x128xf32> to vector<32xf32>
    %227 = vector.shape_cast %226 : vector<32xf32> to vector<32x1xf32>
    %cst_160 = arith.constant 1.280000e+02 : f32
    %228 = vector.broadcast %cst_160 : f32 to vector<32x1xf32>
    %229 = arith.divf %227, %228 : vector<32x1xf32>
    %230 = vector.broadcast %229 : vector<32x1xf32> to vector<32x128xf32>
    %231 = arith.subf %223, %230 : vector<32x128xf32>
    %232 = arith.mulf %231, %231 : vector<32x128xf32>
    %cst_161 = arith.constant dense<0.000000e+00> : vector<32xf32>
    %233 = vector.multi_reduction <add>, %232, %cst_161 [1] : vector<32x128xf32> to vector<32xf32>
    %234 = vector.shape_cast %233 : vector<32xf32> to vector<32x1xf32>
    %cst_162 = arith.constant 1.280000e+02 : f32
    %235 = vector.broadcast %cst_162 : f32 to vector<32x1xf32>
    %236 = arith.divf %234, %235 : vector<32x1xf32>
    %237 = vector.broadcast %229 : vector<32x1xf32> to vector<32x128xf32>
    %238 = arith.subf %223, %237 : vector<32x128xf32>
    %cst_163 = arith.constant 9.99999997E-7 : f32
    %239 = vector.broadcast %cst_163 : f32 to vector<32x1xf32>
    %240 = arith.addf %236, %239 : vector<32x1xf32>
    %241 = math.rsqrt %240 : vector<32x1xf32>
    %242 = vector.broadcast %241 : vector<32x1xf32> to vector<32x128xf32>
    %243 = arith.mulf %238, %242 : vector<32x128xf32>
    %244 = vector.broadcast %224 : vector<1x128xf32> to vector<32x128xf32>
    %245 = arith.mulf %243, %244 : vector<32x128xf32>
    %246 = vector.broadcast %225 : vector<1x128xf32> to vector<32x128xf32>
    %247 = arith.addf %245, %246 : vector<32x128xf32>
    %c0_164 = arith.constant 0 : index
    %c0_165 = arith.constant 0 : index
    %248 = vector.load %arg19[%c0_164, %c0_165] : memref<128x512xf32, #tpu.memory_space<vmem>>, vector<128x512xf32>
    %cst_166 = arith.constant dense<0.000000e+00> : vector<32x512xf32>
    %249 = tpu.matmul %247, %248, %cst_166 {dimension_numbers = #tpu.dot_dimension_numbers<[1], [0], [0], [1], [0, 0, 1, 1], [], []>} : vector<32x128xf32>, vector<128x512xf32>, vector<32x512xf32> -> vector<32x512xf32>
    %c0_167 = arith.constant 0 : index
    %c0_168 = arith.constant 0 : index
    %250 = vector.load %arg20[%c0_167, %c0_168] : memref<1x512xf32, #tpu.memory_space<vmem>>, vector<1x512xf32>
    %251 = vector.broadcast %250 : vector<1x512xf32> to vector<32x512xf32>
    %252 = arith.addf %249, %251 : vector<32x512xf32>
    %253 = arith.mulf %252, %252 : vector<32x512xf32>
    %254 = arith.mulf %252, %253 : vector<32x512xf32>
    %cst_169 = arith.constant 4.471500e-02 : f32
    %255 = vector.broadcast %cst_169 : f32 to vector<32x512xf32>
    %256 = arith.mulf %255, %254 : vector<32x512xf32>
    %257 = arith.addf %252, %256 : vector<32x512xf32>
    %cst_170 = arith.constant 0.797884583 : f32
    %258 = vector.broadcast %cst_170 : f32 to vector<32x512xf32>
    %259 = arith.mulf %258, %257 : vector<32x512xf32>
    %260 = math.tanh %259 : vector<32x512xf32>
    %cst_171 = arith.constant 1.000000e+00 : f32
    %261 = vector.broadcast %cst_171 : f32 to vector<32x512xf32>
    %262 = arith.addf %261, %260 : vector<32x512xf32>
    %cst_172 = arith.constant 5.000000e-01 : f32
    %263 = vector.broadcast %cst_172 : f32 to vector<32x512xf32>
    %264 = arith.mulf %263, %262 : vector<32x512xf32>
    %265 = arith.mulf %252, %264 : vector<32x512xf32>
    %c0_173 = arith.constant 0 : index
    %c0_174 = arith.constant 0 : index
    %266 = vector.load %arg21[%c0_173, %c0_174] : memref<512x128xf32, #tpu.memory_space<vmem>>, vector<512x128xf32>
    %cst_175 = arith.constant dense<0.000000e+00> : vector<32x128xf32>
    %267 = tpu.matmul %265, %266, %cst_175 {dimension_numbers = #tpu.dot_dimension_numbers<[1], [0], [0], [1], [0, 0, 1, 1], [], []>} : vector<32x512xf32>, vector<512x128xf32>, vector<32x128xf32> -> vector<32x128xf32>
    %c0_176 = arith.constant 0 : index
    %c0_177 = arith.constant 0 : index
    %268 = vector.load %arg22[%c0_176, %c0_177] : memref<1x128xf32, #tpu.memory_space<vmem>>, vector<1x128xf32>
    %269 = vector.broadcast %268 : vector<1x128xf32> to vector<32x128xf32>
    %270 = arith.addf %267, %269 : vector<32x128xf32>
    %271 = arith.addf %223, %270 : vector<32x128xf32>
    %c0_178 = arith.constant 0 : index
    %c0_179 = arith.constant 0 : index
    %272 = vector.load %arg23[%c0_178, %c0_179] : memref<1x128xf32, #tpu.memory_space<vmem>>, vector<1x128xf32>
    %c0_180 = arith.constant 0 : index
    %c0_181 = arith.constant 0 : index
    %273 = vector.load %arg24[%c0_180, %c0_181] : memref<1x128xf32, #tpu.memory_space<vmem>>, vector<1x128xf32>
    %cst_182 = arith.constant dense<0.000000e+00> : vector<32xf32>
    %274 = vector.multi_reduction <add>, %271, %cst_182 [1] : vector<32x128xf32> to vector<32xf32>
    %275 = vector.shape_cast %274 : vector<32xf32> to vector<32x1xf32>
    %cst_183 = arith.constant 1.280000e+02 : f32
    %276 = vector.broadcast %cst_183 : f32 to vector<32x1xf32>
    %277 = arith.divf %275, %276 : vector<32x1xf32>
    %278 = vector.broadcast %277 : vector<32x1xf32> to vector<32x128xf32>
    %279 = arith.subf %271, %278 : vector<32x128xf32>
    %280 = arith.mulf %279, %279 : vector<32x128xf32>
    %cst_184 = arith.constant dense<0.000000e+00> : vector<32xf32>
    %281 = vector.multi_reduction <add>, %280, %cst_184 [1] : vector<32x128xf32> to vector<32xf32>
    %282 = vector.shape_cast %281 : vector<32xf32> to vector<32x1xf32>
    %cst_185 = arith.constant 1.280000e+02 : f32
    %283 = vector.broadcast %cst_185 : f32 to vector<32x1xf32>
    %284 = arith.divf %282, %283 : vector<32x1xf32>
    %285 = vector.broadcast %277 : vector<32x1xf32> to vector<32x128xf32>
    %286 = arith.subf %271, %285 : vector<32x128xf32>
    %cst_186 = arith.constant 9.99999997E-7 : f32
    %287 = vector.broadcast %cst_186 : f32 to vector<32x1xf32>
    %288 = arith.addf %284, %287 : vector<32x1xf32>
    %289 = math.rsqrt %288 : vector<32x1xf32>
    %290 = vector.broadcast %289 : vector<32x1xf32> to vector<32x128xf32>
    %291 = arith.mulf %286, %290 : vector<32x128xf32>
    %292 = vector.broadcast %272 : vector<1x128xf32> to vector<32x128xf32>
    %293 = arith.mulf %291, %292 : vector<32x128xf32>
    %294 = vector.broadcast %273 : vector<1x128xf32> to vector<32x128xf32>
    %295 = arith.addf %293, %294 : vector<32x128xf32>
    %c0_187 = arith.constant 0 : index
    %c0_188 = arith.constant 0 : index
    %296 = vector.load %arg25[%c0_187, %c0_188] : memref<4x128xf32, #tpu.memory_space<vmem>>, vector<4x128xf32>
    %cst_189 = arith.constant dense<0.000000e+00> : vector<32x4xf32>
    %297 = tpu.matmul %295, %296, %cst_189 {dimension_numbers = #tpu.dot_dimension_numbers<[1], [1], [0], [0], [0, 0, 1, 0], [], []>} : vector<32x128xf32>, vector<4x128xf32>, vector<32x4xf32> -> vector<32x4xf32>
    %298 = vector.shape_cast %297 : vector<32x4xf32> to vector<2x16x4xf32>
    %299 = tpu.iota {dimensions = array<i32: 1>} : vector<2x16x4xi32>
    %300 = tpu.iota {dimensions = array<i32: 2>} : vector<2x16x4xi32>
    %301 = arith.cmpi eq, %299, %300 : vector<2x16x4xi32>
    %cst_190 = arith.constant 0.000000e+00 : f32
    %302 = vector.broadcast %cst_190 : f32 to vector<2x16x4xf32>
    %303 = arith.select %301, %298, %302 : vector<2x16x4xi1>, vector<2x16x4xf32>
    %cst_191 = arith.constant dense<0.000000e+00> : vector<2x4xf32>
    %304 = vector.multi_reduction <add>, %303, %cst_191 [1] : vector<2x16x4xf32> to vector<2x4xf32>
    %c0_192 = arith.constant 0 : index
    %c0_193 = arith.constant 0 : index
    %305 = vector.load %arg26[%c0_192, %c0_193] : memref<1x4xf32, #tpu.memory_space<vmem>>, vector<1x4xf32>
    %306 = vector.broadcast %305 : vector<1x4xf32> to vector<2x4xf32>
    %307 = arith.addf %304, %306 : vector<2x4xf32>
    %c0_194 = arith.constant 0 : index
    %c0_195 = arith.constant 0 : index
    %308 = vector.load %arg28[%c0_194, %c0_195] : memref<1x4xf32, #tpu.memory_space<vmem>>, vector<1x4xf32>
    %cst_196 = arith.constant 9.99999974E-6 : f32
    %309 = vector.broadcast %cst_196 : f32 to vector<1x4xf32>
    %310 = arith.addf %308, %309 : vector<1x4xf32>
    %311 = math.rsqrt %310 : vector<1x4xf32>
    %c0_197 = arith.constant 0 : index
    %c0_198 = arith.constant 0 : index
    %312 = vector.load %arg27[%c0_197, %c0_198] : memref<1x4xf32, #tpu.memory_space<vmem>>, vector<1x4xf32>
    %313 = vector.broadcast %312 : vector<1x4xf32> to vector<2x4xf32>
    %314 = arith.subf %307, %313 : vector<2x4xf32>
    %315 = vector.broadcast %311 : vector<1x4xf32> to vector<2x4xf32>
    %316 = arith.mulf %314, %315 : vector<2x4xf32>
    %c0_199 = arith.constant 0 : index
    %c0_200 = arith.constant 0 : index
    %317 = vector.load %arg29[%c0_199, %c0_200] : memref<1x4xf32, #tpu.memory_space<vmem>>, vector<1x4xf32>
    %318 = vector.broadcast %317 : vector<1x4xf32> to vector<2x4xf32>
    %319 = arith.mulf %316, %318 : vector<2x4xf32>
    %c0_201 = arith.constant 0 : index
    %c0_202 = arith.constant 0 : index
    %320 = vector.load %arg30[%c0_201, %c0_202] : memref<1x4xf32, #tpu.memory_space<vmem>>, vector<1x4xf32>
    %321 = vector.broadcast %320 : vector<1x4xf32> to vector<2x4xf32>
    %322 = arith.addf %319, %321 : vector<2x4xf32>
    %c0_203 = arith.constant 0 : index
    %c0_204 = arith.constant 0 : index
    %323 = vector.load %arg31[%c0_203, %c0_204] : memref<2x4xf32, #tpu.memory_space<vmem>>, vector<2x4xf32>
    tpu.vector_store %arg31[%c0_203, %c0_204], %322 {strides = array<i32>} : memref<2x4xf32, #tpu.memory_space<vmem>>, vector<2x4xf32>,
    return
  }
  func.func @transform_0(%arg0: i32) -> (i32, i32) {
    %c0_i32 = arith.constant 0 : i32
    %c0_i32_0 = arith.constant 0 : i32
    %c0_i32_1 = arith.constant 0 : i32
    return %c0_i32, %c0_i32_0 : i32, i32
  }
  func.func @transform_1(%arg0: i32) -> (i32, i32, i32) {
    %c0_i32 = arith.constant 0 : i32
    %c0_i32_0 = arith.constant 0 : i32
    %c0_i32_1 = arith.constant 0 : i32
    %c0_i32_2 = arith.constant 0 : i32
    return %c0_i32, %c0_i32_0, %c0_i32_1 : i32, i32, i32
  }
  func.func @transform_2(%arg0: i32) -> (i32, i32) {
    %c0_i32 = arith.constant 0 : i32
    %c0_i32_0 = arith.constant 0 : i32
    %c0_i32_1 = arith.constant 0 : i32
    return %c0_i32, %c0_i32_0 : i32, i32
  }
  func.func @transform_3(%arg0: i32) -> (i32, i32) {
    %c0_i32 = arith.constant 0 : i32
    %c0_i32_0 = arith.constant 0 : i32
    %c0_i32_1 = arith.constant 0 : i32
    return %c0_i32, %c0_i32_0 : i32, i32
  }
  func.func @transform_4(%arg0: i32) -> (i32, i32) {
    %c0_i32 = arith.constant 0 : i32
    %c0_i32_0 = arith.constant 0 : i32
    %c0_i32_1 = arith.constant 0 : i32
    return %c0_i32, %c0_i32_0 : i32, i32
  }
  func.func @transform_5(%arg0: i32) -> (i32, i32) {
    %c0_i32 = arith.constant 0 : i32
    %c0_i32_0 = arith.constant 0 : i32
    %c0_i32_1 = arith.constant 0 : i32
    return %c0_i32, %c0_i32_0 : i32, i32
  }
  func.func @transform_6(%arg0: i32) -> (i32, i32) {
    %c0_i32 = arith.constant 0 : i32
    %c0_i32_0 = arith.constant 0 : i32
    %c0_i32_1 = arith.constant 0 : i32
    return %c0_i32, %c0_i32_0 : i32, i32
  }
  func.func @transform_7(%arg0: i32) -> (i32, i32) {
    %c0_i32 = arith.constant 0 : i32
    %c0_i32_0 = arith.constant 0 : i32
    %c0_i32_1 = arith.constant 0 : i32
    return %c0_i32, %c0_i32_0 : i32, i32
  }
  func.func @transform_8(%arg0: i32) -> (i32, i32, i32) {
    %c0_i32 = arith.constant 0 : i32
    %c0_i32_0 = arith.constant 0 : i32
    %c0_i32_1 = arith.constant 0 : i32
    %c0_i32_2 = arith.constant 0 : i32
    return %c0_i32, %c0_i32_0, %c0_i32_1 : i32, i32, i32
  }
  func.func @transform_9(%arg0: i32) -> (i32, i32, i32) {
    %c0_i32 = arith.constant 0 : i32
    %c0_i32_0 = arith.constant 0 : i32
    %c0_i32_1 = arith.constant 0 : i32
    %c0_i32_2 = arith.constant 0 : i32
    return %c0_i32, %c0_i32_0, %c0_i32_1 : i32, i32, i32
  }
  func.func @transform_10(%arg0: i32) -> (i32, i32, i32) {
    %c0_i32 = arith.constant 0 : i32
    %c0_i32_0 = arith.constant 0 : i32
    %c0_i32_1 = arith.constant 0 : i32
    %c0_i32_2 = arith.constant 0 : i32
    return %c0_i32, %c0_i32_0, %c0_i32_1 : i32, i32, i32
  }
  func.func @transform_11(%arg0: i32) -> (i32, i32, i32) {
    %c0_i32 = arith.constant 0 : i32
    %c0_i32_0 = arith.constant 0 : i32
    %c0_i32_1 = arith.constant 0 : i32
    %c0_i32_2 = arith.constant 0 : i32
    return %c0_i32, %c0_i32_0, %c0_i32_1 : i32, i32, i32
  }
  func.func @transform_12(%arg0: i32) -> (i32, i32, i32) {
    %c0_i32 = arith.constant 0 : i32
    %c0_i32_0 = arith.constant 0 : i32
    %c0_i32_1 = arith.constant 0 : i32
    %c0_i32_2 = arith.constant 0 : i32
    return %c0_i32, %c0_i32_0, %c0_i32_1 : i32, i32, i32
  }
  func.func @transform_13(%arg0: i32) -> (i32, i32, i32) {
    %c0_i32 = arith.constant 0 : i32
    %c0_i32_0 = arith.constant 0 : i32
    %c0_i32_1 = arith.constant 0 : i32
    %c0_i32_2 = arith.constant 0 : i32
    return %c0_i32, %c0_i32_0, %c0_i32_1 : i32, i32, i32
  }
  func.func @transform_14(%arg0: i32) -> (i32, i32, i32) {
    %c0_i32 = arith.constant 0 : i32
    %c0_i32_0 = arith.constant 0 : i32
    %c0_i32_1 = arith.constant 0 : i32
    %c0_i32_2 = arith.constant 0 : i32
    return %c0_i32, %c0_i32_0, %c0_i32_1 : i32, i32, i32
  }
  func.func @transform_15(%arg0: i32) -> (i32, i32) {
    %c0_i32 = arith.constant 0 : i32
    %c0_i32_0 = arith.constant 0 : i32
    %c0_i32_1 = arith.constant 0 : i32
    return %c0_i32, %c0_i32_0 : i32, i32
  }
  func.func @transform_16(%arg0: i32) -> (i32, i32) {
    %c0_i32 = arith.constant 0 : i32
    %c0_i32_0 = arith.constant 0 : i32
    %c0_i32_1 = arith.constant 0 : i32
    return %c0_i32, %c0_i32_0 : i32, i32
  }
  func.func @transform_17(%arg0: i32) -> (i32, i32) {
    %c0_i32 = arith.constant 0 : i32
    %c0_i32_0 = arith.constant 0 : i32
    %c0_i32_1 = arith.constant 0 : i32
    return %c0_i32, %c0_i32_0 : i32, i32
  }
  func.func @transform_18(%arg0: i32) -> (i32, i32) {
    %c0_i32 = arith.constant 0 : i32
    %c0_i32_0 = arith.constant 0 : i32
    %c0_i32_1 = arith.constant 0 : i32
    return %c0_i32, %c0_i32_0 : i32, i32
  }
  func.func @transform_19(%arg0: i32) -> (i32, i32) {
    %c0_i32 = arith.constant 0 : i32
    %c0_i32_0 = arith.constant 0 : i32
    %c0_i32_1 = arith.constant 0 : i32
    return %c0_i32, %c0_i32_0 : i32, i32
  }
  func.func @transform_20(%arg0: i32) -> (i32, i32) {
    %c0_i32 = arith.constant 0 : i32
    %c0_i32_0 = arith.constant 0 : i32
    %c0_i32_1 = arith.constant 0 : i32
    return %c0_i32, %c0_i32_0 : i32, i32
  }
  func.func @transform_21(%arg0: i32) -> (i32, i32) {
    %c0_i32 = arith.constant 0 : i32
    %c0_i32_0 = arith.constant 0 : i32
    %c0_i32_1 = arith.constant 0 : i32
    return %c0_i32, %c0_i32_0 : i32, i32
  }
  func.func @transform_22(%arg0: i32) -> (i32, i32) {
    %c0_i32 = arith.constant 0 : i32
    %c0_i32_0 = arith.constant 0 : i32
    %c0_i32_1 = arith.constant 0 : i32
    return %c0_i32, %c0_i32_0 : i32, i32
  }
  func.func @transform_23(%arg0: i32) -> (i32, i32) {
    %c0_i32 = arith.constant 0 : i32
    %c0_i32_0 = arith.constant 0 : i32
    %c0_i32_1 = arith.constant 0 : i32
    return %c0_i32, %c0_i32_0 : i32, i32
  }
  func.func @transform_24(%arg0: i32) -> (i32, i32) {
    %c0_i32 = arith.constant 0 : i32
    %c0_i32_0 = arith.constant 0 : i32
    %c0_i32_1 = arith.constant 0 : i32
    return %c0_i32, %c0_i32_0 : i32, i32
  }
  func.func @transform_25(%arg0: i32) -> (i32, i32) {
    %c0_i32 = arith.constant 0 : i32
    %c0_i32_0 = arith.constant 0 : i32
    %c0_i32_1 = arith.constant 0 : i32
    return %c0_i32, %c0_i32_0 : i32, i32
  }
  func.func @transform_26(%arg0: i32) -> (i32, i32) {
    %c0_i32 = arith.constant 0 : i32
    %c0_i32_0 = arith.constant 0 : i32
    %c0_i32_1 = arith.constant 0 : i32
    return %c0_i32, %c0_i32_0 : i32, i32
  }
  func.func @transform_27(%arg0: i32) -> (i32, i32) {
    %c0_i32 = arith.constant 0 : i32
    %c0_i32_0 = arith.constant 0 : i32
    %c0_i32_1 = arith.constant 0 : i32
    return %c0_i32, %c0_i32_0 : i32, i32
  }
  func.func @transform_28(%arg0: i32) -> (i32, i32) {
    %c0_i32 = arith.constant 0 : i32
    %c0_i32_0 = arith.constant 0 : i32
    %c0_i32_1 = arith.constant 0 : i32
    return %c0_i32, %c0_i32_0 : i32, i32
  }
  func.func @transform_29(%arg0: i32) -> (i32, i32) {
    %c0_i32 = arith.constant 0 : i32
    %c0_i32_0 = arith.constant 0 : i32
    %c0_i32_1 = arith.constant 0 : i32
    return %c0_i32, %c0_i32_0 : i32, i32
  }
  func.func @transform_30(%arg0: i32) -> (i32, i32) {
    %c0_i32 = arith.constant 0 : i32
    %c0_i32_0 = arith.constant 0 : i32
    %c0_i32_1 = arith.constant 0 : i32
    return %c0_i32, %c0_i32_0 : i32, i32
  }
  func.func @transform_31(%arg0: i32) -> (i32, i32, i32) {
    %c0_i32 = arith.constant 0 : i32
    %c0_i32_0 = arith.constant 0 : i32
    %c0_i32_1 = arith.constant 0 : i32
    %c0_i32_2 = arith.constant 0 : i32
    return %c0_i32, %c0_i32_0, %c0_i32_1 : i32, i32, i32
  }
  func.func @transform_32(%arg0: i32) -> (i32, i32, i32) {
    %c0_i32 = arith.constant 0 : i32
    %c0_i32_0 = arith.constant 0 : i32
    %c0_i32_1 = arith.constant 0 : i32
    %c0_i32_2 = arith.constant 0 : i32
    return %c0_i32, %c0_i32_0, %c0_i32_1 : i32, i32, i32
  }
}

</mosaic_0001>

<bundles_post_ra>
// kernel: transformer_classifier_forward.1
= control target key start
LH: loop header
LB: loop body
LE: loop exit
PB: predicated region body
PF: predicated region fallthrough
CT: control target
= control target key end

     0   :  { %s6879_s6 = smov 1   ;;  %s6880_s10 = smov 2   ;;  %s7956_s0 = inlined_call_operand.smem [shape: u32[33], index: -1, kind: input, shape index: {}] }
   0x1   :  { %s6926_s5 = sld [smem:[%s7956_s0]]   ;;  %s6881_s14 = smov 3  }
   0x2   :  { %s6931_s9 = sld [smem:[%s7956_s0 + %s6879_s6]]   ;;  %s6882_s18 = smov 4  }
   0x3   :  { %s6936_s13 = sld [smem:[%s7956_s0 + %s6880_s10]]   ;;  %s6883_s22 = smov 5  }
   0x4   :  { %s6941_s17 = sld [smem:[%s7956_s0 + %s6881_s14]]   ;;  %s6884_s26 = smov 6  }
   0x5   :  { %s6946_s21 = sld [smem:[%s7956_s0 + %s6882_s18]]   ;;  %s6885_s30 = smov 7  }
   0x6   :  { %s6951_s25 = sld [smem:[%s7956_s0 + %s6883_s22]]   ;;  %s6886_s4 = smov 8  }
   0x7   :  { %s6956_s29 = sld [smem:[%s7956_s0 + %s6884_s26]]   ;;  %s6887_s10 = smov 9  }
   0x8   :  { %s6961_s3 = sld [smem:[%s7956_s0 + %s6885_s30]]   ;;  %s6888_s15 = smov 10  }
   0x9   :  { %s6966_s8 = sld [smem:[%s7956_s0 + %s6886_s4]]   ;;  %s6889_s20 = smov 11  }
   0xa   :  { %s6971_s14 = sld [smem:[%s7956_s0 + %s6887_s10]]   ;;  %s6890_s26 = smov 12  }
   0xb   :  { %s6976_s19 = sld [smem:[%s7956_s0 + %s6888_s15]]   ;;  %s6891_s1 = smov 13  }
   0xc   :  { %s6981_s24 = sld [smem:[%s7956_s0 + %s6889_s20]]   ;;  %s6892_s7 = smov 14  }
   0xd   :  { %s6986_s30 = sld [smem:[%s7956_s0 + %s6890_s26]]   ;;  %s6893_s15 = smov 15  }
   0xe   :  { %s6991_s6 = sld [smem:[%s7956_s0 + %s6891_s1]]   ;;  %s6894_s22 = smov 16  }
   0xf   :  { %s6996_s12 = sld [smem:[%s7956_s0 + %s6892_s7]]   ;;  %s6895_s28 = smov 17  }
  0x10   :  { %s7001_s20 = sld [smem:[%s7956_s0 + %s6893_s15]]   ;;  %s6896_s7 = smov 18  }
  0x11   :  { %s7006_s27 = sld [smem:[%s7956_s0 + %s6894_s22]]   ;;  %s6897_s15 = smov 19  }
  0x12   :  { %s7011_s4 = sld [smem:[%s7956_s0 + %s6895_s28]]   ;;  %s6898_s22 = smov 20  }
  0x13   :  { %s6899_s28 = smov 21  }
  0x15   :  { %7960 = sst [smem:[#allocation9_spill]] %s6996_s12 }
  0x16   :  { %7961 = sst [smem:[#allocation10_spill]] %s7001_s20 }
  0x17   :  { %7962 = sst [smem:[#allocation11_spill]] %s7006_s27 }
  0x18   :  { %7963 = sst [smem:[#allocation12_spill]] %s7011_s4 }
  0x19   :  { %s7016_s12 = sld [smem:[%s7956_s0 + %s6896_s7]]   ;;  %s6900_s7 = smov 22  }
  0x1a   :  { %s7021_s20 = sld [smem:[%s7956_s0 + %s6897_s15]]   ;;  %s6901_s15 = smov 23  }
  0x1b   :  { %s7026_s27 = sld [smem:[%s7956_s0 + %s6898_s22]]   ;;  %s6902_s22 = smov 24  }
  0x1c   :  { %s7031_s4 = sld [smem:[%s7956_s0 + %s6899_s28]]   ;;  %s6903_s28 = smov 25  }
  0x1f   :  { %7964 = sst [smem:[#allocation13_spill]] %s7016_s12 }
  0x20   :  { %7965 = sst [smem:[#allocation14_spill]] %s7021_s20 }
  0x21   :  { %7966 = sst [smem:[#allocation15_spill]] %s7026_s27 }
  0x22   :  { %7967 = sst [smem:[#allocation16_spill]] %s7031_s4 }
  0x23   :  { %s7036_s12 = sld [smem:[%s7956_s0 + %s6900_s7]]   ;;  %s6904_s7 = smov 26  }
  0x24   :  { %s7041_s20 = sld [smem:[%s7956_s0 + %s6901_s15]]   ;;  %s6905_s15 = smov 27  }
  0x25   :  { %s7046_s27 = sld [smem:[%s7956_s0 + %s6902_s22]]   ;;  %s6906_s22 = smov 28  }
  0x26   :  { %s7051_s4 = sld [smem:[%s7956_s0 + %s6903_s28]]   ;;  %s6907_s28 = smov 29  }
  0x29   :  { %7968 = sst [smem:[#allocation17_spill]] %s7036_s12 }
  0x2a   :  { %7969 = sst [smem:[#allocation18_spill]] %s7041_s20 }
  0x2b   :  { %7970 = sst [smem:[#allocation19_spill]] %s7046_s27 }
  0x2c   :  { %7971 = sst [smem:[#allocation20_spill]] %s7051_s4 }
  0x2d   :  { %s7056_s12 = sld [smem:[%s7956_s0 + %s6904_s7]]   ;;  %s6908_s7 = smov 30  }
  0x2e   :  { %s7061_s20 = sld [smem:[%s7956_s0 + %s6905_s15]]   ;;  %s6909_s15 = smov 31  }
  0x2f   :  { %s7066_s27 = sld [smem:[%s7956_s0 + %s6906_s22]]   ;;  %s6910_s22 = smov 32  }
  0x30   :  { %s7071_s4 = sld [smem:[%s7956_s0 + %s6907_s28]]  }
  0x33   :  { %7972 = sst [smem:[#allocation21_spill]] %s7056_s12 }
  0x34   :  { %7973 = sst [smem:[#allocation22_spill]] %s7061_s20 }
  0x35   :  { %7974 = sst [smem:[#allocation23_spill]] %s7066_s27 }
  0x36   :  { %s7076_s12 = sld [smem:[%s7956_s0 + %s6908_s7]]  }
  0x37   :  { %s7081_s20 = sld [smem:[%s7956_s0 + %s6909_s15]]  }
  0x38   :  { %s7086_s27 = sld [smem:[%s7956_s0 + %s6910_s22]]  }
  0x39   :  { %71 = vsyncpa [#allocation4], 0  ;;  %v134_v0 = vld [vmem:[%s6936_s13] sm:$0xff]  ;;  %v135_v1 = vld [vmem:[%s6936_s13 + $0x8] sm:$0xff]  ;;  %v6911_v3 = vmov 0.0|0.0   ;;  %vm6912_vm0 = vmmov 0  }
  0x3a   :  { %v136_v2 = vld [vmem:[%s6936_s13 + $0x10] sm:$0xff]  ;;  %6006 = vmatprep.subr.bf16.mxu0 %v6911_v3  ;;  %v6007_v4 = vpack.c.bf16 %v135_v1, %v134_v0  ;;  %v137_v5 = vld [vmem:[%s6936_s13 + $0x18] sm:$0xff]  ;;  %v6913_v6 = vmov 0.0   ;;  %v138_v8 = vld [vmem:[%s6936_s13 + $0x20] sm:$0xff] }
  0x3b   :  { %5371 = vmatprep.mubr.msk.f32.mxu0 %vm6912_vm0, %v6913_v6  ;;  %v6010_v7 = vpack.c.bf16 %v137_v5, %v136_v2  ;;  %v139_v9 = vld [vmem:[%s6936_s13 + $0x28] sm:$0xff] }
  0x3c   :  { %6008 = vmatpush3.bf16.msra.mxu0 %v6007_v4 }
  0x3d   :  { %6009 = vmatprep.subr.bf16.mxu0 %v6911_v3 }
  0x3e   :  { %72 = vsyncpa [#allocation6], 0  ;;  %v6013_v10 = vpack.c.bf16 %v139_v9, %v138_v8  ;;  %v140_v11 = vld [vmem:[%s6936_s13 + $0x30] sm:$0xff]  ;;  %v141_v12 = vld [vmem:[%s6936_s13 + $0x38] sm:$0xff]  ;;  %vm661_vm1 = vcmask 261120   ;;  %vm836_vm3 = vcmask 130048  }
  0x3f   :  { %v6016_v13 = vpack.c.bf16 %v141_v12, %v140_v11  ;;  %v142_v14 = vld [vmem:[%s6936_s13 + $0x40] sm:$0xff]  ;;  %v143_v15 = vld [vmem:[%s6936_s13 + $0x48] sm:$0xff]  ;;  %v144_v17 = vld [vmem:[%s6936_s13 + $0x50] sm:$0xff]  ;;  %s7977_s0 = sld [smem:[#allocation9_spill]] }
  0x40   :  { %6011 = vmatpush3.bf16.msra.mxu0 %v6010_v7  ;;  %v6019_v16 = vpack.c.bf16 %v143_v15, %v142_v14  ;;  %v145_v18 = vld [vmem:[%s6936_s13 + $0x58] sm:$0xff]  ;;  %v146_v20 = vld [vmem:[%s6936_s13 + $0x60] sm:$0xff]  ;;  %v147_v21 = vld [vmem:[%s6936_s13 + $0x68] sm:$0xff] }
  0x41   :  { %6012 = vmatprep.subr.bf16.mxu0 %v6911_v3  ;;  %v6022_v19 = vpack.c.bf16 %v145_v18, %v144_v17  ;;  %v6025_v22 = vpack.c.bf16 %v147_v21, %v146_v20  ;;  %v148_v23 = vld [vmem:[%s6936_s13 + $0x70] sm:$0xff]  ;;  %v149_v24 = vld [vmem:[%s6936_s13 + $0x78] sm:$0xff]  ;;  %v133_v26 = vld [vmem:[%s6926_s5] sm:$0xf]  ;;  %s7978_s5 = sld [smem:[#allocation10_spill]]  ;;  %s7980_s13 = sld [smem:[#allocation11_spill]] }
  0x42   :  { %v6028_v25 = vpack.c.bf16 %v149_v24, %v148_v23  ;;  %v239_v27 = vld [vmem:[%s6931_s9 + $0x10] sm:$0xff]  ;;  %v4639_v28 = vld [vmem:[%s6951_s25] ss:$0 sm:$0xff]  ;;  %v238_v32 = vld [vmem:[%s6931_s9 + $0x8] sm:$0xf]  ;;  %s7983_s25 = sld [smem:[#allocation14_spill]] }
  0x43   :  { %v237_v29 = vld [vmem:[%s6931_s9] sm:$0xff]  ;;  %v250_v30 = vadd.f32 %v4639_v28, %v239_v27  ;;  %v249_v33 = vadd.f32 %v4639_v28, %v238_v32  ;;  %v240_v34 = vld [vmem:[%s6931_s9 + $0x18] sm:$0xf]  ;;  %v334_v47 = vld [vmem:[%s6966_s8 + $0x8] sm:$0xff]  ;;  %s7979_s9 = sld [smem:[#allocation13_spill]] }
  0x44   :  { %6014 = vmatpush3.bf16.msra.mxu0 %v6013_v10  ;;  %v248_v31 = vadd.f32 %v4639_v28, %v237_v29  ;;  %v251_v35 = vadd.f32 %v4639_v28, %v240_v34  ;;  %v4637_v36 = vld [vmem:[%s6941_s17] ss:$0 sm:$0xff]  ;;  %v446_v50 = vld [vmem:[%s6976_s19 + $0x8] sm:$0xff]  ;;  %v335_v51 = vld [vmem:[%s6966_s8 + $0x10] sm:$0xff]  ;;  %s7981_s17 = sld [smem:[#allocation12_spill]] }
  0x45   :  { %6015 = vmatprep.subr.bf16.mxu0 %v6911_v3  ;;  %254 = vst [vmem:[%s7081_s20 + $0x10] sm:$0xff] %v250_v30  ;;  %260 = vst [vmem:[#allocation2 + $0x14] sm:$0xff] %v250_v30  ;;  %v4638_v38 = vld [vmem:[%s6946_s21] ss:$0 sm:$0xff]  ;;  %v336_v52 = vld [vmem:[%s6966_s8 + $0x18] sm:$0xff]  ;;  %s7982_s21 = sld [smem:[#allocation15_spill]] }
  0x46   :  { %252 = vst [vmem:[%s7081_s20] sm:$0xff] %v248_v31  ;;  %258 = vst [vmem:[#allocation2 + $0x4] sm:$0xff] %v248_v31  ;;  %v333_v46 = vld [vmem:[%s6966_s8] sm:$0xff]  ;;  %v6034_v54 = vpack.c.bf16 %v336_v52, %v335_v51  ;;  %v447_v55 = vld [vmem:[%s6976_s19 + $0x10] sm:$0xff] }
  0x47   :  { %253 = vst [vmem:[%s7081_s20 + $0x8] sm:$0xf] %v249_v33  ;;  %259 = vst [vmem:[#allocation2 + $0xc] sm:$0xf] %v249_v33  ;;  %v445_v48 = vld [vmem:[%s6976_s19] sm:$0xff]  ;;  %v6030_v49 = vpack.c.bf16 %v334_v47, %v333_v46  ;;  %v448_v56 = vld [vmem:[%s6976_s19 + $0x18] sm:$0xff] }
  0x48   :  { %6017 = vmatpush3.bf16.msra.mxu0 %v6016_v13  ;;  %255 = vst [vmem:[%s7081_s20 + $0x18] sm:$0xf] %v251_v35  ;;  %261 = vst [vmem:[#allocation2 + $0x1c] sm:$0xf] %v251_v35  ;;  %v6062_v53 = vpack.c.bf16 %v446_v50, %v445_v48  ;;  %v6066_v57 = vpack.c.bf16 %v448_v56, %v447_v55  ;;  %v337_v11 = vld [vmem:[%s6966_s8 + $0x20] sm:$0xff]  ;;  %v338_v12 = vld [vmem:[%s6966_s8 + $0x28] sm:$0xff] }
  0x49   :  { %6018 = vmatprep.subr.bf16.mxu0 %v6911_v3  ;;  %6031 = vmatprep.subr.bf16.mxu1 %v6030_v49  ;;  %v6038_v13 = vpack.c.bf16 %v338_v12, %v337_v11  ;;  %v449_v14 = vld [vmem:[%s6976_s19 + $0x20] sm:$0xff]  ;;  %v450_v15 = vld [vmem:[%s6976_s19 + $0x28] sm:$0xff]  ;;  %v339_v17 = vld [vmem:[%s6966_s8 + $0x30] sm:$0xff] }
  0x4a   :  { %6033 = vmatpush3.bf16.msra.mxu1 %v6030_v49  ;;  %v340_v18 = vld [vmem:[%s6966_s8 + $0x38] sm:$0xff]  ;;  %v451_v20 = vld [vmem:[%s6976_s19 + $0x30] sm:$0xff]  ;;  %v341_v23 = vld [vmem:[%s6966_s8 + $0x40] sm:$0xff] }
  0x4b   :  { %6035 = vmatprep.subr.bf16.mxu1 %v6034_v54  ;;  %v452_v21 = vld [vmem:[%s6976_s19 + $0x38] sm:$0xff]  ;;  %v342_v24 = vld [vmem:[%s6966_s8 + $0x48] sm:$0xff]  ;;  %v343_v29 = vld [vmem:[%s6966_s8 + $0x50] sm:$0xff] }
  0x4c   :  { %6020 = vmatpush3.bf16.msra.mxu0 %v6019_v16  ;;  %v6070_v16 = vpack.c.bf16 %v450_v15, %v449_v14  ;;  %v454_v27 = vld [vmem:[%s6976_s19 + $0x48] sm:$0xff]  ;;  %v344_v30 = vld [vmem:[%s6966_s8 + $0x58] sm:$0xff]  ;;  %v455_v32 = vld [vmem:[%s6976_s19 + $0x50] sm:$0xff] }
  0x4d   :  { %6021 = vmatprep.subr.bf16.mxu0 %v6911_v3  ;;  %v6050_v31 = vpack.c.bf16 %v344_v30, %v343_v29  ;;  %v456_v33 = vld [vmem:[%s6976_s19 + $0x58] sm:$0xff]  ;;  %v345_v35 = vld [vmem:[%s6966_s8 + $0x60] sm:$0xff]  ;;  %v554_v48 = vld [vmem:[%s6986_s30 + $0x8] sm:$0xff] }
  0x4e   :  { %v263_v44 = vld [vmem:[#allocation2 + $0x8] sm:$0xff]  ;;  %6037 = vmatpush3.bf16.msra.mxu1 %v6034_v54  ;;  %v6082_v34 = vpack.c.bf16 %v456_v33, %v455_v32  ;;  %v553_v47 = vld [vmem:[%s6986_s30] sm:$0xff]  ;;  %v556_v14 = vld [vmem:[%s6986_s30 + $0x18] sm:$0xff] }
  0x4f   :  { %v265_v45 = vld [vmem:[#allocation2 + $0x18] sm:$0xff]  ;;  %6039 = vmatprep.subr.bf16.mxu1 %v6038_v13  ;;  %v6094_v49 = vpack.c.bf16 %v554_v48, %v553_v47  ;;  %v563_v29 = vld [vmem:[%s6986_s30 + $0x50] sm:$0xff]  ;;  %v565_v32 = vld [vmem:[%s6986_s30 + $0x60] sm:$0xff] }
  0x50   :  { %6023 = vmatpush3.bf16.msra.mxu0 %v6022_v19  ;;  %v6042_v19 = vpack.c.bf16 %v340_v18, %v339_v17  ;;  %v564_v30 = vld [vmem:[%s6986_s30 + $0x58] sm:$0xff]  ;;  %v566_v33 = vld [vmem:[%s6986_s30 + $0x68] sm:$0xff]  ;;  %vm7211_vm2 = vmpackc.low %vm661_vm1, %vm661_vm1 }
  0x51   :  { %6024 = vmatprep.subr.bf16.mxu0 %v6911_v3 }
  0x52   :  { %6041 = vmatpush3.bf16.msra.mxu1 %v6038_v13  ;;  %v555_v13 = vld [vmem:[%s6986_s30 + $0x10] sm:$0xff] }
  0x53   :  { %6043 = vmatprep.subr.bf16.mxu1 %v6042_v19 }
  0x54   :  { %6026 = vmatpush3.bf16.msra.mxu0 %v6025_v22  ;;  %v6074_v22 = vpack.c.bf16 %v452_v21, %v451_v20 }
  0x55   :  { %6027 = vmatprep.subr.bf16.mxu0 %v6911_v3 }
  0x56   :  { %6045 = vmatpush3.bf16.msra.mxu1 %v6042_v19  ;;  %v6098_v19 = vpack.c.bf16 %v556_v14, %v555_v13 }
  0x58   :  { %6029 = vmatpush3.bf16.msra.mxu0 %v6028_v25  ;;  %v6046_v25 = vpack.c.bf16 %v342_v24, %v341_v23  ;;  %v559_v23 = vld [vmem:[%s6986_s30 + $0x30] sm:$0xff]  ;;  %v560_v24 = vld [vmem:[%s6986_s30 + $0x38] sm:$0xff] }
  0x59   :  { %6063 = vmatprep.subr.bf16.mxu0 %v6062_v53 }
  0x5a   :  { %6047 = vmatprep.subr.bf16.mxu1 %v6046_v25 }
  0x5b   :  { %5372 = vmatmul.mubr.f32.vlgmr.msra.gmra.mrb[0].mxu0 %v133_v26  ;;  %v453_v26 = vld [vmem:[%s6976_s19 + $0x40] sm:$0xff]  ;;  %6049 = vmatpush3.bf16.msra.mxu1 %v6046_v25  ;;  %v6106_v25 = vpack.c.bf16 %v560_v24, %v559_v23 }
  0x5c   :  { %6065 = vmatpush3.bf16.msra.mxu0 %v6062_v53  ;;  %v6078_v28 = vpack.c.bf16 %v454_v27, %v453_v26  ;;  %6051 = vmatprep.subr.bf16.mxu1 %v6050_v31  ;;  %v561_v26 = vld [vmem:[%s6986_s30 + $0x40] sm:$0xff]  ;;  %v562_v27 = vld [vmem:[%s6986_s30 + $0x48] sm:$0xff] }
  0x5d   :  { %6067 = vmatprep.subr.bf16.mxu0 %v6066_v57 }
  0x5f   :  { %6053 = vmatpush3.bf16.msra.mxu1 %v6050_v31  ;;  %v6114_v31 = vpack.c.bf16 %v564_v30, %v563_v29 }
  0x60   :  { %6069 = vmatpush3.bf16.msra.mxu0 %v6066_v57 }
  0x61   :  { %6071 = vmatprep.subr.bf16.mxu0 %v6070_v16 }
  0x64   :  { %6073 = vmatpush3.bf16.msra.mxu0 %v6070_v16 }
  0x65   :  { %6075 = vmatprep.subr.bf16.mxu0 %v6074_v22 }
  0x68   :  { %6077 = vmatpush3.bf16.msra.mxu0 %v6074_v22 }
  0x69   :  { %6079 = vmatprep.subr.bf16.mxu0 %v6078_v28 }
  0x6c   :  { %6081 = vmatpush3.bf16.msra.mxu0 %v6078_v28  ;;  %v6110_v28 = vpack.c.bf16 %v562_v27, %v561_v26 }
  0x6d   :  { %6083 = vmatprep.subr.bf16.mxu0 %v6082_v34 }
  0x70   :  { %6085 = vmatpush3.bf16.msra.mxu0 %v6082_v34  ;;  %v6118_v34 = vpack.c.bf16 %v566_v33, %v565_v32 }
 0x12e   :  { %v223_v37 = vpop.f32.mrb[0].mxu0 }
 0x12f   :  { %v224_v39 = vadd.f32 %v4637_v36, %v223_v37  ;;  %v5373_v40 = vpop.f32.mrb[1].mxu0  ;;  %v346_v36 = vld [vmem:[%s6966_s8 + $0x68] sm:$0xff] }
 0x130   :  { %v6054_v37 = vpack.c.bf16 %v346_v36, %v345_v35  ;;  %v567_v35 = vld [vmem:[%s6986_s30 + $0x70] sm:$0xff]  ;;  %v568_v36 = vld [vmem:[%s6986_s30 + $0x78] sm:$0xff] }
 0x131   :  { %v234_v41 = vadd.f32 %v4638_v38, %v224_v39  ;;  %v457_v38 = vld [vmem:[%s6976_s19 + $0x60] sm:$0xff]  ;;  %v458_v39 = vld [vmem:[%s6976_s19 + $0x68] sm:$0xff] }
 0x132   :  { %v6086_v40 = vpack.c.bf16 %v458_v39, %v457_v38  ;;  %6055 = vmatprep.subr.bf16.mxu1 %v6054_v37  ;;  %v4643_v38 = vld [vmem:[%s6981_s24] ss:$0 sm:$0xff] }
 0x133   :  { %256 = vst [vmem:[#allocation2] sm:$0xf] %v234_v41  ;;  %257 = vst [vmem:[#allocation2 + $0x10] sm:$0xf] %v234_v41  ;;  %6057 = vmatpush3.bf16.msra.mxu1 %v6054_v37  ;;  %v6122_v37 = vpack.c.bf16 %v568_v36, %v567_v35  ;;  %v4642_v39 = vld [vmem:[%s6971_s14] ss:$0 sm:$0xff] }
 0x134   :  { %235 = vst [vmem:[#allocation5] sm:$0xf] %v234_v41  ;;  %236 = vst [vmem:[#allocation5 + $0x4] sm:$0xf] %v234_v41  ;;  %6087 = vmatprep.subr.bf16.mxu0 %v6086_v40  ;;  %v347_v41 = vld [vmem:[%s6966_s8 + $0x70] sm:$0xff] }
 0x135   :  { %6089 = vmatpush3.bf16.msra.mxu0 %v6086_v40 }
 0x13a   :  { %v264_v42 = vld [vmem:[#allocation2 + $0x10] sm:$0xff]  ;;  %v262_v43 = vld [vmem:[#allocation2] sm:$0xff] }
 0x13b   :  { %272 = vadd.xlane.f32.xlu1 %v264_v42  ;;  %268 = vadd.xlane.f32.xlu0 %v262_v43 }
 0x13f   :  { %270 = vadd.xlane.f32.xlu0 %v263_v44  ;;  %274 = vadd.xlane.f32.xlu1 %v265_v45 }
 0x1c8   :  { %v273_v58 = vpop.xlane.xlu1 %272  ;;  %v269_v59 = vpop.xlane.xlu0 %268 }
 0x1c9   :  { %v279_v60 = vmul.f32 0.0078125, %v273_v58  ;;  %v277_v61 = vmul.f32 0.0078125, %v269_v59 }
 0x1cb   :  { %v7125_v62 = vsub.f32 %v262_v43, %v277_v61  ;;  %v7127_v1 = vsub.f32 %v264_v42, %v279_v60  ;;  %v348_v42 = vld [vmem:[%s6966_s8 + $0x78] sm:$0xff] }
 0x1cc   :  { %v271_v63 = vpop.xlane.xlu0 %270  ;;  %v275_v0 = vpop.xlane.xlu1 %274  ;;  %v6058_v43 = vpack.c.bf16 %v348_v42, %v347_v41 }
 0x1cd   :  { %v278_v2 = vmul.f32 0.0078125, %v271_v63  ;;  %v285_v3 = vmul.f32 %v7125_v62, %v7125_v62  ;;  %v280_v4 = vmul.f32 0.0078125, %v275_v0  ;;  %v287_v8 = vmul.f32 %v7127_v1, %v7127_v1  ;;  %v4640_v0 = vld [vmem:[%s6956_s29] ss:$0 sm:$0xff]  ;;  %s7984_s29 = sld [smem:[#allocation16_spill]] }
 0x1ce   :  { %6059 = vmatprep.subr.bf16.mxu1 %v6058_v43 }
 0x1cf   :  { %v7131_v5 = vsub.f32 %v263_v44, %v278_v2  ;;  %289 = vadd.xlane.f32.xlu0 %v285_v3  ;;  %v7133_v7 = vsub.f32 %v265_v45, %v280_v4  ;;  %v459_v44 = vld [vmem:[%s6976_s19 + $0x70] sm:$0xff]  ;;  %v460_v45 = vld [vmem:[%s6976_s19 + $0x78] sm:$0xff]  ;;  %6061 = vmatpush3.bf16.msra.mxu1 %v6058_v43  ;;  %v4641_v3 = vld [vmem:[%s6961_s3] ss:$0 sm:$0xff]  ;;  %s7985_s3 = sld [smem:[#allocation19_spill]] }
 0x1d0   :  { %v6090_v46 = vpack.c.bf16 %v460_v45, %v459_v44  ;;  %6095 = vmatprep.subr.bf16.mxu1 %v6094_v49 }
 0x1d1   :  { %v286_v9 = vmul.f32 %v7131_v5, %v7131_v5  ;;  %v288_v10 = vmul.f32 %v7133_v7, %v7133_v7 }
 0x1d2   :  { %6091 = vmatprep.subr.bf16.mxu0 %v6090_v46 }
 0x1d3   :  { %293 = vadd.xlane.f32.xlu0 %v287_v8  ;;  %291 = vadd.xlane.f32.xlu1 %v286_v9 }
 0x1d4   :  { %6093 = vmatpush3.bf16.msra.mxu0 %v6090_v46 }
 0x1d7   :  { %295 = vadd.xlane.f32.xlu1 %v288_v10 }
 0x25c   :  { %v290_v50 = vpop.xlane.xlu0 %289 }
 0x25d   :  { %v297_v51 = vmul.f32 0.0078125, %v290_v50 }
 0x25f   :  { %v301_v52 = vadd.f32 1e-06, %v297_v51 }
 0x260   :  { %v292_v53 = vpop.xlane.xlu1 %291  ;;  %v294_v54 = vpop.xlane.xlu0 %293 }
 0x261   :  { %6705 = vrsqrt.f32 %v301_v52  ;;  %v298_v55 = vmul.f32 0.0078125, %v292_v53  ;;  %v299_v56 = vmul.f32 0.0078125, %v294_v54 }
 0x263   :  { %v302_v57 = vadd.f32 1e-06, %v298_v55  ;;  %v303_v58 = vadd.f32 1e-06, %v299_v56 }
 0x264   :  { %v296_v59 = vpop.xlane.xlu1 %295 }
 0x265   :  { %6707 = vrsqrt.f32 %v302_v57  ;;  %v300_v60 = vmul.f32 0.0078125, %v296_v59 }
 0x266   :  { %6709 = vrsqrt.f32 %v303_v58 }
 0x267   :  { %v304_v61 = vadd.f32 1e-06, %v300_v60 }
 0x269   :  { %6711 = vrsqrt.f32 %v304_v61 }
 0x26b   :  { %v6706_v63 = vpop.eup %6705 }
 0x26c   :  { %v309_v2 = vmul.f32 %v6706_v63, %v7125_v62 }
 0x26e   :  { %v319_v4 = vmul.f32 %v4640_v0, %v309_v2 }
 0x26f   :  { %v6708_v8 = vpop.eup %6707 }
 0x270   :  { %v6710_v9 = vpop.eup %6709  ;;  %v7170_v10 = vadd.f32 %v4641_v3, %v319_v4  ;;  %v310_v11 = vmul.f32 %v6708_v8, %v7131_v5  ;;  %v557_v5 = vld [vmem:[%s6986_s30 + $0x20] sm:$0xff] }
 0x271   :  { %v311_v12 = vmul.f32 %v6710_v9, %v7127_v1  ;;  %v558_v1 = vld [vmem:[%s6986_s30 + $0x28] sm:$0xff] }
 0x272   :  { %v320_v15 = vmul.f32 %v4640_v0, %v310_v11  ;;  %5406 = vmatprep.mubr.f32.mxu1 %v7170_v10  ;;  %5444 = vmatprep.mubr.f32.mxu0 %v7170_v10 }
 0x273   :  { %v6712_v62 = vpop.eup %6711  ;;  %v321_v16 = vmul.f32 %v4640_v0, %v311_v12 }
 0x274   :  { %v7178_v17 = vadd.f32 %v4641_v3, %v320_v15  ;;  %v312_v18 = vmul.f32 %v6712_v62, %v7133_v7  ;;  %v6102_v7 = vpack.c.bf16 %v558_v1, %v557_v5 }
 0x275   :  { %v7181_v20 = vadd.f32 %v4641_v3, %v321_v16 }
 0x276   :  { %v322_v21 = vmul.f32 %v4640_v0, %v312_v18  ;;  %5407 = vmatmul.mubr.f32.vlgmr.msra.gmra.mrb[0].mxu1 %v7178_v17  ;;  %5445 = vmatmul.mubr.f32.vlgmr.msra.gmra.mrb[2].mxu0 %v7178_v17  ;;  %v4644_v0 = vld [vmem:[%s6991_s6] ss:$0 sm:$0xff] }
 0x277   :  { %6097 = vmatpush3.bf16.msra.mxu1 %v6094_v49  ;;  %5409 = vmatprep.mubr.f32.mxu1 %v7181_v20 }
 0x278   :  { %v7188_v22 = vadd.f32 %v4641_v3, %v322_v21  ;;  %5447 = vmatprep.mubr.f32.mxu0 %v7181_v20  ;;  %6099 = vmatprep.subr.bf16.mxu1 %v6098_v19 }
 0x27a   :  { %5410 = vmatmul.mubr.f32.gmra.mrb[2].mxu1 %v7188_v22  ;;  %5448 = vmatmul.mubr.f32.gmra.mrb[4].mxu0 %v7188_v22 }
 0x27b   :  { %6101 = vmatpush3.bf16.msra.mxu1 %v6098_v19  ;;  %5482 = vmatprep.mubr.f32.mxu1 %v7170_v10 }
 0x27c   :  { %6103 = vmatprep.subr.bf16.mxu1 %v6102_v7 }
 0x27f   :  { %6105 = vmatpush3.bf16.msra.mxu1 %v6102_v7 }
 0x280   :  { %6107 = vmatprep.subr.bf16.mxu1 %v6106_v25 }
 0x283   :  { %6109 = vmatpush3.bf16.msra.mxu1 %v6106_v25 }
 0x284   :  { %6111 = vmatprep.subr.bf16.mxu1 %v6110_v28 }
 0x287   :  { %6113 = vmatpush3.bf16.msra.mxu1 %v6110_v28 }
 0x288   :  { %6115 = vmatprep.subr.bf16.mxu1 %v6114_v31 }
 0x28b   :  { %6117 = vmatpush3.bf16.msra.mxu1 %v6114_v31 }
 0x28c   :  { %6119 = vmatprep.subr.bf16.mxu1 %v6118_v34 }
 0x28f   :  { %6121 = vmatpush3.bf16.msra.mxu1 %v6118_v34 }
 0x290   :  { %6123 = vmatprep.subr.bf16.mxu1 %v6122_v37 }
 0x293   :  { %6125 = vmatpush3.bf16.msra.mxu1 %v6122_v37 }
 0x296   :  { %5483 = vmatmul.mubr.f32.vlgmr.msra.gmra.mrb[4].mxu1 %v7178_v17 }
 0x297   :  { %5485 = vmatprep.mubr.f32.mxu1 %v7181_v20 }
 0x29a   :  { %5486 = vmatmul.mubr.f32.gmra.mrb[6].mxu1 %v7188_v22 }
 0x349   :  { %v5408_v40 = vpop.f32.mrb[0].mxu1  ;;  %v5446_v41 = vpop.f32.mrb[2].mxu0 }
 0x34a   :  { %v540_v42 = vadd.f32 %v5446_v41, %v4643_v38  ;;  %v422_v43 = vpop.f32.mrb[1].mxu1  ;;  %v534_v44 = vpop.f32.mrb[3].mxu0  ;;  %v428_v57 = vadd.f32 %v5408_v40, %v4642_v39 }
 0x34b   :  { %v423_v45 = vadd.f32 %v4642_v39, %v422_v43  ;;  %v535_v46 = vadd.f32 %v4643_v38, %v534_v44  ;;  %v4675_v43 = vld [vmem:[%s6976_s19 + $0x80] sm:$0xff]  ;;  %v4676_v44 = vld [vmem:[%s6976_s19 + $0x88] sm:$0xff] }
 0x34c   :  { %v442_v60 = vmul.f32 0.17677669, %v428_v57 }
 0x34d   :  { %v441_v48 = vmul.f32 0.17677669, %v423_v45  ;;  %v6126_v49 = vpack.c.bf16 %v540_v42, %v535_v46  ;;  %v5411_v50 = vpop.f32.mrb[2].mxu1  ;;  %v5449_v51 = vpop.f32.mrb[4].mxu0  ;;  %v6178_v45 = vpack.c.bf16 %v4676_v44, %v4675_v43  ;;  %v4657_v46 = vld [vmem:[%s6966_s8 + $0x80] sm:$0xff]  ;;  %v4672_v43 = vld [vmem:[%s6966_s8 + $0xf8] sm:$0xff] }
 0x34e   :  { %v550_v52 = vadd.f32 %v5449_v51, %v4643_v38  ;;  %v432_v53 = vpop.f32.mrb[3].mxu1  ;;  %v544_v54 = vpop.f32.mrb[5].mxu0  ;;  %v438_v61 = vadd.f32 %v5411_v50, %v4642_v39 }
 0x34f   :  { %v433_v55 = vadd.f32 %v4642_v39, %v432_v53  ;;  %v545_v56 = vadd.f32 %v4643_v38, %v544_v54  ;;  %6128 = vmatprep.subr.msk.bf16.mxu0 %vm7211_vm2, %v6126_v49  ;;  %5492 = vmatprep.mubr.msk.f32.mxu0 %vm661_vm1, %v441_v48  ;;  %v4658_v48 = vld [vmem:[%s6966_s8 + $0x88] sm:$0xff] }
 0x350   :  { %6131 = vmatpush3.bf16.xpose.msk.msra.mxu0 %vm7211_vm2, %v6126_v49  ;;  %v444_v63 = vmul.f32 0.17677669, %v438_v61  ;;  %v6146_v49 = vpack.c.bf16 %v4658_v48, %v4657_v46  ;;  %v4694_v46 = vld [vmem:[%s6986_s30 + $0x88] sm:$0xff] }
 0x351   :  { %v443_v58 = vmul.f32 0.17677669, %v433_v55  ;;  %v6132_v59 = vpack.c.bf16 %v550_v52, %v545_v56  ;;  %v4677_v55 = vld [vmem:[%s6976_s19 + $0x90] sm:$0xff]  ;;  %v4678_v56 = vld [vmem:[%s6976_s19 + $0x98] sm:$0xff] }
 0x353   :  { %6134 = vmatprep.subr.msk.bf16.mxu1 %vm7211_vm2, %v6132_v59  ;;  %5499 = vmatprep.mubr.msk.f32.mxu1 %vm661_vm1, %v443_v58 }
 0x354   :  { %6137 = vmatpush3.bf16.xpose.msk.msra.mxu1 %vm7211_vm2, %v6132_v59 }
 0x357   :  { %5493 = vmatmul.mubr.msk.f32.vlgmr.msra.gmra.mrb[6].mxu0 %vm661_vm1, %v442_v60  ;;  %v6182_v60 = vpack.c.bf16 %v4678_v56, %v4677_v55  ;;  %v4699_v55 = vld [vmem:[%s6986_s30 + $0xb0] sm:$0xff]  ;;  %v4700_v56 = vld [vmem:[%s6986_s30 + $0xb8] sm:$0xff] }
 0x35b   :  { %5500 = vmatmul.mubr.msk.f32.vlgmr.msra.gmra.mrb[8].mxu1 %vm661_vm1, %v444_v63  ;;  %v4659_v63 = vld [vmem:[%s6966_s8 + $0x90] sm:$0xff] }
 0x369   :  { %v5484_v2 = vpop.f32.mrb[4].mxu1 }
 0x36a   :  { %v648_v3 = vadd.f32 %v5484_v2, %v4644_v0  ;;  %v642_v4 = vpop.f32.mrb[5].mxu1 }
 0x36b   :  { %v643_v8 = vadd.f32 %v4644_v0, %v642_v4  ;;  %v4680_v4 = vld [vmem:[%s6976_s19 + $0xa8] sm:$0xff] }
 0x36d   :  { %v6138_v9 = vpack.c.bf16 %v648_v3, %v643_v8  ;;  %v5487_v11 = vpop.f32.mrb[6].mxu1  ;;  %v4679_v3 = vld [vmem:[%s6976_s19 + $0xa0] sm:$0xff] }
 0x36e   :  { %v658_v12 = vadd.f32 %v5487_v11, %v4644_v0  ;;  %v652_v13 = vpop.f32.mrb[7].mxu1 }
 0x36f   :  { %v653_v14 = vadd.f32 %v4644_v0, %v652_v13  ;;  %6139 = vmatprep.subr.bf16.mxu0 %v6138_v9  ;;  %v4660_v0 = vld [vmem:[%s6966_s8 + $0x98] sm:$0xff]  ;;  %v6186_v13 = vpack.c.bf16 %v4680_v4, %v4679_v3  ;;  %v4706_v3 = vld [vmem:[%s6986_s30 + $0xe8] sm:$0xff] }
 0x370   :  { %6141 = vmatpush3.bf16.msra.mxu0 %v6138_v9  ;;  %v6150_v11 = vpack.c.bf16 %v4660_v0, %v4659_v63  ;;  %v4704_v63 = vld [vmem:[%s6986_s30 + $0xd8] sm:$0xff] }
 0x371   :  { %v6142_v15 = vpack.c.bf16 %v658_v12, %v653_v14  ;;  %6147 = vmatprep.subr.bf16.mxu0 %v6146_v49  ;;  %v4661_v12 = vld [vmem:[%s6966_s8 + $0xa0] sm:$0xff]  ;;  %v4662_v14 = vld [vmem:[%s6966_s8 + $0xa8] sm:$0xff] }
 0x373   :  { %6143 = vmatprep.subr.bf16.mxu1 %v6142_v15 }
 0x374   :  { %6145 = vmatpush3.bf16.msra.mxu1 %v6142_v15  ;;  %v4681_v15 = vld [vmem:[%s6976_s19 + $0xb0] sm:$0xff] }
 0x375   :  { %6179 = vmatprep.subr.bf16.mxu1 %v6178_v45 }
 0x42a   :  { %v5494_v62 = vpop.f32.mrb[6].mxu0 }
 0x42b   :  { %v740_v16 = vpop.f32.mrb[7].mxu0  ;;  %v840_v21 = vsel %vm836_vm3, %v5494_v62, -inf }
 0x42c   :  { %v837_v7 = vsel %vm836_vm3, %v740_v16, -inf }
 0x42e   :  { %v5501_v18 = vpop.f32.mrb[8].mxu1 }
 0x42f   :  { %v827_v19 = vpop.f32.mrb[9].mxu1  ;;  %v846_v5 = vsel %vm836_vm3, %v5501_v18, -inf }
 0x430   :  { %847 = vmax.xlane.f32.xlu1 %v846_v5  ;;  %v843_v1 = vsel %vm836_vm3, %v827_v19, -inf  ;;  %v4664_v5 = vld [vmem:[%s6966_s8 + $0xb8] sm:$0xff] }
 0x431   :  { %844 = vmax.xlane.f32.xlu0 %v843_v1  ;;  %v4683_v1 = vld [vmem:[%s6976_s19 + $0xc0] sm:$0xff] }
 0x434   :  { %841 = vmax.xlane.f32.xlu1 %v840_v21  ;;  %v4684_v21 = vld [vmem:[%s6976_s19 + $0xc8] sm:$0xff] }
 0x435   :  { %838 = vmax.xlane.f32.xlu0 %v837_v7 }
 0x4bd   :  { %v848_v23 = vpop.xlane.xlu1 %847 }
 0x4be   :  { %v852_v24 = vsub.f32 %v5501_v18, %v848_v23  ;;  %v845_v25 = vpop.xlane.xlu0 %844  ;;  %v6194_v23 = vpack.c.bf16 %v4684_v21, %v4683_v1  ;;  %v4741_v1 = vld [vmem:[%s6966_s8 + $0x130] sm:$0xff]  ;;  %v4742_v21 = vld [vmem:[%s6966_s8 + $0x138] sm:$0xff] }
 0x4bf   :  { %v851_v26 = vsub.f32 %v827_v19, %v845_v25  ;;  %v4663_v19 = vld [vmem:[%s6966_s8 + $0xb0] sm:$0xff]  ;;  %v4666_v25 = vld [vmem:[%s6966_s8 + $0xc8] sm:$0xff] }
 0x4c0   :  { %v859_v27 = vmul.f32 1.442695, %v852_v24  ;;  %v6158_v7 = vpack.c.bf16 %v4664_v5, %v4663_v19  ;;  %v4665_v24 = vld [vmem:[%s6966_s8 + $0xc0] sm:$0xff]  ;;  %v4740_v19 = vld [vmem:[%s6966_s8 + $0x128] sm:$0xff] }
 0x4c1   :  { %v857_v28 = vmul.f32 1.442695, %v851_v26  ;;  %v842_v29 = vpop.xlane.xlu1 %841  ;;  %v4685_v26 = vld [vmem:[%s6976_s19 + $0xd0] sm:$0xff] }
 0x4c2   :  { %6713 = vpow2.f32 %v859_v27  ;;  %v850_v30 = vsub.f32 %v5494_v62, %v842_v29  ;;  %v839_v31 = vpop.xlane.xlu0 %838  ;;  %v4682_v62 = vld [vmem:[%s6976_s19 + $0xb8] sm:$0xff] }
 0x4c3   :  { %6715 = vpow2.f32 %v857_v28  ;;  %v849_v32 = vsub.f32 %v740_v16, %v839_v31  ;;  %v6154_v16 = vpack.c.bf16 %v4662_v14, %v4661_v12  ;;  %v6190_v18 = vpack.c.bf16 %v4682_v62, %v4681_v15  ;;  %v4686_v27 = vld [vmem:[%s6976_s19 + $0xd8] sm:$0xff]  ;;  %v4735_v12 = vld [vmem:[%s6966_s8 + $0x100] sm:$0xff]  ;;  %v4737_v15 = vld [vmem:[%s6966_s8 + $0x110] sm:$0xff] }
 0x4c4   :  { %v855_v33 = vmul.f32 1.442695, %v850_v30  ;;  %v6162_v28 = vpack.c.bf16 %v4666_v25, %v4665_v24  ;;  %v6198_v29 = vpack.c.bf16 %v4686_v27, %v4685_v26  ;;  %v4667_v30 = vld [vmem:[%s6966_s8 + $0xd0] sm:$0xff]  ;;  %v4668_v31 = vld [vmem:[%s6966_s8 + $0xd8] sm:$0xff]  ;;  %v4744_v24 = vld [vmem:[%s6966_s8 + $0x148] sm:$0xff] }
 0x4c5   :  { %v853_v34 = vmul.f32 1.442695, %v849_v32  ;;  %v4687_v32 = vld [vmem:[%s6976_s19 + $0xe0] sm:$0xff]  ;;  %v4738_v62 = vld [vmem:[%s6966_s8 + $0x118] sm:$0xff]  ;;  %v4745_v26 = vld [vmem:[%s6966_s8 + $0x150] sm:$0xff] }
 0x4c6   :  { %6717 = vpow2.f32 %v855_v33  ;;  %v4688_v33 = vld [vmem:[%s6976_s19 + $0xe8] sm:$0xff]  ;;  %v4746_v27 = vld [vmem:[%s6966_s8 + $0x158] sm:$0xff] }
 0x4c7   :  { %6719 = vpow2.f32 %v853_v34  ;;  %v6166_v34 = vpack.c.bf16 %v4668_v31, %v4667_v30  ;;  %v4748_v30 = vld [vmem:[%s6966_s8 + $0x168] sm:$0xff] }
 0x4cc   :  { %v6714_v35 = vpop.eup %6713 }
 0x4cd   :  { %v6716_v36 = vpop.eup %6715  ;;  %v870_v37 = vsel %vm836_vm3, %v6714_v35, 0.0 }
 0x4ce   :  { %871 = vadd.xlane.f32.xlu1 %v870_v37  ;;  %v867_v38 = vsel %vm836_vm3, %v6716_v36, 0.0  ;;  %v4670_v37 = vld [vmem:[%s6966_s8 + $0xe8] sm:$0xff] }
 0x4cf   :  { %868 = vadd.xlane.f32.xlu0 %v867_v38  ;;  %v4689_v38 = vld [vmem:[%s6976_s19 + $0xf0] sm:$0xff] }
 0x4d0   :  { %v6718_v39 = vpop.eup %6717 }
 0x4d1   :  { %v6720_v40 = vpop.eup %6719  ;;  %v864_v41 = vsel %vm836_vm3, %v6718_v39, 0.0 }
 0x4d2   :  { %865 = vadd.xlane.f32.xlu1 %v864_v41  ;;  %v861_v42 = vsel %vm836_vm3, %v6720_v40, 0.0 }
 0x4d3   :  { %862 = vadd.xlane.f32.xlu0 %v861_v42  ;;  %v4671_v42 = vld [vmem:[%s6966_s8 + $0xf0] sm:$0xff] }
 0x4d4   :  { %v6174_v44 = vpack.c.bf16 %v4672_v43, %v4671_v42  ;;  %v4776_v42 = vld [vmem:[%s6986_s30 + $0x128] sm:$0xff] }
 0x55b   :  { %v872_v50 = vpop.xlane.xlu1 %871 }
 0x55c   :  { %6721 = vrcp.f32 %v872_v50  ;;  %v869_v51 = vpop.xlane.xlu0 %868  ;;  %v4696_v50 = vld [vmem:[%s6986_s30 + $0x98] sm:$0xff] }
 0x55d   :  { %6723 = vrcp.f32 %v869_v51 }
 0x55f   :  { %v866_v52 = vpop.xlane.xlu1 %865 }
 0x560   :  { %6725 = vrcp.f32 %v866_v52  ;;  %v863_v53 = vpop.xlane.xlu0 %862  ;;  %v4697_v52 = vld [vmem:[%s6986_s30 + $0xa0] sm:$0xff] }
 0x561   :  { %6727 = vrcp.f32 %v863_v53  ;;  %v4698_v53 = vld [vmem:[%s6986_s30 + $0xa8] sm:$0xff] }
 0x566   :  { %v6722_v54 = vpop.eup %6721 }
 0x567   :  { %v6724_v57 = vpop.eup %6723  ;;  %v880_v59 = vmul.f32 %v6722_v54, %v6714_v35  ;;  %v6202_v35 = vpack.c.bf16 %v4688_v33, %v4687_v32  ;;  %v6218_v54 = vpack.c.bf16 %v4698_v53, %v4697_v52  ;;  %v4749_v32 = vld [vmem:[%s6966_s8 + $0x170] sm:$0xff]  ;;  %v4750_v33 = vld [vmem:[%s6966_s8 + $0x178] sm:$0xff] }
 0x568   :  { %v879_v58 = vmul.f32 %v6724_v57, %v6716_v36  ;;  %v4669_v36 = vld [vmem:[%s6966_s8 + $0xe0] sm:$0xff]  ;;  %v6222_v57 = vpack.c.bf16 %v4700_v56, %v4699_v55  ;;  %v4782_v52 = vld [vmem:[%s6986_s30 + $0x158] sm:$0xff]  ;;  %v4784_v55 = vld [vmem:[%s6986_s30 + $0x168] sm:$0xff] }
 0x56a   :  { %v6726_v61 = vpop.eup %6725  ;;  %5513 = vmatprep.mubr.msk.f32.mxu1 %vm836_vm3, %v879_v58  ;;  %v4701_v58 = vld [vmem:[%s6986_s30 + $0xc0] sm:$0xff] }
 0x56b   :  { %v6728_v2 = vpop.eup %6727  ;;  %5514 = vmatmul.mubr.msk.f32.vlgmr.msra.gmra.mrb[10].mxu1 %vm836_vm3, %v880_v59  ;;  %v878_v9 = vmul.f32 %v6726_v61, %v6718_v39  ;;  %v4690_v39 = vld [vmem:[%s6976_s19 + $0xf8] sm:$0xff]  ;;  %v4702_v59 = vld [vmem:[%s6986_s30 + $0xc8] sm:$0xff]  ;;  %v4703_v61 = vld [vmem:[%s6986_s30 + $0xd0] sm:$0xff] }
 0x56c   :  { %6181 = vmatpush3.bf16.msra.mxu1 %v6178_v45  ;;  %5586 = vmatprep.mubr.f32.mxu1 %v7170_v10  ;;  %v877_v8 = vmul.f32 %v6728_v2, %v6720_v40  ;;  %v6170_v40 = vpack.c.bf16 %v4670_v37, %v4669_v36  ;;  %v6206_v41 = vpack.c.bf16 %v4690_v39, %v4689_v38  ;;  %v4693_v45 = vld [vmem:[%s6986_s30 + $0x80] sm:$0xff]  ;;  %v4772_v36 = vld [vmem:[%s6986_s30 + $0x108] sm:$0xff]  ;;  %v4773_v38 = vld [vmem:[%s6986_s30 + $0x110] sm:$0xff] }
 0x56d   :  { %6183 = vmatprep.subr.bf16.mxu1 %v6182_v60  ;;  %v6210_v48 = vpack.c.bf16 %v4694_v46, %v4693_v45  ;;  %v6230_v0 = vpack.c.bf16 %v4704_v63, %v4703_v61  ;;  %v4705_v2 = vld [vmem:[%s6986_s30 + $0xe0] sm:$0xff]  ;;  %v4774_v39 = vld [vmem:[%s6986_s30 + $0x118] sm:$0xff]  ;;  %v4810_v61 = vld [vmem:[%s6966_s8 + $0x188] sm:$0xff] }
 0x56e   :  { %5506 = vmatprep.mubr.msk.f32.mxu0 %vm836_vm3, %v877_v8  ;;  %v6234_v4 = vpack.c.bf16 %v4706_v3, %v4705_v2  ;;  %v4707_v8 = vld [vmem:[%s6986_s30 + $0xf0] sm:$0xff]  ;;  %v4778_v45 = vld [vmem:[%s6986_s30 + $0x138] sm:$0xff] }
 0x56f   :  { %5507 = vmatmul.mubr.msk.f32.vlgmr.msra.gmra.mrb[8].mxu0 %vm836_vm3, %v878_v9  ;;  %v4708_v9 = vld [vmem:[%s6986_s30 + $0xf8] sm:$0xff] }
 0x570   :  { %6149 = vmatpush3.bf16.msra.mxu0 %v6146_v49  ;;  %6185 = vmatpush3.bf16.msra.mxu1 %v6182_v60  ;;  %v4695_v49 = vld [vmem:[%s6986_s30 + $0x90] sm:$0xff]  ;;  %v6226_v60 = vpack.c.bf16 %v4702_v59, %v4701_v58  ;;  %v4786_v58 = vld [vmem:[%s6986_s30 + $0x178] sm:$0xff] }
 0x571   :  { %5548 = vmatprep.mubr.f32.mxu0 %v7170_v10  ;;  %6151 = vmatprep.subr.bf16.mxu0 %v6150_v11  ;;  %v6214_v51 = vpack.c.bf16 %v4696_v50, %v4695_v49  ;;  %v4780_v49 = vld [vmem:[%s6986_s30 + $0x148] sm:$0xff]  ;;  %v4812_v2 = vld [vmem:[%s6966_s8 + $0x198] sm:$0xff] }
 0x572   :  { %6187 = vmatprep.subr.bf16.mxu1 %v6186_v13 }
 0x574   :  { %6153 = vmatpush3.bf16.msra.mxu0 %v6150_v11  ;;  %6189 = vmatpush3.bf16.msra.mxu1 %v6186_v13  ;;  %v6238_v11 = vpack.c.bf16 %v4708_v9, %v4707_v8  ;;  %v4736_v13 = vld [vmem:[%s6966_s8 + $0x108] sm:$0xff] }
 0x575   :  { %6155 = vmatprep.subr.bf16.mxu0 %v6154_v16  ;;  %6191 = vmatprep.subr.bf16.mxu1 %v6190_v18  ;;  %v6278_v14 = vpack.c.bf16 %v4736_v13, %v4735_v12  ;;  %v4814_v8 = vld [vmem:[%s6966_s8 + $0x1a8] sm:$0xff]  ;;  %v4816_v12 = vld [vmem:[%s6966_s8 + $0x1b8] sm:$0xff] }
 0x578   :  { %6157 = vmatpush3.bf16.msra.mxu0 %v6154_v16  ;;  %6193 = vmatpush3.bf16.msra.mxu1 %v6190_v18  ;;  %v6282_v16 = vpack.c.bf16 %v4738_v62, %v4737_v15  ;;  %v4739_v18 = vld [vmem:[%s6966_s8 + $0x120] sm:$0xff]  ;;  %v4818_v15 = vld [vmem:[%s6966_s8 + $0x1c8] sm:$0xff] }
 0x579   :  { %6159 = vmatprep.subr.bf16.mxu0 %v6158_v7  ;;  %6195 = vmatprep.subr.bf16.mxu1 %v6194_v23  ;;  %v6286_v5 = vpack.c.bf16 %v4740_v19, %v4739_v18  ;;  %v4820_v18 = vld [vmem:[%s6966_s8 + $0x1d8] sm:$0xff] }
 0x57c   :  { %6161 = vmatpush3.bf16.msra.mxu0 %v6158_v7  ;;  %6197 = vmatpush3.bf16.msra.mxu1 %v6194_v23  ;;  %v6290_v7 = vpack.c.bf16 %v4742_v21, %v4741_v1  ;;  %v4743_v23 = vld [vmem:[%s6966_s8 + $0x140] sm:$0xff]  ;;  %v4822_v1 = vld [vmem:[%s6966_s8 + $0x1e8] sm:$0xff] }
 0x57d   :  { %6163 = vmatprep.subr.bf16.mxu0 %v6162_v28  ;;  %6199 = vmatprep.subr.bf16.mxu1 %v6198_v29  ;;  %v6294_v25 = vpack.c.bf16 %v4744_v24, %v4743_v23  ;;  %v4824_v23 = vld [vmem:[%s6966_s8 + $0x1f8] sm:$0xff] }
 0x580   :  { %6165 = vmatpush3.bf16.msra.mxu0 %v6162_v28  ;;  %6201 = vmatpush3.bf16.msra.mxu1 %v6198_v29  ;;  %v6298_v28 = vpack.c.bf16 %v4746_v27, %v4745_v26  ;;  %v4747_v29 = vld [vmem:[%s6966_s8 + $0x160] sm:$0xff]  ;;  %v4846_v26 = vld [vmem:[%s6986_s30 + $0x188] sm:$0xff] }
 0x581   :  { %6167 = vmatprep.subr.bf16.mxu0 %v6166_v34  ;;  %6203 = vmatprep.subr.bf16.mxu1 %v6202_v35  ;;  %v6302_v31 = vpack.c.bf16 %v4748_v30, %v4747_v29  ;;  %v4848_v29 = vld [vmem:[%s6986_s30 + $0x198] sm:$0xff] }
 0x584   :  { %6169 = vmatpush3.bf16.msra.mxu0 %v6166_v34  ;;  %6205 = vmatpush3.bf16.msra.mxu1 %v6202_v35  ;;  %v6306_v34 = vpack.c.bf16 %v4750_v33, %v4749_v32  ;;  %v4771_v35 = vld [vmem:[%s6986_s30 + $0x100] sm:$0xff]  ;;  %v4850_v32 = vld [vmem:[%s6986_s30 + $0x1a8] sm:$0xff] }
 0x585   :  { %6171 = vmatprep.subr.bf16.mxu0 %v6170_v40  ;;  %6207 = vmatprep.subr.bf16.mxu1 %v6206_v41  ;;  %v6342_v37 = vpack.c.bf16 %v4772_v36, %v4771_v35  ;;  %v4852_v35 = vld [vmem:[%s6986_s30 + $0x1b8] sm:$0xff] }
 0x588   :  { %6173 = vmatpush3.bf16.msra.mxu0 %v6170_v40  ;;  %6209 = vmatpush3.bf16.msra.mxu1 %v6206_v41  ;;  %v6346_v40 = vpack.c.bf16 %v4774_v39, %v4773_v38  ;;  %v4775_v41 = vld [vmem:[%s6986_s30 + $0x120] sm:$0xff]  ;;  %v4854_v38 = vld [vmem:[%s6986_s30 + $0x1c8] sm:$0xff] }
 0x589   :  { %6175 = vmatprep.subr.bf16.mxu0 %v6174_v44  ;;  %v6350_v43 = vpack.c.bf16 %v4776_v42, %v4775_v41  ;;  %v4856_v41 = vld [vmem:[%s6986_s30 + $0x1d8] sm:$0xff] }
 0x58b   :  { %5587 = vmatmul.mubr.f32.vlgmr.msra.gmra.mrb[12].mxu1 %v7178_v17 }
 0x58c   :  { %6177 = vmatpush3.bf16.msra.mxu0 %v6174_v44  ;;  %5589 = vmatprep.mubr.f32.mxu1 %v7181_v20  ;;  %v4777_v44 = vld [vmem:[%s6986_s30 + $0x130] sm:$0xff] }
 0x58d   :  { %6211 = vmatprep.subr.bf16.mxu0 %v6210_v48  ;;  %v6354_v46 = vpack.c.bf16 %v4778_v45, %v4777_v44  ;;  %v4858_v44 = vld [vmem:[%s6986_s30 + $0x1e8] sm:$0xff] }
 0x58f   :  { %5549 = vmatmul.mubr.f32.vlgmr.msra.gmra.mrb[10].mxu0 %v7178_v17  ;;  %5590 = vmatmul.mubr.f32.gmra.mrb[14].mxu1 %v7188_v22 }
 0x590   :  { %5551 = vmatprep.mubr.f32.mxu0 %v7181_v20  ;;  %6213 = vmatpush3.bf16.msra.mxu0 %v6210_v48  ;;  %v4779_v48 = vld [vmem:[%s6986_s30 + $0x140] sm:$0xff] }
 0x591   :  { %6215 = vmatprep.subr.bf16.mxu0 %v6214_v51  ;;  %v6358_v50 = vpack.c.bf16 %v4780_v49, %v4779_v48  ;;  %v4860_v48 = vld [vmem:[%s6986_s30 + $0x1f8] sm:$0xff] }
 0x593   :  { %5552 = vmatmul.mubr.f32.gmra.mrb[12].mxu0 %v7188_v22 }
 0x594   :  { %6217 = vmatpush3.bf16.msra.mxu0 %v6214_v51  ;;  %5624 = vmatprep.mubr.f32.mxu0 %v7170_v10  ;;  %v4781_v51 = vld [vmem:[%s6986_s30 + $0x150] sm:$0xff] }
 0x595   :  { %6219 = vmatprep.subr.bf16.mxu0 %v6218_v54  ;;  %v6362_v53 = vpack.c.bf16 %v4782_v52, %v4781_v51 }
 0x598   :  { %6221 = vmatpush3.bf16.msra.mxu0 %v6218_v54  ;;  %v4783_v54 = vld [vmem:[%s6986_s30 + $0x160] sm:$0xff] }
 0x599   :  { %6223 = vmatprep.subr.bf16.mxu0 %v6222_v57  ;;  %v6366_v56 = vpack.c.bf16 %v4784_v55, %v4783_v54  ;;  %v4692_v54 = vld [vmem:[%s6981_s24 + $0x1] ss:$0 sm:$0xff] }
 0x59c   :  { %6225 = vmatpush3.bf16.msra.mxu0 %v6222_v57  ;;  %v4785_v57 = vld [vmem:[%s6986_s30 + $0x170] sm:$0xff] }
 0x59d   :  { %6227 = vmatprep.subr.bf16.mxu0 %v6226_v60  ;;  %v6370_v59 = vpack.c.bf16 %v4786_v58, %v4785_v57 }
 0x5a0   :  { %6229 = vmatpush3.bf16.msra.mxu0 %v6226_v60  ;;  %v4809_v60 = vld [vmem:[%s6966_s8 + $0x180] sm:$0xff] }
 0x5a1   :  { %6231 = vmatprep.subr.bf16.mxu0 %v6230_v0  ;;  %v6402_v63 = vpack.c.bf16 %v4810_v61, %v4809_v60 }
 0x5a4   :  { %6233 = vmatpush3.bf16.msra.mxu0 %v6230_v0  ;;  %v4811_v0 = vld [vmem:[%s6966_s8 + $0x190] sm:$0xff] }
 0x5a5   :  { %6235 = vmatprep.subr.bf16.mxu0 %v6234_v4  ;;  %v6406_v3 = vpack.c.bf16 %v4812_v2, %v4811_v0 }
 0x5a8   :  { %6237 = vmatpush3.bf16.msra.mxu0 %v6234_v4  ;;  %v4813_v4 = vld [vmem:[%s6966_s8 + $0x1a0] sm:$0xff] }
 0x5a9   :  { %6239 = vmatprep.subr.bf16.mxu0 %v6238_v11  ;;  %v6410_v9 = vpack.c.bf16 %v4814_v8, %v4813_v4 }
 0x5ac   :  { %6241 = vmatpush3.bf16.msra.mxu0 %v6238_v11  ;;  %v4815_v11 = vld [vmem:[%s6966_s8 + $0x1b0] sm:$0xff] }
 0x5ad   :  { %6279 = vmatprep.subr.bf16.mxu0 %v6278_v14  ;;  %v6414_v13 = vpack.c.bf16 %v4816_v12, %v4815_v11 }
 0x5af   :  { %5625 = vmatmul.mubr.f32.vlgmr.msra.gmra.mrb[14].mxu0 %v7178_v17 }
 0x5b0   :  { %5627 = vmatprep.mubr.f32.mxu0 %v7181_v20  ;;  %6281 = vmatpush3.bf16.msra.mxu0 %v6278_v14  ;;  %v4817_v14 = vld [vmem:[%s6966_s8 + $0x1c0] sm:$0xff] }
 0x5b1   :  { %6283 = vmatprep.subr.bf16.mxu0 %v6282_v16  ;;  %v6418_v62 = vpack.c.bf16 %v4818_v15, %v4817_v14 }
 0x5b3   :  { %5628 = vmatmul.mubr.f32.gmra.mrb[16].mxu0 %v7188_v22 }
 0x5b4   :  { %6285 = vmatpush3.bf16.msra.mxu0 %v6282_v16  ;;  %5718 = vmatprep.mubr.f32.mxu0 %v7170_v10  ;;  %v4819_v16 = vld [vmem:[%s6966_s8 + $0x1d0] sm:$0xff] }
 0x5b5   :  { %6287 = vmatprep.subr.bf16.mxu0 %v6286_v5  ;;  %v6422_v19 = vpack.c.bf16 %v4820_v18, %v4819_v16 }
 0x5b8   :  { %6289 = vmatpush3.bf16.msra.mxu0 %v6286_v5  ;;  %v4821_v5 = vld [vmem:[%s6966_s8 + $0x1e0] sm:$0xff] }
 0x5b9   :  { %6291 = vmatprep.subr.bf16.mxu0 %v6290_v7  ;;  %v6426_v21 = vpack.c.bf16 %v4822_v1, %v4821_v5  ;;  %v4710_v5 = vld [vmem:[%s6991_s6 + $0x1] ss:$0 sm:$0xff] }
 0x5bc   :  { %6293 = vmatpush3.bf16.msra.mxu0 %v6290_v7  ;;  %v4823_v7 = vld [vmem:[%s6966_s8 + $0x1f0] sm:$0xff]  ;;  %s7986_s8 = sld [smem:[#allocation17_spill]] }
 0x5bd   :  { %6295 = vmatprep.subr.bf16.mxu0 %v6294_v25  ;;  %v6430_v24 = vpack.c.bf16 %v4824_v23, %v4823_v7 }
 0x5c0   :  { %6297 = vmatpush3.bf16.msra.mxu0 %v6294_v25  ;;  %v4845_v25 = vld [vmem:[%s6986_s30 + $0x180] sm:$0xff] }
 0x5c1   :  { %6299 = vmatprep.subr.bf16.mxu0 %v6298_v28  ;;  %v6466_v27 = vpack.c.bf16 %v4846_v26, %v4845_v25 }
 0x5c4   :  { %6301 = vmatpush3.bf16.msra.mxu0 %v6298_v28  ;;  %v4847_v28 = vld [vmem:[%s6986_s30 + $0x190] sm:$0xff] }
 0x5c5   :  { %6303 = vmatprep.subr.bf16.mxu0 %v6302_v31  ;;  %v6470_v30 = vpack.c.bf16 %v4848_v29, %v4847_v28 }
 0x5c8   :  { %6305 = vmatpush3.bf16.msra.mxu0 %v6302_v31  ;;  %v4849_v31 = vld [vmem:[%s6986_s30 + $0x1a0] sm:$0xff] }
 0x5c9   :  { %6307 = vmatprep.subr.bf16.mxu0 %v6306_v34  ;;  %v6474_v33 = vpack.c.bf16 %v4850_v32, %v4849_v31 }
 0x5cc   :  { %6309 = vmatpush3.bf16.msra.mxu0 %v6306_v34  ;;  %v4851_v34 = vld [vmem:[%s6986_s30 + $0x1b0] sm:$0xff] }
 0x5cd   :  { %6343 = vmatprep.subr.bf16.mxu0 %v6342_v37  ;;  %v6478_v36 = vpack.c.bf16 %v4852_v35, %v4851_v34 }
 0x5cf   :  { %5719 = vmatmul.mubr.f32.vlgmr.msra.gmra.mrb[18].mxu0 %v7178_v17 }
 0x5d0   :  { %5721 = vmatprep.mubr.f32.mxu0 %v7181_v20  ;;  %6345 = vmatpush3.bf16.msra.mxu0 %v6342_v37  ;;  %v4853_v37 = vld [vmem:[%s6986_s30 + $0x1c0] sm:$0xff] }
 0x5d1   :  { %6347 = vmatprep.subr.bf16.mxu0 %v6346_v40  ;;  %v6482_v39 = vpack.c.bf16 %v4854_v38, %v4853_v37  ;;  %v4788_v38 = vld [vmem:[%s6991_s6 + $0x2] ss:$0 sm:$0xff] }
 0x5d3   :  { %5722 = vmatmul.mubr.f32.gmra.mrb[20].mxu0 %v7188_v22 }
 0x5d4   :  { %6349 = vmatpush3.bf16.msra.mxu0 %v6346_v40  ;;  %5794 = vmatprep.mubr.f32.mxu0 %v7170_v10  ;;  %v4855_v40 = vld [vmem:[%s6986_s30 + $0x1d0] sm:$0xff] }
 0x5d5   :  { %6351 = vmatprep.subr.bf16.mxu0 %v6350_v43  ;;  %v6486_v42 = vpack.c.bf16 %v4856_v41, %v4855_v40 }
 0x5d8   :  { %6353 = vmatpush3.bf16.msra.mxu0 %v6350_v43  ;;  %v4857_v43 = vld [vmem:[%s6986_s30 + $0x1e0] sm:$0xff] }
 0x5d9   :  { %6355 = vmatprep.subr.bf16.mxu0 %v6354_v46  ;;  %v6490_v45 = vpack.c.bf16 %v4858_v44, %v4857_v43 }
 0x5dc   :  { %6357 = vmatpush3.bf16.msra.mxu0 %v6354_v46  ;;  %v4859_v46 = vld [vmem:[%s6986_s30 + $0x1f0] sm:$0xff] }
 0x5dd   :  { %6359 = vmatprep.subr.bf16.mxu0 %v6358_v50  ;;  %v6494_v49 = vpack.c.bf16 %v4860_v48, %v4859_v46 }
 0x5e0   :  { %6361 = vmatpush3.bf16.msra.mxu0 %v6358_v50 }
 0x5e1   :  { %6363 = vmatprep.subr.bf16.mxu0 %v6362_v53 }
 0x5e4   :  { %6365 = vmatpush3.bf16.msra.mxu0 %v6362_v53 }
 0x5e5   :  { %6367 = vmatprep.subr.bf16.mxu0 %v6366_v56 }
 0x5e8   :  { %6369 = vmatpush3.bf16.msra.mxu0 %v6366_v56 }
 0x5e9   :  { %6371 = vmatprep.subr.bf16.mxu0 %v6370_v59 }
 0x5ec   :  { %6373 = vmatpush3.bf16.msra.mxu0 %v6370_v59  ;;  %v4674_v59 = vld [vmem:[%s6971_s14 + $0x1] ss:$0 sm:$0xff] }
 0x5ed   :  { %6403 = vmatprep.subr.bf16.mxu0 %v6402_v63 }
 0x5ef   :  { %5795 = vmatmul.mubr.f32.vlgmr.msra.gmra.mrb[22].mxu0 %v7178_v17 }
 0x5f0   :  { %5797 = vmatprep.mubr.f32.mxu0 %v7181_v20  ;;  %6405 = vmatpush3.bf16.msra.mxu0 %v6402_v63 }
 0x5f1   :  { %6407 = vmatprep.subr.bf16.mxu0 %v6406_v3 }
 0x5f3   :  { %5798 = vmatmul.mubr.f32.gmra.mrb[24].mxu0 %v7188_v22 }
 0x5f4   :  { %6409 = vmatpush3.bf16.msra.mxu0 %v6406_v3  ;;  %5874 = vmatprep.mubr.f32.mxu0 %v7170_v10 }
 0x5f5   :  { %6411 = vmatprep.subr.bf16.mxu0 %v6410_v9 }
 0x5f8   :  { %6413 = vmatpush3.bf16.msra.mxu0 %v6410_v9 }
 0x5f9   :  { %6415 = vmatprep.subr.bf16.mxu0 %v6414_v13 }
 0x5fc   :  { %6417 = vmatpush3.bf16.msra.mxu0 %v6414_v13 }
 0x5fd   :  { %6419 = vmatprep.subr.bf16.mxu0 %v6418_v62 }
 0x600   :  { %6421 = vmatpush3.bf16.msra.mxu0 %v6418_v62 }
 0x601   :  { %6423 = vmatprep.subr.bf16.mxu0 %v6422_v19 }
 0x604   :  { %6425 = vmatpush3.bf16.msra.mxu0 %v6422_v19 }
 0x605   :  { %6427 = vmatprep.subr.bf16.mxu0 %v6426_v21 }
 0x608   :  { %6429 = vmatpush3.bf16.msra.mxu0 %v6426_v21 }
 0x609   :  { %6431 = vmatprep.subr.bf16.mxu0 %v6430_v24 }
 0x60c   :  { %6433 = vmatpush3.bf16.msra.mxu0 %v6430_v24 }
 0x60d   :  { %6467 = vmatprep.subr.bf16.mxu0 %v6466_v27 }
 0x60f   :  { %5875 = vmatmul.mubr.f32.vlgmr.msra.gmra.mrb[26].mxu0 %v7178_v17 }
 0x610   :  { %5877 = vmatprep.mubr.f32.mxu0 %v7181_v20  ;;  %6469 = vmatpush3.bf16.msra.mxu0 %v6466_v27 }
 0x611   :  { %6471 = vmatprep.subr.bf16.mxu0 %v6470_v30 }
 0x613   :  { %5878 = vmatmul.mubr.f32.gmra.mrb[28].mxu0 %v7188_v22 }
 0x614   :  { %6473 = vmatpush3.bf16.msra.mxu0 %v6470_v30  ;;  %5950 = vmatprep.mubr.f32.mxu0 %v7170_v10  ;;  %v7408_v30 = vld [vmem:[%s6971_s14 + $0x2] ss:$0 sm:$0xff] }
 0x615   :  { %6475 = vmatprep.subr.bf16.mxu0 %v6474_v33 }
 0x618   :  { %6477 = vmatpush3.bf16.msra.mxu0 %v6474_v33 }
 0x619   :  { %6479 = vmatprep.subr.bf16.mxu0 %v6478_v36 }
 0x61c   :  { %6481 = vmatpush3.bf16.msra.mxu0 %v6478_v36 }
 0x61d   :  { %6483 = vmatprep.subr.bf16.mxu0 %v6482_v39 }
 0x620   :  { %6485 = vmatpush3.bf16.msra.mxu0 %v6482_v39 }
 0x621   :  { %6487 = vmatprep.subr.bf16.mxu0 %v6486_v42 }
 0x624   :  { %6489 = vmatpush3.bf16.msra.mxu0 %v6486_v42 }
 0x625   :  { %6491 = vmatprep.subr.bf16.mxu0 %v6490_v45 }
 0x628   :  { %6493 = vmatpush3.bf16.msra.mxu0 %v6490_v45 }
 0x629   :  { %6495 = vmatprep.subr.bf16.mxu0 %v6494_v49 }
 0x62c   :  { %6497 = vmatpush3.bf16.msra.mxu0 %v6494_v49 }
 0x62f   :  { %5951 = vmatmul.mubr.f32.vlgmr.msra.gmra.mrb[30].mxu0 %v7178_v17 }
 0x630   :  { %5953 = vmatprep.mubr.f32.mxu0 %v7181_v20 }
 0x633   :  { %5954 = vmatmul.mubr.f32.gmra.mrb[32].mxu0 %v7188_v22 }
 0x634   :  { %3831 = vmatprep.mubr.f32.mxu0 %v6913_v6 }
 0x63e   :  { %v7381_v50 = vpop.f32.mrb[10].mxu1 }
 0x63f   :  { %v7383_v51 = vpop.f32.mrb[11].mxu1 }
 0x642   :  { %v7385_v52 = vpop.f32.mrb[8].mxu0 }
 0x643   :  { %v7387_v53 = vpop.f32.mrb[9].mxu0 }
 0x65e   :  { %v5588_v55 = vpop.f32.mrb[12].mxu1 }
 0x65f   :  { %v1258_v56 = vadd.f32 %v5588_v55, %v4692_v54  ;;  %v1252_v57 = vpop.f32.mrb[13].mxu1 }
 0x660   :  { %v1253_v58 = vadd.f32 %v4692_v54, %v1252_v57 }
 0x662   :  { %v6242_v60 = vpack.c.bf16 %v1258_v56, %v1253_v58  ;;  %v5550_v61 = vpop.f32.mrb[10].mxu0  ;;  %v5591_v63 = vpop.f32.mrb[14].mxu1 }
 0x663   :  { %v1268_v0 = vadd.f32 %v5591_v63, %v4692_v54  ;;  %v1138_v2 = vpop.f32.mrb[11].mxu0  ;;  %v1262_v3 = vpop.f32.mrb[15].mxu1  ;;  %v1144_v9 = vadd.f32 %v5550_v61, %v4674_v59  ;;  %v4862_v63 = vld [vmem:[%s6991_s6 + $0x3] ss:$0 sm:$0xff] }
 0x664   :  { %v1139_v4 = vadd.f32 %v4674_v59, %v1138_v2  ;;  %v1263_v8 = vadd.f32 %v4692_v54, %v1262_v3  ;;  %6244 = vmatprep.subr.msk.bf16.mxu1 %vm7211_vm2, %v6242_v60  ;;  %v7427_v54 = vld [vmem:[%s6971_s14 + $0x3] ss:$0 sm:$0xff]  ;;  %s7987_s14 = sld [smem:[#allocation18_spill]] }
 0x665   :  { %6247 = vmatpush3.bf16.xpose.msk.msra.mxu1 %vm7211_vm2, %v6242_v60  ;;  %v1158_v62 = vmul.f32 0.17677669, %v1144_v9 }
 0x666   :  { %v1157_v11 = vmul.f32 0.17677669, %v1139_v4  ;;  %v6248_v12 = vpack.c.bf16 %v1268_v0, %v1263_v8  ;;  %v5553_v13 = vpop.f32.mrb[12].mxu0 }
 0x667   :  { %v1148_v14 = vpop.f32.mrb[13].mxu0  ;;  %v1154_v18 = vadd.f32 %v5553_v13, %v4674_v59 }
 0x668   :  { %v1149_v15 = vadd.f32 %v4674_v59, %v1148_v14  ;;  %5634 = vmatprep.mubr.msk.f32.mxu1 %vm661_vm1, %v1157_v11  ;;  %6250 = vmatprep.subr.msk.bf16.mxu1 %vm7211_vm2, %v6248_v12 }
 0x669   :  { %v1160_v19 = vmul.f32 0.17677669, %v1154_v18 }
 0x66a   :  { %v1159_v16 = vmul.f32 0.17677669, %v1149_v15 }
 0x66c   :  { %5635 = vmatmul.mubr.msk.f32.vlgmr.msra.gmra.mrb[16].mxu1 %vm661_vm1, %v1158_v62 }
 0x66d   :  { %6253 = vmatpush3.bf16.xpose.msk.msra.mxu1 %vm7211_vm2, %v6248_v12  ;;  %5641 = vmatprep.mubr.msk.f32.mxu1 %vm661_vm1, %v1159_v16 }
 0x674   :  { %5642 = vmatmul.mubr.msk.f32.vlgmr.msra.gmra.mrb[18].mxu1 %vm661_vm1, %v1160_v19 }
 0x682   :  { %v5626_v1 = vpop.f32.mrb[14].mxu0 }
 0x683   :  { %v1368_v21 = vadd.f32 %v5626_v1, %v4710_v5  ;;  %v1362_v7 = vpop.f32.mrb[15].mxu0 }
 0x684   :  { %v1363_v23 = vadd.f32 %v4710_v5, %v1362_v7 }
 0x686   :  { %v6254_v24 = vpack.c.bf16 %v1368_v21, %v1363_v23  ;;  %v5629_v25 = vpop.f32.mrb[16].mxu0 }
 0x687   :  { %v1378_v26 = vadd.f32 %v5629_v25, %v4710_v5  ;;  %v1372_v27 = vpop.f32.mrb[17].mxu0 }
 0x688   :  { %v1373_v28 = vadd.f32 %v4710_v5, %v1372_v27  ;;  %6255 = vmatprep.subr.bf16.mxu1 %v6254_v24 }
 0x689   :  { %6257 = vmatpush3.bf16.msra.mxu1 %v6254_v24 }
 0x68a   :  { %v7404_v29 = vpack.c.bf16 %v1378_v26, %v1373_v28 }
 0x68c   :  { %6259 = vmatprep.subr.bf16.mxu1 %v7404_v29 }
 0x6a2   :  { %v5720_v31 = vpop.f32.mrb[18].mxu0 }
 0x6a3   :  { %v7411_v32 = vadd.f32 %v5720_v31, %v7408_v30  ;;  %v7413_v33 = vpop.f32.mrb[19].mxu0 }
 0x6a6   :  { %v5723_v34 = vpop.f32.mrb[20].mxu0 }
 0x6a7   :  { %v7416_v35 = vadd.f32 %v5723_v34, %v7408_v30  ;;  %v2061_v36 = vpop.f32.mrb[21].mxu0 }
 0x6a8   :  { %v7419_v37 = vadd.f32 %v7408_v30, %v2061_v36 }
 0x6c2   :  { %v5796_v39 = vpop.f32.mrb[22].mxu0 }
 0x6c3   :  { %v2281_v40 = vadd.f32 %v5796_v39, %v4788_v38  ;;  %v2275_v41 = vpop.f32.mrb[23].mxu0 }
 0x6c4   :  { %v2276_v42 = vadd.f32 %v4788_v38, %v2275_v41 }
 0x6c6   :  { %v7422_v43 = vpack.c.bf16 %v2281_v40, %v2276_v42  ;;  %v5799_v44 = vpop.f32.mrb[24].mxu0 }
 0x6c7   :  { %v2291_v45 = vadd.f32 %v5799_v44, %v4788_v38  ;;  %v2285_v46 = vpop.f32.mrb[25].mxu0 }
 0x6c8   :  { %v2286_v48 = vadd.f32 %v4788_v38, %v2285_v46 }
 0x6ca   :  { %v7424_v49 = vpack.c.bf16 %v2291_v45, %v2286_v48 }
 0x6e2   :  { %v5876_v55 = vpop.f32.mrb[26].mxu0 }
 0x6e3   :  { %v7430_v56 = vadd.f32 %v5876_v55, %v7427_v54  ;;  %v7432_v57 = vpop.f32.mrb[27].mxu0 }
 0x6e6   :  { %v5879_v58 = vpop.f32.mrb[28].mxu0 }
 0x6e7   :  { %v7435_v59 = vadd.f32 %v5879_v58, %v7427_v54  ;;  %v2881_v60 = vpop.f32.mrb[29].mxu0 }
 0x6e8   :  { %v7438_v61 = vadd.f32 %v7427_v54, %v2881_v60 }
 0x702   :  { %v5952_v0 = vpop.f32.mrb[30].mxu0 }
 0x703   :  { %v3101_v2 = vadd.f32 %v5952_v0, %v4862_v63  ;;  %v3095_v3 = vpop.f32.mrb[31].mxu0 }
 0x704   :  { %v3096_v4 = vadd.f32 %v4862_v63, %v3095_v3  ;;  %v4723_v3 = vld [vmem:[%s7977_s0 + $0x20] sm:$0xff] }
 0x706   :  { %v7441_v8 = vpack.c.bf16 %v3101_v2, %v3096_v4  ;;  %v5955_v9 = vpop.f32.mrb[32].mxu0  ;;  %v4724_v4 = vld [vmem:[%s7977_s0 + $0x28] sm:$0xff] }
 0x707   :  { %v3111_v11 = vadd.f32 %v5955_v9, %v4862_v63  ;;  %v3105_v12 = vpop.f32.mrb[33].mxu0 }
 0x708   :  { %v3106_v13 = vadd.f32 %v4862_v63, %v3105_v12 }
 0x70a   :  { %v7443_v14 = vpack.c.bf16 %v3111_v11, %v3106_v13  ;;  %v6262_v13 = vpack.c.bf16 %v4724_v4, %v4723_v3  ;;  %v4767_v3 = vld [vmem:[%s6976_s19 + $0x170] sm:$0xff]  ;;  %v4768_v4 = vld [vmem:[%s6976_s19 + $0x178] sm:$0xff] }
 0x73f   :  { %v5636_v15 = vpop.f32.mrb[16].mxu1 }
 0x740   :  { %v1459_v62 = vpop.f32.mrb[17].mxu1  ;;  %v1558_v16 = vsel %vm836_vm3, %v5636_v15, -inf }
 0x741   :  { %1559 = vmax.xlane.f32.xlu1 %v1558_v16  ;;  %v1555_v18 = vsel %vm836_vm3, %v1459_v62, -inf  ;;  %v4726_v16 = vld [vmem:[%s7977_s0 + $0x38] sm:$0xff] }
 0x742   :  { %1556 = vmax.xlane.f32.xlu0 %v1555_v18 }
 0x747   :  { %v5643_v19 = vpop.f32.mrb[18].mxu1 }
 0x748   :  { %v1546_v5 = vpop.f32.mrb[19].mxu1  ;;  %v1564_v1 = vsel %vm836_vm3, %v5643_v19, -inf }
 0x749   :  { %1565 = vmax.xlane.f32.xlu1 %v1564_v1  ;;  %v1561_v21 = vsel %vm836_vm3, %v1546_v5, -inf }
 0x74a   :  { %1562 = vmax.xlane.f32.xlu0 %v1561_v21  ;;  %v1044_v21 = vld [vmem:[%s7977_s0 + $0x8] sm:$0xff] }
 0x7ce   :  { %v1560_v7 = vpop.xlane.xlu1 %1559 }
 0x7cf   :  { %v1568_v23 = vsub.f32 %v5636_v15, %v1560_v7  ;;  %v1557_v24 = vpop.xlane.xlu0 %1556 }
 0x7d0   :  { %v1567_v25 = vsub.f32 %v1459_v62, %v1557_v24  ;;  %v4725_v62 = vld [vmem:[%s7977_s0 + $0x30] sm:$0xff]  ;;  %v1046_v24 = vld [vmem:[%s7977_s0 + $0x18] sm:$0xff] }
 0x7d1   :  { %v1573_v26 = vmul.f32 1.442695, %v1568_v23  ;;  %v6266_v1 = vpack.c.bf16 %v4726_v16, %v4725_v62  ;;  %v1045_v23 = vld [vmem:[%s7977_s0 + $0x10] sm:$0xff] }
 0x7d2   :  { %v1571_v27 = vmul.f32 1.442695, %v1567_v25 }
 0x7d3   :  { %6729 = vpow2.f32 %v1573_v26 }
 0x7d4   :  { %6731 = vpow2.f32 %v1571_v27  ;;  %v6274_v27 = vpack.c.bf16 %v1046_v24, %v1045_v23  ;;  %v2073_v23 = vmul.f32 0.17677669, %v7416_v35 }
 0x7d6   :  { %v1566_v28 = vpop.xlane.xlu1 %1565 }
 0x7d7   :  { %v1570_v31 = vsub.f32 %v5643_v19, %v1566_v28  ;;  %v1563_v34 = vpop.xlane.xlu0 %1562  ;;  %v4753_v28 = vld [vmem:[%s6976_s19 + $0x100] sm:$0xff] }
 0x7d8   :  { %v1569_v36 = vsub.f32 %v1546_v5, %v1563_v34 }
 0x7d9   :  { %v1577_v38 = vmul.f32 1.442695, %v1570_v31  ;;  %v4754_v31 = vld [vmem:[%s6976_s19 + $0x108] sm:$0xff] }
 0x7da   :  { %v1575_v39 = vmul.f32 1.442695, %v1569_v36  ;;  %v6310_v34 = vpack.c.bf16 %v4754_v31, %v4753_v28 }
 0x7db   :  { %6733 = vpow2.f32 %v1577_v38 }
 0x7dc   :  { %6735 = vpow2.f32 %v1575_v39  ;;  %v4755_v39 = vld [vmem:[%s6976_s19 + $0x110] sm:$0xff] }
 0x7dd   :  { %v6730_v40 = vpop.eup %6729 }
 0x7de   :  { %v6732_v41 = vpop.eup %6731  ;;  %v1582_v42 = vsel %vm836_vm3, %v6730_v40, 0.0 }
 0x7df   :  { %1583 = vadd.xlane.f32.xlu1 %v1582_v42  ;;  %v1579_v44 = vsel %vm836_vm3, %v6732_v41, 0.0  ;;  %v4757_v42 = vld [vmem:[%s6976_s19 + $0x120] sm:$0xff] }
 0x7e0   :  { %1580 = vadd.xlane.f32.xlu0 %v1579_v44  ;;  %v4758_v44 = vld [vmem:[%s6976_s19 + $0x128] sm:$0xff] }
 0x7e5   :  { %v6734_v45 = vpop.eup %6733 }
 0x7e6   :  { %v6736_v46 = vpop.eup %6735  ;;  %v1588_v48 = vsel %vm836_vm3, %v6734_v45, 0.0 }
 0x7e7   :  { %1589 = vadd.xlane.f32.xlu1 %v1588_v48  ;;  %v1585_v55 = vsel %vm836_vm3, %v6736_v46, 0.0  ;;  %v4760_v48 = vld [vmem:[%s6976_s19 + $0x138] sm:$0xff] }
 0x7e8   :  { %1586 = vadd.xlane.f32.xlu0 %v1585_v55  ;;  %v4762_v55 = vld [vmem:[%s6976_s19 + $0x148] sm:$0xff] }
 0x86c   :  { %v1584_v58 = vpop.xlane.xlu1 %1583 }
 0x86d   :  { %6737 = vrcp.f32 %v1584_v58  ;;  %v1581_v60 = vpop.xlane.xlu0 %1580  ;;  %v4763_v58 = vld [vmem:[%s6976_s19 + $0x150] sm:$0xff] }
 0x86e   :  { %6739 = vrcp.f32 %v1581_v60  ;;  %v4764_v60 = vld [vmem:[%s6976_s19 + $0x158] sm:$0xff] }
 0x874   :  { %v1590_v63 = vpop.xlane.xlu1 %1589 }
 0x875   :  { %6741 = vrcp.f32 %v1590_v63  ;;  %v1587_v0 = vpop.xlane.xlu0 %1586  ;;  %v6330_v63 = vpack.c.bf16 %v4764_v60, %v4763_v58 }
 0x876   :  { %6743 = vrcp.f32 %v1587_v0  ;;  %v4765_v0 = vld [vmem:[%s6976_s19 + $0x160] sm:$0xff] }
 0x877   :  { %v6738_v2 = vpop.eup %6737 }
 0x878   :  { %v6740_v9 = vpop.eup %6739  ;;  %v1596_v12 = vmul.f32 %v6738_v2, %v6730_v40  ;;  %v4756_v40 = vld [vmem:[%s6976_s19 + $0x118] sm:$0xff] }
 0x879   :  { %v1595_v11 = vmul.f32 %v6740_v9, %v6732_v41  ;;  %v6314_v41 = vpack.c.bf16 %v4756_v40, %v4755_v39  ;;  %v6338_v9 = vpack.c.bf16 %v4768_v4, %v4767_v3 }
 0x87b   :  { %5648 = vmatprep.mubr.msk.f32.mxu1 %vm836_vm3, %v1595_v11  ;;  %v2052_v11 = vadd.f32 %v7408_v30, %v7413_v33  ;;  %v2071_v33 = vmul.f32 0.17677669, %v7411_v32 }
 0x87c   :  { %5649 = vmatmul.mubr.msk.f32.vlgmr.msra.gmra.mrb[20].mxu1 %vm836_vm3, %v1596_v12 }
 0x87d   :  { %6261 = vmatpush3.bf16.msra.mxu1 %v7404_v29  ;;  %v1043_v29 = vld [vmem:[%s7977_s0] sm:$0xff]  ;;  %v2070_v12 = vmul.f32 0.17677669, %v2052_v11  ;;  %v4802_v11 = vld [vmem:[%s7977_s0 + $0x48] sm:$0xff] }
 0x87e   :  { %6263 = vmatprep.subr.bf16.mxu1 %v6262_v13  ;;  %v6270_v7 = vpack.c.bf16 %v1044_v21, %v1043_v29 }
 0x87f   :  { %v6742_v15 = vpop.eup %6741 }
 0x880   :  { %v6744_v18 = vpop.eup %6743  ;;  %v1598_v5 = vmul.f32 %v6742_v15, %v6734_v45  ;;  %v6318_v45 = vpack.c.bf16 %v4758_v44, %v4757_v42 }
 0x881   :  { %v1597_v19 = vmul.f32 %v6744_v18, %v6736_v46  ;;  %v4759_v46 = vld [vmem:[%s6976_s19 + $0x130] sm:$0xff] }
 0x883   :  { %5655 = vmatprep.mubr.msk.f32.mxu1 %vm836_vm3, %v1597_v19 }
 0x884   :  { %5656 = vmatmul.mubr.msk.f32.vlgmr.msra.gmra.mrb[22].mxu1 %vm836_vm3, %v1598_v5 }
 0x885   :  { %6265 = vmatpush3.bf16.msra.mxu1 %v6262_v13  ;;  %v4770_v13 = vld [vmem:[%s6981_s24 + $0x2] ss:$0 sm:$0xff] }
 0x886   :  { %6267 = vmatprep.subr.bf16.mxu1 %v6266_v1 }
 0x889   :  { %6269 = vmatpush3.bf16.msra.mxu1 %v6266_v1 }
 0x88a   :  { %6271 = vmatprep.subr.bf16.mxu1 %v6270_v7 }
 0x94f   :  { %v5650_v25 = vpop.f32.mrb[20].mxu1 }
 0x950   :  { %v1671_v26 = vpop.f32.mrb[21].mxu1 }
 0x951   :  { %5666 = vmatprep.mubr.msk.f32.mxu1 %vm661_vm1, %v1671_v26 }
 0x952   :  { %5667 = vmatmul.mubr.msk.f32.vlgmr.msra.gmra.mrb[24].mxu1 %vm661_vm1, %v5650_v25 }
 0x953   :  { %6273 = vmatpush3.bf16.msra.mxu1 %v6270_v7  ;;  %v2072_v7 = vmul.f32 0.17677669, %v7419_v37 }
 0x954   :  { %6275 = vmatprep.subr.bf16.mxu1 %v6274_v27 }
 0x957   :  { %v5657_v36 = vpop.f32.mrb[22].mxu1  ;;  %6277 = vmatpush3.bf16.msra.mxu1 %v6274_v27 }
 0x958   :  { %v1752_v38 = vpop.f32.mrb[23].mxu1  ;;  %6311 = vmatprep.subr.bf16.mxu1 %v6310_v34 }
 0x959   :  { %5669 = vmatprep.mubr.msk.f32.mxu1 %vm661_vm1, %v1752_v38 }
 0x95a   :  { %5670 = vmatmul.mubr.msk.f32.gmra.mrb[26].mxu1 %vm661_vm1, %v5657_v36 }
 0x95b   :  { %5680 = vmatprep.mubr.msk.f32.mxu1 %vm661_vm1, %v7387_v53  ;;  %v4761_v53 = vld [vmem:[%s6976_s19 + $0x140] sm:$0xff] }
 0x95e   :  { %5681 = vmatmul.mubr.msk.f32.vlgmr.msra.gmra.mrb[24].mxu1 %vm661_vm1, %v7385_v52  ;;  %v6322_v52 = vpack.c.bf16 %v4760_v48, %v4759_v46 }
 0x95f   :  { %6313 = vmatpush3.bf16.msra.mxu1 %v6310_v34  ;;  %5683 = vmatprep.mubr.msk.f32.mxu1 %vm661_vm1, %v7383_v51  ;;  %v6326_v51 = vpack.c.bf16 %v4762_v55, %v4761_v53 }
 0x960   :  { %6315 = vmatprep.subr.bf16.mxu1 %v6314_v41 }
 0x962   :  { %5684 = vmatmul.mubr.msk.f32.gmra.mrb[26].mxu1 %vm661_vm1, %v7381_v50  ;;  %v4766_v50 = vld [vmem:[%s6976_s19 + $0x168] sm:$0xff] }
 0x963   :  { %6317 = vmatpush3.bf16.msra.mxu1 %v6314_v41  ;;  %5756 = vmatprep.mubr.f32.mxu1 %v7170_v10  ;;  %v6334_v2 = vpack.c.bf16 %v4766_v50, %v4765_v0 }
 0x964   :  { %6319 = vmatprep.subr.bf16.mxu1 %v6318_v45 }
 0x967   :  { %6321 = vmatpush3.bf16.msra.mxu1 %v6318_v45 }
 0x968   :  { %6323 = vmatprep.subr.bf16.mxu1 %v6322_v52 }
 0x96b   :  { %6325 = vmatpush3.bf16.msra.mxu1 %v6322_v52 }
 0x96c   :  { %6327 = vmatprep.subr.bf16.mxu1 %v6326_v51 }
 0x96f   :  { %6329 = vmatpush3.bf16.msra.mxu1 %v6326_v51 }
 0x970   :  { %6331 = vmatprep.subr.bf16.mxu1 %v6330_v63 }
 0x973   :  { %6333 = vmatpush3.bf16.msra.mxu1 %v6330_v63 }
 0x974   :  { %6335 = vmatprep.subr.bf16.mxu1 %v6334_v2 }
 0x977   :  { %6337 = vmatpush3.bf16.msra.mxu1 %v6334_v2 }
 0x978   :  { %6339 = vmatprep.subr.bf16.mxu1 %v6338_v9 }
 0x97b   :  { %6341 = vmatpush3.bf16.msra.mxu1 %v6338_v9  ;;  %v4801_v9 = vld [vmem:[%s7977_s0 + $0x40] sm:$0xff] }
 0x97e   :  { %5757 = vmatmul.mubr.f32.vlgmr.msra.gmra.mrb[28].mxu1 %v7178_v17 }
 0x97f   :  { %5759 = vmatprep.mubr.f32.mxu1 %v7181_v20 }
 0x982   :  { %5760 = vmatmul.mubr.f32.gmra.mrb[30].mxu1 %v7188_v22 }
 0x983   :  { %5804 = vmatprep.mubr.msk.f32.mxu1 %vm661_vm1, %v2070_v12 }
 0xa51   :  { %v5758_v15 = vpop.f32.mrb[28].mxu1 }
 0xa52   :  { %v2171_v62 = vadd.f32 %v5758_v15, %v4770_v13  ;;  %v2165_v16 = vpop.f32.mrb[29].mxu1 }
 0xa53   :  { %v2166_v18 = vadd.f32 %v4770_v13, %v2165_v16 }
 0xa55   :  { %v6374_v19 = vpack.c.bf16 %v2171_v62, %v2166_v18  ;;  %v5761_v5 = vpop.f32.mrb[30].mxu1  ;;  %v6394_v62 = vpack.c.bf16 %v4802_v11, %v4801_v9  ;;  %v4803_v18 = vld [vmem:[%s7977_s0 + $0x50] sm:$0xff] }
 0xa56   :  { %v2181_v1 = vadd.f32 %v5761_v5, %v4770_v13  ;;  %v2175_v29 = vpop.f32.mrb[31].mxu1 }
 0xa57   :  { %v2176_v21 = vadd.f32 %v4770_v13, %v2175_v29  ;;  %6376 = vmatprep.subr.msk.bf16.mxu1 %vm7211_vm2, %v6374_v19 }
 0xa58   :  { %6379 = vmatpush3.bf16.xpose.msk.msra.mxu1 %vm7211_vm2, %v6374_v19  ;;  %v4804_v19 = vld [vmem:[%s7977_s0 + $0x58] sm:$0xff] }
 0xa59   :  { %v6380_v30 = vpack.c.bf16 %v2181_v1, %v2176_v21  ;;  %v6398_v21 = vpack.c.bf16 %v4804_v19, %v4803_v18 }
 0xa5b   :  { %6382 = vmatprep.subr.msk.bf16.mxu1 %vm7211_vm2, %v6380_v30 }
 0xa5f   :  { %5805 = vmatmul.mubr.msk.f32.vlgmr.msra.gmra.mrb[32].mxu1 %vm661_vm1, %v2071_v33 }
 0xa60   :  { %6385 = vmatpush3.bf16.xpose.msk.msra.mxu1 %vm7211_vm2, %v6380_v30  ;;  %5811 = vmatprep.mubr.msk.f32.mxu1 %vm661_vm1, %v2072_v7  ;;  %v4828_v30 = vld [vmem:[%s6976_s19 + $0x188] sm:$0xff]  ;;  %v4829_v7 = vld [vmem:[%s6976_s19 + $0x190] sm:$0xff] }
 0xa61   :  { %6387 = vmatprep.subr.bf16.mxu1 %v7422_v43 }
 0xa67   :  { %5812 = vmatmul.mubr.msk.f32.vlgmr.msra.gmra.mrb[34].mxu1 %vm661_vm1, %v2073_v23  ;;  %v4830_v23 = vld [vmem:[%s6976_s19 + $0x198] sm:$0xff] }
 0xa68   :  { %6389 = vmatpush3.bf16.msra.mxu1 %v7422_v43 }
 0xa69   :  { %6391 = vmatprep.subr.bf16.mxu1 %v7424_v49 }
 0xb32   :  { %v5806_v32 = vpop.f32.mrb[32].mxu1 }
 0xb33   :  { %v2372_v24 = vpop.f32.mrb[33].mxu1  ;;  %v2471_v37 = vsel %vm836_vm3, %v5806_v32, -inf }
 0xb34   :  { %2472 = vmax.xlane.f32.xlu1 %v2471_v37  ;;  %v2468_v25 = vsel %vm836_vm3, %v2372_v24, -inf  ;;  %v6438_v37 = vpack.c.bf16 %v4830_v23, %v4829_v7 }
 0xb35   :  { %2469 = vmax.xlane.f32.xlu0 %v2468_v25  ;;  %v4831_v25 = vld [vmem:[%s6976_s19 + $0x1a0] sm:$0xff] }
 0xb3a   :  { %v5813_v26 = vpop.f32.mrb[34].mxu1 }
 0xb3b   :  { %v2459_v27 = vpop.f32.mrb[35].mxu1  ;;  %v2477_v28 = vsel %vm836_vm3, %v5813_v26, -inf }
 0xb3c   :  { %2478 = vmax.xlane.f32.xlu1 %v2477_v28  ;;  %v2474_v35 = vsel %vm836_vm3, %v2459_v27, -inf  ;;  %v4833_v28 = vld [vmem:[%s6976_s19 + $0x1b0] sm:$0xff] }
 0xb3d   :  { %2475 = vmax.xlane.f32.xlu0 %v2474_v35  ;;  %v4834_v35 = vld [vmem:[%s6976_s19 + $0x1b8] sm:$0xff] }
 0xbc1   :  { %v2473_v31 = vpop.xlane.xlu1 %2472 }
 0xbc2   :  { %v2481_v43 = vsub.f32 %v5806_v32, %v2473_v31  ;;  %v2470_v34 = vpop.xlane.xlu0 %2469 }
 0xbc3   :  { %v2480_v36 = vsub.f32 %v2372_v24, %v2470_v34  ;;  %v6446_v34 = vpack.c.bf16 %v4834_v35, %v4833_v28 }
 0xbc4   :  { %v2486_v38 = vmul.f32 1.442695, %v2481_v43 }
 0xbc5   :  { %v2484_v39 = vmul.f32 1.442695, %v2480_v36  ;;  %v4835_v36 = vld [vmem:[%s6976_s19 + $0x1c0] sm:$0xff] }
 0xbc6   :  { %6745 = vpow2.f32 %v2486_v38  ;;  %v4836_v38 = vld [vmem:[%s6976_s19 + $0x1c8] sm:$0xff] }
 0xbc7   :  { %6747 = vpow2.f32 %v2484_v39  ;;  %v6450_v39 = vpack.c.bf16 %v4836_v38, %v4835_v36  ;;  %v4876_v36 = vld [vmem:[%s7977_s0 + $0x68] sm:$0xff] }
 0xbc9   :  { %v2479_v40 = vpop.xlane.xlu1 %2478 }
 0xbca   :  { %v2483_v41 = vsub.f32 %v5813_v26, %v2479_v40  ;;  %v2476_v42 = vpop.xlane.xlu0 %2475  ;;  %v4832_v26 = vld [vmem:[%s6976_s19 + $0x1a8] sm:$0xff]  ;;  %v4837_v40 = vld [vmem:[%s6976_s19 + $0x1d0] sm:$0xff] }
 0xbcb   :  { %v2482_v44 = vsub.f32 %v2459_v27, %v2476_v42  ;;  %v6442_v27 = vpack.c.bf16 %v4832_v26, %v4831_v25 }
 0xbcc   :  { %v2490_v45 = vmul.f32 1.442695, %v2483_v41  ;;  %v4838_v41 = vld [vmem:[%s6976_s19 + $0x1d8] sm:$0xff] }
 0xbcd   :  { %v2488_v46 = vmul.f32 1.442695, %v2482_v44  ;;  %v6454_v42 = vpack.c.bf16 %v4838_v41, %v4837_v40  ;;  %v4839_v44 = vld [vmem:[%s6976_s19 + $0x1e0] sm:$0xff] }
 0xbce   :  { %6749 = vpow2.f32 %v2490_v45  ;;  %v4840_v45 = vld [vmem:[%s6976_s19 + $0x1e8] sm:$0xff] }
 0xbcf   :  { %6751 = vpow2.f32 %v2488_v46  ;;  %v6458_v46 = vpack.c.bf16 %v4840_v45, %v4839_v44  ;;  %v4877_v44 = vld [vmem:[%s7977_s0 + $0x70] sm:$0xff]  ;;  %v4878_v45 = vld [vmem:[%s7977_s0 + $0x78] sm:$0xff] }
 0xbd0   :  { %v6746_v48 = vpop.eup %6745 }
 0xbd1   :  { %v6748_v52 = vpop.eup %6747  ;;  %v2495_v53 = vsel %vm836_vm3, %v6746_v48, 0.0 }
 0xbd2   :  { %2496 = vadd.xlane.f32.xlu1 %v2495_v53  ;;  %v2492_v55 = vsel %vm836_vm3, %v6748_v52, 0.0 }
 0xbd3   :  { %2493 = vadd.xlane.f32.xlu0 %v2492_v55 }
 0xbd8   :  { %v6750_v51 = vpop.eup %6749 }
 0xbd9   :  { %v6752_v58 = vpop.eup %6751  ;;  %v2501_v60 = vsel %vm836_vm3, %v6750_v51, 0.0 }
 0xbda   :  { %2502 = vadd.xlane.f32.xlu1 %v2501_v60  ;;  %v2498_v63 = vsel %vm836_vm3, %v6752_v58, 0.0 }
 0xbdb   :  { %2499 = vadd.xlane.f32.xlu0 %v2498_v63 }
 0xc5f   :  { %v2497_v0 = vpop.xlane.xlu1 %2496 }
 0xc60   :  { %6753 = vrcp.f32 %v2497_v0  ;;  %v2494_v50 = vpop.xlane.xlu0 %2493 }
 0xc61   :  { %6755 = vrcp.f32 %v2494_v50 }
 0xc67   :  { %v2503_v2 = vpop.xlane.xlu1 %2502 }
 0xc68   :  { %6757 = vrcp.f32 %v2503_v2  ;;  %v2500_v3 = vpop.xlane.xlu0 %2499 }
 0xc69   :  { %6759 = vrcp.f32 %v2500_v3 }
 0xc6a   :  { %v6754_v4 = vpop.eup %6753 }
 0xc6b   :  { %v6756_v12 = vpop.eup %6755  ;;  %v2509_v15 = vmul.f32 %v6754_v4, %v6746_v48  ;;  %v4841_v48 = vld [vmem:[%s6976_s19 + $0x1f0] sm:$0xff] }
 0xc6c   :  { %v2508_v13 = vmul.f32 %v6756_v12, %v6748_v52  ;;  %v4842_v52 = vld [vmem:[%s6976_s19 + $0x1f8] sm:$0xff] }
 0xc6d   :  { %v6462_v53 = vpack.c.bf16 %v4842_v52, %v4841_v48 }
 0xc6e   :  { %5818 = vmatprep.mubr.msk.f32.mxu1 %vm836_vm3, %v2508_v13 }
 0xc6f   :  { %5819 = vmatmul.mubr.msk.f32.vlgmr.msra.gmra.mrb[36].mxu1 %vm836_vm3, %v2509_v15 }
 0xc70   :  { %6393 = vmatpush3.bf16.msra.mxu1 %v7424_v49  ;;  %v4827_v49 = vld [vmem:[%s6976_s19 + $0x180] sm:$0xff]  ;;  %s6914_s19 = smov [#allocation5]  }
 0xc71   :  { %6395 = vmatprep.subr.bf16.mxu1 %v6394_v62  ;;  %v6434_v33 = vpack.c.bf16 %v4828_v30, %v4827_v49 }
 0xc72   :  { %v6758_v16 = vpop.eup %6757 }
 0xc73   :  { %v6760_v5 = vpop.eup %6759  ;;  %v2511_v29 = vmul.f32 %v6758_v16, %v6750_v51  ;;  %v4844_v51 = vld [vmem:[%s6981_s24 + $0x3] ss:$0 sm:$0xff]  ;;  %s4588_s24 = sshll.u32 %s6914_s19, 4  ;;  %s4589_s24 = int_to_ptr.vmem [resolvable:$true] %s4588_s24 }
 0xc74   :  { %v2510_v1 = vmul.f32 %v6760_v5, %v6752_v58  ;;  %s6831_s30 = scalar_lea.vmem %s4589_s24, 128  ;;  %p6836_p1 = scmp.lt.s32.totalorder %s4589_s24, %s4589_s24 }
 0xc75   :  { %p6832_p0 = scmp.ne.s32.totalorder %s4589_s24, %s6831_s30  ;;  %p6837_p2 = scmp.lt.s32.totalorder %s6831_s30, %s6831_s30 }
 0xc76   :  { %5825 = vmatprep.mubr.msk.f32.mxu1 %vm836_vm3, %v2510_v1 }
 0xc77   :  { %5826 = vmatmul.mubr.msk.f32.vlgmr.msra.gmra.mrb[38].mxu1 %vm836_vm3, %v2511_v29  ;;  %p6838_p3 = por %p6837_p2, %p6836_p1 }
 0xc78   :  { %6397 = vmatpush3.bf16.msra.mxu1 %v6394_v62 }
 0xc79   :  { %6399 = vmatprep.subr.bf16.mxu1 %v6398_v21  ;;  %p6839_p4 = pnand %p6838_p3, %p6832_p0 }
 0xc7c   :  { %6401 = vmatpush3.bf16.msra.mxu1 %v6398_v21 }
 0xc7d   :  { %6435 = vmatprep.subr.bf16.mxu1 %v6434_v33 }
 0xd42   :  { %v5820_v32 = vpop.f32.mrb[36].mxu1 }
 0xd43   :  { %v2584_v24 = vpop.f32.mrb[37].mxu1 }
 0xd44   :  { %5836 = vmatprep.mubr.msk.f32.mxu1 %vm661_vm1, %v2584_v24 }
 0xd45   :  { %5837 = vmatmul.mubr.msk.f32.vlgmr.msra.gmra.mrb[24].mxu1 %vm661_vm1, %v5820_v32 }
 0xd46   :  { %6437 = vmatpush3.bf16.msra.mxu1 %v6434_v33 }
 0xd47   :  { %6439 = vmatprep.subr.bf16.mxu1 %v6438_v37 }
 0xd4a   :  { %6441 = vmatpush3.bf16.msra.mxu1 %v6438_v37  ;;  %v5827_v31 = vpop.f32.mrb[38].mxu1 }
 0xd4b   :  { %v2665_v43 = vpop.f32.mrb[39].mxu1  ;;  %6443 = vmatprep.subr.bf16.mxu1 %v6442_v27 }
 0xd4c   :  { %5839 = vmatprep.mubr.msk.f32.mxu1 %vm661_vm1, %v2665_v43 }
 0xd4d   :  { %5840 = vmatmul.mubr.msk.f32.gmra.mrb[26].mxu1 %vm661_vm1, %v5827_v31 }
 0xd4e   :  { %6445 = vmatpush3.bf16.msra.mxu1 %v6442_v27  ;;  %5912 = vmatprep.mubr.f32.mxu1 %v7170_v10  ;;  %v2872_v10 = vadd.f32 %v7427_v54, %v7432_v57  ;;  %v2893_v54 = vmul.f32 0.17677669, %v7435_v59 }
 0xd4f   :  { %6447 = vmatprep.subr.bf16.mxu1 %v6446_v34 }
 0xd50   :  { %v2890_v55 = vmul.f32 0.17677669, %v2872_v10 }
 0xd52   :  { %6449 = vmatpush3.bf16.msra.mxu1 %v6446_v34  ;;  %v4875_v34 = vld [vmem:[%s7977_s0 + $0x60] sm:$0xff] }
 0xd53   :  { %6451 = vmatprep.subr.bf16.mxu1 %v6450_v39  ;;  %v6518_v41 = vpack.c.bf16 %v4876_v36, %v4875_v34  ;;  %v3697_v34 = vld [vmem:[%s7979_s9 + $0x80] sm:$0xff] }
 0xd56   :  { %6453 = vmatpush3.bf16.msra.mxu1 %v6450_v39 }
 0xd57   :  { %6455 = vmatprep.subr.bf16.mxu1 %v6454_v42 }
 0xd5a   :  { %6457 = vmatpush3.bf16.msra.mxu1 %v6454_v42 }
 0xd5b   :  { %6459 = vmatprep.subr.bf16.mxu1 %v6458_v46 }
 0xd5e   :  { %6461 = vmatpush3.bf16.msra.mxu1 %v6458_v46 }
 0xd5f   :  { %6463 = vmatprep.subr.bf16.mxu1 %v6462_v53 }
 0xd62   :  { %6465 = vmatpush3.bf16.msra.mxu1 %v6462_v53  ;;  %v6522_v53 = vpack.c.bf16 %v4878_v45, %v4877_v44 }
 0xd65   :  { %5913 = vmatmul.mubr.f32.vlgmr.msra.gmra.mrb[40].mxu1 %v7178_v17 }
 0xd66   :  { %5915 = vmatprep.mubr.f32.mxu1 %v7181_v20  ;;  %v2891_v20 = vmul.f32 0.17677669, %v7430_v56 }
 0xd69   :  { %5916 = vmatmul.mubr.f32.gmra.mrb[42].mxu1 %v7188_v22  ;;  %v2892_v22 = vmul.f32 0.17677669, %v7438_v61 }
 0xd6a   :  { %5960 = vmatprep.mubr.msk.f32.mxu1 %vm661_vm1, %v2890_v55 }
 0xe38   :  { %v5914_v58 = vpop.f32.mrb[40].mxu1 }
 0xe39   :  { %v2991_v60 = vadd.f32 %v5914_v58, %v4844_v51  ;;  %v2985_v63 = vpop.f32.mrb[41].mxu1 }
 0xe3a   :  { %v2986_v0 = vadd.f32 %v4844_v51, %v2985_v63  ;;  %v6827_v63 = vld [vmem:[#allocation2 + $0x8] sm:$0xff] }
 0xe3c   :  { %v6498_v50 = vpack.c.bf16 %v2991_v60, %v2986_v0  ;;  %v5917_v2 = vpop.f32.mrb[42].mxu1  ;;  %v4883_v60 = vld [vmem:[%s7978_s5] ss:$0 sm:$0xff] }
 0xe3d   :  { %v3001_v3 = vadd.f32 %v5917_v2, %v4844_v51  ;;  %v2995_v4 = vpop.f32.mrb[43].mxu1  ;;  %v6828_v2 = vld [vmem:[#allocation2] sm:$0xff] }
 0xe3e   :  { %v2996_v9 = vadd.f32 %v4844_v51, %v2995_v4  ;;  %6500 = vmatprep.subr.msk.bf16.mxu1 %vm7211_vm2, %v6498_v50 }
 0xe3f   :  { %6503 = vmatpush3.bf16.xpose.msk.msra.mxu1 %vm7211_vm2, %v6498_v50 }
 0xe40   :  { %v6504_v17 = vpack.c.bf16 %v3001_v3, %v2996_v9 }
 0xe42   :  { %6506 = vmatprep.subr.msk.bf16.mxu1 %vm7211_vm2, %v6504_v17 }
 0xe46   :  { %5961 = vmatmul.mubr.msk.f32.vlgmr.msra.gmra.mrb[44].mxu1 %vm661_vm1, %v2891_v20  ;;  %v6829_v20 = vld [vmem:[#allocation2 + $0x18] sm:$0xff] }
 0xe47   :  { %6509 = vmatpush3.bf16.xpose.msk.msra.mxu1 %vm7211_vm2, %v6504_v17  ;;  %5967 = vmatprep.mubr.msk.f32.mxu1 %vm661_vm1, %v2892_v22 }
 0xe48   :  { %6511 = vmatprep.subr.bf16.mxu1 %v7441_v8 }
 0xe4e   :  { %5968 = vmatmul.mubr.msk.f32.vlgmr.msra.gmra.mrb[46].mxu1 %vm661_vm1, %v2893_v54 }
 0xe4f   :  { %6513 = vmatpush3.bf16.msra.mxu1 %v7441_v8 }
 0xe50   :  { %6515 = vmatprep.subr.bf16.mxu1 %v7443_v14 }
 0xf19   :  { %v5962_v56 = vpop.f32.mrb[44].mxu1 }
 0xf1a   :  { %v3192_v57 = vpop.f32.mrb[45].mxu1  ;;  %v3291_v61 = vsel %vm836_vm3, %v5962_v56, -inf }
 0xf1b   :  { %3292 = vmax.xlane.f32.xlu1 %v3291_v61  ;;  %v3288_v47 = vsel %vm836_vm3, %v3192_v57, -inf }
 0xf1c   :  { %3289 = vmax.xlane.f32.xlu0 %v3288_v47 }
 0xf21   :  { %v5969_v11 = vpop.f32.mrb[46].mxu1 }
 0xf22   :  { %v3279_v12 = vpop.f32.mrb[47].mxu1  ;;  %v3297_v13 = vsel %vm836_vm3, %v5969_v11, -inf }
 0xf23   :  { %3298 = vmax.xlane.f32.xlu1 %v3297_v13  ;;  %v3294_v59 = vsel %vm836_vm3, %v3279_v12, -inf  ;;  %v3684_v13 = vld [vmem:[%s7979_s9 + $0x18] sm:$0xff] }
 0xf24   :  { %3295 = vmax.xlane.f32.xlu0 %v3294_v59 }
 0xfa8   :  { %v3293_v15 = vpop.xlane.xlu1 %3292 }
 0xfa9   :  { %v3301_v8 = vsub.f32 %v5962_v56, %v3293_v15  ;;  %v3290_v62 = vpop.xlane.xlu0 %3289  ;;  %v6830_v56 = vld [vmem:[#allocation2 + $0x10] sm:$0xff]  ;;  %v3688_v15 = vld [vmem:[%s7979_s9 + $0x38] sm:$0xff] }
 0xfaa   :  { %v3300_v16 = vsub.f32 %v3192_v57, %v3290_v62  ;;  %v3685_v62 = vld [vmem:[%s7979_s9 + $0x20] sm:$0xff] }
 0xfab   :  { %v3306_v18 = vmul.f32 1.442695, %v3301_v8  ;;  %v3681_v8 = vld [vmem:[%s7979_s9] sm:$0xff] }
 0xfac   :  { %v3304_v19 = vmul.f32 1.442695, %v3300_v16  ;;  %v6558_v16 = vpack.c.bf16 %v3688_v15, %v3684_v13  ;;  %v3707_v13 = vld [vmem:[%s7979_s9 + $0xd0] sm:$0xff] }
 0xfad   :  { %6761 = vpow2.f32 %v3306_v18  ;;  %v6528_v18 = vpack.c.bf16 %v3685_v62, %v3681_v8  ;;  %v3714_v8 = vld [vmem:[%s7979_s9 + $0x108] sm:$0xff] }
 0xfae   :  { %6763 = vpow2.f32 %v3304_v19  ;;  %v3683_v19 = vld [vmem:[%s7979_s9 + $0x10] sm:$0xff]  ;;  %v3718_v62 = vld [vmem:[%s7979_s9 + $0x128] sm:$0xff] }
 0xfb0   :  { %v3299_v5 = vpop.xlane.xlu1 %3298 }
 0xfb1   :  { %v3303_v1 = vsub.f32 %v5969_v11, %v3299_v5  ;;  %v3296_v29 = vpop.xlane.xlu0 %3295  ;;  %v3682_v11 = vld [vmem:[%s7979_s9 + $0x8] sm:$0xff]  ;;  %v3687_v5 = vld [vmem:[%s7979_s9 + $0x30] sm:$0xff] }
 0xfb2   :  { %v3302_v21 = vsub.f32 %v3279_v12, %v3296_v29  ;;  %v3686_v12 = vld [vmem:[%s7979_s9 + $0x28] sm:$0xff]  ;;  %v6560_v29 = vpack.c.bf16 %v3687_v5, %v3683_v19  ;;  %v3720_v19 = vld [vmem:[%s7979_s9 + $0x138] sm:$0xff]  ;;  %v3713_v5 = vld [vmem:[%s7979_s9 + $0x100] sm:$0xff] }
 0xfb3   :  { %v3310_v49 = vmul.f32 1.442695, %v3303_v1  ;;  %v6526_v59 = vpack.c.bf16 %v3686_v12, %v3682_v11  ;;  %v3690_v1 = vld [vmem:[%s7979_s9 + $0x48] sm:$0xff] }
 0xfb4   :  { %v3308_v30 = vmul.f32 1.442695, %v3302_v21  ;;  %v3694_v21 = vld [vmem:[%s7979_s9 + $0x68] sm:$0xff] }
 0xfb5   :  { %6765 = vpow2.f32 %v3310_v49  ;;  %6527 = vmatprep.subr.bf16.mxu0 %v6526_v59  ;;  %v3692_v49 = vld [vmem:[%s7979_s9 + $0x58] sm:$0xff]  ;;  %v3711_v59 = vld [vmem:[%s7979_s9 + $0xf0] sm:$0xff] }
 0xfb6   :  { %6767 = vpow2.f32 %v3308_v30  ;;  %v3696_v30 = vld [vmem:[%s7979_s9 + $0x78] sm:$0xff]  ;;  %6529 = vmatpush1.bf16.msra.mxu0 %v6528_v18  ;;  %v6572_v15 = vpack.c.bf16 %v3711_v59, %v3707_v13  ;;  %v6542_v18 = vpack.c.bf16 %v3718_v62, %v3714_v8 }
 0xfb7   :  { %v6762_v33 = vpop.eup %6761 }
 0xfb8   :  { %v6764_v7 = vpop.eup %6763  ;;  %v3315_v23 = vsel %vm836_vm3, %v6762_v33, 0.0 }
 0xfb9   :  { %3316 = vadd.xlane.f32.xlu1 %v3315_v23  ;;  %v3312_v32 = vsel %vm836_vm3, %v6764_v7, 0.0  ;;  %v3689_v23 = vld [vmem:[%s7979_s9 + $0x40] sm:$0xff] }
 0xfba   :  { %3313 = vadd.xlane.f32.xlu0 %v3312_v32  ;;  %v3693_v32 = vld [vmem:[%s7979_s9 + $0x60] sm:$0xff] }
 0xfbf   :  { %v6766_v24 = vpop.eup %6765 }
 0xfc0   :  { %v6768_v37 = vpop.eup %6767  ;;  %v3321_v25 = vsel %vm836_vm3, %v6766_v24, 0.0 }
 0xfc1   :  { %3322 = vadd.xlane.f32.xlu1 %v3321_v25  ;;  %v3318_v26 = vsel %vm836_vm3, %v6768_v37, 0.0  ;;  %v3695_v25 = vld [vmem:[%s7979_s9 + $0x70] sm:$0xff] }
 0xfc2   :  { %3319 = vadd.xlane.f32.xlu0 %v3318_v26  ;;  %v3698_v26 = vld [vmem:[%s7979_s9 + $0x88] sm:$0xff] }
0x1046   :  { %v3317_v27 = vpop.xlane.xlu1 %3316 }
0x1047   :  { %6769 = vrcp.f32 %v3317_v27  ;;  %v3314_v28 = vpop.xlane.xlu0 %3313  ;;  %v3702_v27 = vld [vmem:[%s7979_s9 + $0xa8] sm:$0xff] }
0x1048   :  { %6771 = vrcp.f32 %v3314_v28 }
0x104e   :  { %v3323_v35 = vpop.xlane.xlu1 %3322 }
0x104f   :  { %6773 = vrcp.f32 %v3323_v35  ;;  %v3320_v31 = vpop.xlane.xlu0 %3319  ;;  %v6534_v35 = vpack.c.bf16 %v3702_v27, %v3698_v26  ;;  %v3725_v26 = vld [vmem:[%s7979_s9 + $0x160] sm:$0xff] }
0x1050   :  { %6775 = vrcp.f32 %v3320_v31  ;;  %v3700_v31 = vld [vmem:[%s7979_s9 + $0x98] sm:$0xff] }
0x1051   :  { %v6770_v43 = vpop.eup %6769 }
0x1052   :  { %v6772_v38 = vpop.eup %6771  ;;  %v3329_v40 = vmul.f32 %v6770_v43, %v6762_v33  ;;  %v6530_v33 = vpack.c.bf16 %v3694_v21, %v3690_v1  ;;  %v3704_v43 = vld [vmem:[%s7979_s9 + $0xb8] sm:$0xff]  ;;  %v3717_v1 = vld [vmem:[%s7979_s9 + $0x120] sm:$0xff] }
0x1053   :  { %v3328_v39 = vmul.f32 %v6772_v38, %v6764_v7  ;;  %v6562_v7 = vpack.c.bf16 %v3696_v30, %v3692_v49  ;;  %v6566_v36 = vpack.c.bf16 %v3704_v43, %v3700_v31  ;;  %v3701_v38 = vld [vmem:[%s7979_s9 + $0xa0] sm:$0xff]  ;;  %v6544_v21 = vpack.c.bf16 %v3717_v1, %v3713_v5  ;;  %v3715_v49 = vld [vmem:[%s7979_s9 + $0x110] sm:$0xff] }
0x1054   :  { %6531 = vmatprep.subr.bf16.mxu0 %v6530_v33  ;;  %v3719_v30 = vld [vmem:[%s7979_s9 + $0x130] sm:$0xff] }
0x1055   :  { %5974 = vmatprep.mubr.msk.f32.mxu1 %vm836_vm3, %v3328_v39  ;;  %v3699_v39 = vld [vmem:[%s7979_s9 + $0x90] sm:$0xff]  ;;  %v6576_v33 = vpack.c.bf16 %v3719_v30, %v3715_v49  ;;  %v4885_v30 = vld [vmem:[%s7981_s17] ss:$0 sm:$0xff] }
0x1056   :  { %5975 = vmatmul.mubr.msk.f32.vlgmr.msra.gmra.mrb[48].mxu1 %vm836_vm3, %v3329_v40  ;;  %v3703_v40 = vld [vmem:[%s7979_s9 + $0xb0] sm:$0xff] }
0x1057   :  { %6517 = vmatpush3.bf16.msra.mxu1 %v7443_v14  ;;  %v3727_v31 = vld [vmem:[%s7979_s9 + $0x170] sm:$0xff] }
0x1058   :  { %6519 = vmatprep.subr.bf16.mxu1 %v6518_v41 }
0x1059   :  { %v6774_v42 = vpop.eup %6773 }
0x105a   :  { %v6776_v46 = vpop.eup %6775  ;;  %v3331_v52 = vmul.f32 %v6774_v42, %v6766_v24  ;;  %v3691_v24 = vld [vmem:[%s7979_s9 + $0x50] sm:$0xff]  ;;  %v6568_v42 = vpack.c.bf16 %v3703_v40, %v3699_v39  ;;  %v3736_v40 = vld [vmem:[%s7979_s9 + $0x1b8] sm:$0xff] }
0x105b   :  { %v3330_v48 = vmul.f32 %v6776_v46, %v6768_v37  ;;  %v6532_v37 = vpack.c.bf16 %v3693_v32, %v3689_v23  ;;  %v6564_v28 = vpack.c.bf16 %v3695_v25, %v3691_v24  ;;  %v3726_v23 = vld [vmem:[%s7979_s9 + $0x168] sm:$0xff]  ;;  %v3724_v32 = vld [vmem:[%s7979_s9 + $0x158] sm:$0xff]  ;;  %v3721_v25 = vld [vmem:[%s7979_s9 + $0x140] sm:$0xff] }
0x105d   :  { %5981 = vmatprep.mubr.msk.f32.mxu1 %vm836_vm3, %v3330_v48  ;;  %6533 = vmatpush1.bf16.msra.mxu0 %v6532_v37  ;;  %v3728_v37 = vld [vmem:[%s7979_s9 + $0x178] sm:$0xff] }
0x105e   :  { %5982 = vmatmul.mubr.msk.f32.vlgmr.msra.gmra.mrb[50].mxu1 %vm836_vm3, %v3331_v52  ;;  %6535 = vmatprep.subr.bf16.mxu0 %v6534_v35  ;;  %v6578_v27 = vpack.c.bf16 %v3728_v37, %v3724_v32  ;;  %v3723_v35 = vld [vmem:[%s7979_s9 + $0x150] sm:$0xff] }
0x105f   :  { %6521 = vmatpush3.bf16.msra.mxu1 %v6518_v41  ;;  %v6536_v41 = vpack.c.bf16 %v3701_v38, %v3697_v34  ;;  %v6580_v43 = vpack.c.bf16 %v3727_v31, %v3723_v35  ;;  %v3730_v34 = vld [vmem:[%s7979_s9 + $0x188] sm:$0xff]  ;;  %v3732_v38 = vld [vmem:[%s7979_s9 + $0x198] sm:$0xff]  ;;  %v4137_v35 = vld [vmem:[%s7982_s21 + $0x180] sm:$0xff] }
0x1060   :  { %6523 = vmatprep.subr.bf16.mxu1 %v6522_v53 }
0x1061   :  { %6537 = vmatpush1.bf16.msra.mxu0 %v6536_v41  ;;  %v3729_v41 = vld [vmem:[%s7979_s9 + $0x180] sm:$0xff] }
0x1063   :  { %6525 = vmatpush3.bf16.msra.mxu1 %v6522_v53 }
0x1064   :  { %6559 = vmatprep.subr.bf16.mxu1 %v6558_v16  ;;  %v3716_v16 = vld [vmem:[%s7979_s9 + $0x118] sm:$0xff] }
0x1129   :  { %v5976_v10 = vpop.f32.mrb[48].mxu1 }
0x112a   :  { %v3404_v55 = vpop.f32.mrb[49].mxu1 }
0x112b   :  { %5992 = vmatprep.mubr.msk.f32.mxu1 %vm661_vm1, %v3404_v55 }
0x112c   :  { %5993 = vmatmul.mubr.msk.f32.vlgmr.msra.gmra.mrb[24].mxu1 %vm661_vm1, %v5976_v10 }
0x112d   :  { %6561 = vmatpush1.bf16.msra.mxu1 %v6560_v29  ;;  %v6574_v29 = vpack.c.bf16 %v3720_v19, %v3716_v16 }
0x112e   :  { %6563 = vmatprep.subr.bf16.mxu1 %v6562_v7  ;;  %v3722_v7 = vld [vmem:[%s7979_s9 + $0x148] sm:$0xff] }
0x112f   :  { %v6546_v24 = vpack.c.bf16 %v3726_v23, %v3722_v7 }
0x1131   :  { %v5983_v14 = vpop.f32.mrb[50].mxu1  ;;  %6565 = vmatpush1.bf16.msra.mxu1 %v6564_v28  ;;  %v6548_v28 = vpack.c.bf16 %v3725_v26, %v3721_v25 }
0x1132   :  { %v3485_v51 = vpop.f32.mrb[51].mxu1  ;;  %6567 = vmatprep.subr.bf16.mxu1 %v6566_v36  ;;  %v3734_v36 = vld [vmem:[%s7979_s9 + $0x1a8] sm:$0xff] }
0x1133   :  { %5995 = vmatprep.mubr.msk.f32.mxu1 %vm661_vm1, %v3485_v51  ;;  %v6550_v39 = vpack.c.bf16 %v3734_v36, %v3730_v34  ;;  %v4089_v34 = vld [vmem:[%s7982_s21] sm:$0xff]  ;;  %v4090_v36 = vld [vmem:[%s7982_s21 + $0x8] sm:$0xff] }
0x1134   :  { %5996 = vmatmul.mubr.msk.f32.gmra.mrb[26].mxu1 %vm661_vm1, %v5983_v14 }
0x1135   :  { %3920 = vmatprep.mubr.f32.mxu1 %v6913_v6  ;;  %6569 = vmatpush1.bf16.msra.mxu1 %v6568_v42  ;;  %v3733_v42 = vld [vmem:[%s7979_s9 + $0x1a0] sm:$0xff] }
0x11ff   :  { %v5994_v58 = vpop.f32.mrb[24].mxu1 }
0x1200   :  { %v3601_v0 = vadd.f32 %v6827_v63, %v5994_v58  ;;  %v3577_v50 = vpop.f32.mrb[25].mxu1 }
0x1201   :  { %v3600_v3 = vadd.f32 %v6828_v2, %v3577_v50 }
0x1202   :  { %v7604_v4 = vadd.f32 %v4883_v60, %v3601_v0 }
0x1203   :  { %v7606_v9 = vadd.f32 %v4883_v60, %v3600_v3  ;;  %v3706_v3 = vld [vmem:[%s7979_s9 + $0xc8] sm:$0xff] }
0x1204   :  { %3619 = vadd.xlane.f32.xlu1 %v7604_v4 }
0x1205   :  { %3617 = vadd.xlane.f32.xlu0 %v7606_v9 }
0x1207   :  { %v5997_v17 = vpop.f32.mrb[26].mxu1 }
0x1208   :  { %v3603_v22 = vadd.f32 %v6829_v20, %v5997_v17  ;;  %v3587_v54 = vpop.f32.mrb[27].mxu1  ;;  %v3710_v17 = vld [vmem:[%s7979_s9 + $0xe8] sm:$0xff]  ;;  %v3708_v20 = vld [vmem:[%s7979_s9 + $0xd8] sm:$0xff] }
0x1209   :  { %v3602_v57 = vadd.f32 %v6830_v56, %v3587_v54  ;;  %v3712_v54 = vld [vmem:[%s7979_s9 + $0xf8] sm:$0xff]  ;;  %v3705_v56 = vld [vmem:[%s7979_s9 + $0xc0] sm:$0xff] }
0x120a   :  { %v7610_v61 = vadd.f32 %v4883_v60, %v3603_v22  ;;  %v6538_v22 = vpack.c.bf16 %v3710_v17, %v3706_v3  ;;  %v6570_v11 = vpack.c.bf16 %v3712_v54, %v3708_v20  ;;  %v3739_v20 = vld [vmem:[%s7979_s9 + $0x1d0] sm:$0xff] }
0x120b   :  { %v7612_v47 = vadd.f32 %v4883_v60, %v3602_v57  ;;  %v3709_v57 = vld [vmem:[%s7979_s9 + $0xe0] sm:$0xff] }
0x120c   :  { %3623 = vadd.xlane.f32.xlu1 %v7610_v61  ;;  %v6540_v12 = vpack.c.bf16 %v3709_v57, %v3705_v56  ;;  %6539 = vmatprep.subr.bf16.mxu0 %v6538_v22  ;;  %v3743_v22 = vld [vmem:[%s7979_s9 + $0x1f0] sm:$0xff] }
0x120d   :  { %3621 = vadd.xlane.f32.xlu0 %v7612_v47  ;;  %6571 = vmatprep.subr.bf16.mxu1 %v6570_v11  ;;  %v6588_v54 = vpack.c.bf16 %v3743_v22, %v3739_v20  ;;  %v4142_v22 = vld [vmem:[%s7982_s21 + $0x1a8] sm:$0xff] }
0x120e   :  { %6541 = vmatpush1.bf16.msra.mxu0 %v6540_v12  ;;  %6573 = vmatpush1.bf16.msra.mxu1 %v6572_v15 }
0x120f   :  { %6543 = vmatprep.subr.bf16.mxu0 %v6542_v18  ;;  %6575 = vmatprep.subr.bf16.mxu1 %v6574_v29  ;;  %v4884_v29 = vld [vmem:[%s7980_s13] ss:$0 sm:$0xff] }
0x1212   :  { %6545 = vmatpush1.bf16.msra.mxu0 %v6544_v21  ;;  %6577 = vmatpush1.bf16.msra.mxu1 %v6576_v33 }
0x1213   :  { %6547 = vmatprep.subr.bf16.mxu0 %v6546_v24  ;;  %6579 = vmatprep.subr.bf16.mxu1 %v6578_v27 }
0x1216   :  { %6549 = vmatpush1.bf16.msra.mxu0 %v6548_v28  ;;  %6581 = vmatpush1.bf16.msra.mxu1 %v6580_v43  ;;  %v4106_v28 = vld [vmem:[%s7982_s21 + $0x88] sm:$0xff] }
0x1217   :  { %6551 = vmatprep.subr.bf16.mxu0 %v6550_v39  ;;  %v4138_v43 = vld [vmem:[%s7982_s21 + $0x188] sm:$0xff]  ;;  %v6592_v39 = vpack.c.bf16 %v4090_v36, %v4089_v34  ;;  %v4099_v34 = vld [vmem:[%s7982_s21 + $0x50] sm:$0xff]  ;;  %v4100_v36 = vld [vmem:[%s7982_s21 + $0x58] sm:$0xff] }
0x1291   :  { %v3620_v44 = vpop.xlane.xlu1 %3619 }
0x1292   :  { %v3626_v45 = vmul.f32 0.0078125, %v3620_v44  ;;  %v3618_v46 = vpop.xlane.xlu0 %3617  ;;  %v6582_v44 = vpack.c.bf16 %v3736_v40, %v3732_v38  ;;  %v6622_v38 = vpack.c.bf16 %v4138_v43, %v4137_v35  ;;  %v4121_v40 = vld [vmem:[%s7982_s21 + $0x100] sm:$0xff]  ;;  %v4147_v35 = vld [vmem:[%s7982_s21 + $0x1d0] sm:$0xff]  ;;  %v4148_v43 = vld [vmem:[%s7982_s21 + $0x1d8] sm:$0xff] }
0x1293   :  { %v3625_v48 = vmul.f32 0.0078125, %v3618_v46  ;;  %v3731_v46 = vld [vmem:[%s7979_s9 + $0x190] sm:$0xff] }
0x1294   :  { %v7641_v52 = vsub.f32 %v7604_v4, %v3626_v45  ;;  %v6552_v45 = vpack.c.bf16 %v3733_v42, %v3729_v41  ;;  %6583 = vmatprep.subr.bf16.mxu1 %v6582_v44  ;;  %v4107_v42 = vld [vmem:[%s7982_s21 + $0x90] sm:$0xff]  ;;  %v4108_v44 = vld [vmem:[%s7982_s21 + $0x98] sm:$0xff] }
0x1295   :  { %v7644_v53 = vsub.f32 %v7606_v9, %v3625_v48  ;;  %v3735_v48 = vld [vmem:[%s7979_s9 + $0x1b0] sm:$0xff] }
0x1296   :  { %v3634_v10 = vmul.f32 %v7641_v52, %v7641_v52  ;;  %6553 = vmatpush1.bf16.msra.mxu0 %v6552_v45  ;;  %v4139_v45 = vld [vmem:[%s7982_s21 + $0x190] sm:$0xff] }
0x1297   :  { %v3633_v55 = vmul.f32 %v7644_v53, %v7644_v53 }
0x1298   :  { %3639 = vadd.xlane.f32.xlu1 %v3634_v10  ;;  %v6584_v10 = vpack.c.bf16 %v3735_v48, %v3731_v46  ;;  %v6594_v46 = vpack.c.bf16 %v4108_v44, %v4107_v42  ;;  %v4140_v48 = vld [vmem:[%s7982_s21 + $0x198] sm:$0xff]  ;;  %v4117_v42 = vld [vmem:[%s7982_s21 + $0xe0] sm:$0xff]  ;;  %v4118_v44 = vld [vmem:[%s7982_s21 + $0xe8] sm:$0xff] }
0x1299   :  { %v3624_v14 = vpop.xlane.xlu1 %3623  ;;  %3637 = vadd.xlane.f32.xlu0 %v3633_v55  ;;  %v3738_v55 = vld [vmem:[%s7979_s9 + $0x1c8] sm:$0xff] }
0x129a   :  { %v3628_v51 = vmul.f32 0.0078125, %v3624_v14  ;;  %v3622_v58 = vpop.xlane.xlu0 %3621  ;;  %v3742_v14 = vld [vmem:[%s7979_s9 + $0x1e8] sm:$0xff]  ;;  %6585 = vmatpush1.bf16.msra.mxu1 %v6584_v10  ;;  %v4091_v10 = vld [vmem:[%s7982_s21 + $0x10] sm:$0xff] }
0x129b   :  { %v3627_v60 = vmul.f32 0.0078125, %v3622_v58  ;;  %v6554_v58 = vpack.c.bf16 %v3742_v14, %v3738_v55  ;;  %v4092_v55 = vld [vmem:[%s7982_s21 + $0x18] sm:$0xff]  ;;  %v6626_v14 = vpack.c.bf16 %v4140_v48, %v4139_v45  ;;  %v4149_v45 = vld [vmem:[%s7982_s21 + $0x1e0] sm:$0xff]  ;;  %v4150_v48 = vld [vmem:[%s7982_s21 + $0x1e8] sm:$0xff] }
0x129c   :  { %v7651_v63 = vsub.f32 %v7610_v61, %v3628_v51  ;;  %v3740_v51 = vld [vmem:[%s7979_s9 + $0x1d8] sm:$0xff] }
0x129d   :  { %v7654_v0 = vsub.f32 %v7612_v47, %v3627_v60  ;;  %v3744_v60 = vld [vmem:[%s7979_s9 + $0x1f8] sm:$0xff]  ;;  %6555 = vmatprep.subr.bf16.mxu0 %v6554_v58  ;;  %v4123_v58 = vld [vmem:[%s7982_s21 + $0x110] sm:$0xff] }
0x129e   :  { %v3636_v50 = vmul.f32 %v7651_v63, %v7651_v63  ;;  %v6586_v3 = vpack.c.bf16 %v3744_v60, %v3740_v51  ;;  %v6596_v51 = vpack.c.bf16 %v4092_v55, %v4091_v10  ;;  %v4124_v60 = vld [vmem:[%s7982_s21 + $0x118] sm:$0xff]  ;;  %v4101_v10 = vld [vmem:[%s7982_s21 + $0x60] sm:$0xff]  ;;  %v4102_v55 = vld [vmem:[%s7982_s21 + $0x68] sm:$0xff] }
0x129f   :  { %v3635_v2 = vmul.f32 %v7654_v0, %v7654_v0 }
0x12a0   :  { %3643 = vadd.xlane.f32.xlu1 %v3636_v50  ;;  %v3737_v50 = vld [vmem:[%s7979_s9 + $0x1c0] sm:$0xff]  ;;  %6587 = vmatprep.subr.bf16.mxu1 %v6586_v3  ;;  %v4110_v3 = vld [vmem:[%s7982_s21 + $0xa8] sm:$0xff] }
0x12a1   :  { %3641 = vadd.xlane.f32.xlu0 %v3635_v2  ;;  %v3741_v2 = vld [vmem:[%s7979_s9 + $0x1e0] sm:$0xff]  ;;  %6589 = vmatpush1.bf16.msra.mxu1 %v6588_v54 }
0x12a2   :  { %v6556_v17 = vpack.c.bf16 %v3741_v2, %v3737_v50  ;;  %6623 = vmatprep.subr.bf16.mxu1 %v6622_v38  ;;  %v6628_v50 = vpack.c.bf16 %v4124_v60, %v4123_v58  ;;  %v4109_v2 = vld [vmem:[%s7982_s21 + $0xa0] sm:$0xff]  ;;  %v6642_v38 = vpack.c.bf16 %v4148_v43, %v4147_v35  ;;  %v4134_v60 = vld [vmem:[%s7982_s21 + $0x168] sm:$0xff] }
0x12a3   :  { %v6598_v20 = vpack.c.bf16 %v4110_v3, %v4109_v2  ;;  %v4133_v58 = vld [vmem:[%s7982_s21 + $0x160] sm:$0xff]  ;;  %v4119_v2 = vld [vmem:[%s7982_s21 + $0xf0] sm:$0xff]  ;;  %v4120_v3 = vld [vmem:[%s7982_s21 + $0xf8] sm:$0xff] }
0x12a4   :  { %6557 = vmatpush1.bf16.msra.mxu0 %v6556_v17  ;;  %v4141_v17 = vld [vmem:[%s7982_s21 + $0x1a0] sm:$0xff] }
0x12a5   :  { %v6630_v54 = vpack.c.bf16 %v4142_v22, %v4141_v17  ;;  %v4151_v17 = vld [vmem:[%s7982_s21 + $0x1f0] sm:$0xff]  ;;  %v4152_v22 = vld [vmem:[%s7982_s21 + $0x1f8] sm:$0xff] }
0x1325   :  { %v3640_v56 = vpop.xlane.xlu1 %3639 }
0x1326   :  { %v3646_v57 = vmul.f32 0.0078125, %v3640_v56  ;;  %v3638_v11 = vpop.xlane.xlu0 %3637  ;;  %v4093_v56 = vld [vmem:[%s7982_s21 + $0x20] sm:$0xff] }
0x1327   :  { %v3645_v12 = vmul.f32 0.0078125, %v3638_v11  ;;  %v4125_v11 = vld [vmem:[%s7982_s21 + $0x120] sm:$0xff] }
0x1328   :  { %v3650_v13 = vadd.f32 1e-06, %v3646_v57  ;;  %v4094_v57 = vld [vmem:[%s7982_s21 + $0x28] sm:$0xff] }
0x1329   :  { %v3649_v59 = vadd.f32 1e-06, %v3645_v12  ;;  %v6600_v12 = vpack.c.bf16 %v4094_v57, %v4093_v56  ;;  %v4104_v56 = vld [vmem:[%s7982_s21 + $0x78] sm:$0xff]  ;;  %v6650_v57 = vpack.c.bf16 %v4152_v22, %v4151_v17 }
0x132a   :  { %6777 = vrsqrt.f32 %v3650_v13  ;;  %v4126_v13 = vld [vmem:[%s7982_s21 + $0x128] sm:$0xff] }
0x132b   :  { %6779 = vrsqrt.f32 %v3649_v59  ;;  %v6632_v59 = vpack.c.bf16 %v4126_v13, %v4125_v11  ;;  %v4136_v13 = vld [vmem:[%s7982_s21 + $0x178] sm:$0xff] }
0x132d   :  { %v3644_v15 = vpop.xlane.xlu1 %3643 }
0x132e   :  { %v3648_v8 = vmul.f32 0.0078125, %v3644_v15  ;;  %v3642_v62 = vpop.xlane.xlu0 %3641  ;;  %v4111_v15 = vld [vmem:[%s7982_s21 + $0xb0] sm:$0xff] }
0x132f   :  { %v3647_v16 = vmul.f32 0.0078125, %v3642_v62  ;;  %v4143_v62 = vld [vmem:[%s7982_s21 + $0x1b0] sm:$0xff] }
0x1330   :  { %v3652_v18 = vadd.f32 1e-06, %v3648_v8  ;;  %v4112_v8 = vld [vmem:[%s7982_s21 + $0xb8] sm:$0xff] }
0x1331   :  { %v3651_v19 = vadd.f32 1e-06, %v3647_v16  ;;  %v6602_v16 = vpack.c.bf16 %v4112_v8, %v4111_v15  ;;  %v3747_v15 = vlaneseq }
0x1332   :  { %6781 = vrsqrt.f32 %v3652_v18  ;;  %v4144_v18 = vld [vmem:[%s7982_s21 + $0x1b8] sm:$0xff] }
0x1333   :  { %6783 = vrsqrt.f32 %v3651_v19  ;;  %v4095_v19 = vld [vmem:[%s7982_s21 + $0x30] sm:$0xff]  ;;  %v7777_v8 = vshrl.u32 %v3747_v15, 7 }
0x1334   :  { %v6778_v5 = vpop.eup %6777 }
0x1335   :  { %v6780_v1 = vpop.eup %6779  ;;  %v3658_v49 = vmul.f32 %v6778_v5, %v7641_v52  ;;  %v4096_v5 = vld [vmem:[%s7982_s21 + $0x38] sm:$0xff] }
0x1336   :  { %v3657_v21 = vmul.f32 %v6780_v1, %v7644_v53  ;;  %v6634_v1 = vpack.c.bf16 %v4144_v18, %v4143_v62  ;;  %v3749_v62 = vsub.s32 0, %v7777_v8  ;;  %v3745_v18 = vld [vmem:[%s7983_s25] sm:$0xf] }
0x1337   :  { %v3668_v23 = vmul.f32 %v4884_v29, %v3658_v49  ;;  %v4128_v49 = vld [vmem:[%s7982_s21 + $0x138] sm:$0xff] }
0x1338   :  { %v3667_v33 = vmul.f32 %v4884_v29, %v3657_v21  ;;  %v4127_v21 = vld [vmem:[%s7982_s21 + $0x130] sm:$0xff] }
0x1339   :  { %v3678_v37 = vadd.f32 %v4885_v30, %v3668_v23  ;;  %v4145_v23 = vld [vmem:[%s7982_s21 + $0x1c0] sm:$0xff] }
0x133a   :  { %v3677_v7 = vadd.f32 %v4885_v30, %v3667_v33  ;;  %v4113_v33 = vld [vmem:[%s7982_s21 + $0xc0] sm:$0xff] }
0x133c   :  { %v6782_v32 = vpop.eup %6781  ;;  %3832 = vmatmul.mubr.f32.vlgmr.msra.gmra.mrb[34].mxu0 %v3677_v7  ;;  %3921 = vmatmul.mubr.f32.vlgmr.msra.gmra.mrb[52].mxu1 %v3677_v7  ;;  %v4114_v7 = vld [vmem:[%s7982_s21 + $0xc8] sm:$0xff] }
0x133d   :  { %v6784_v24 = vpop.eup %6783  ;;  %3837 = vmatprep.mubr.f32.mxu0 %v6913_v6  ;;  %3926 = vmatprep.mubr.f32.mxu1 %v6913_v6  ;;  %v3660_v53 = vmul.f32 %v6782_v32, %v7651_v63  ;;  %v6606_v32 = vpack.c.bf16 %v4114_v7, %v4113_v33 }
0x133e   :  { %v3659_v25 = vmul.f32 %v6784_v24, %v7654_v0  ;;  %v4105_v0 = vld [vmem:[%s7982_s21 + $0x80] sm:$0xff]  ;;  %v4146_v24 = vld [vmem:[%s7982_s21 + $0x1c8] sm:$0xff] }
0x133f   :  { %v3670_v27 = vmul.f32 %v4884_v29, %v3660_v53  ;;  %v6590_v31 = vpack.c.bf16 %v4106_v28, %v4105_v0  ;;  %v6638_v53 = vpack.c.bf16 %v4146_v24, %v4145_v23  ;;  %v4115_v0 = vld [vmem:[%s7982_s21 + $0xd0] sm:$0xff]  ;;  %v4116_v28 = vld [vmem:[%s7982_s21 + $0xd8] sm:$0xff] }
0x1340   :  { %3838 = vmatmul.mubr.f32.gmra.mrb[36].mxu0 %v3678_v37  ;;  %3927 = vmatmul.mubr.f32.gmra.mrb[54].mxu1 %v3678_v37  ;;  %v3669_v52 = vmul.f32 %v4884_v29, %v3659_v25  ;;  %v6604_v29 = vpack.c.bf16 %v4096_v5, %v4095_v19  ;;  %v4097_v37 = vld [vmem:[%s7982_s21 + $0x40] sm:$0xff]  ;;  %v4098_v25 = vld [vmem:[%s7982_s21 + $0x48] sm:$0xff]  ;;  %v3753_v19 = vsub.s32 1, %v7777_v8  ;;  %v3761_v5 = vsub.s32 3, %v7777_v8 }
0x1341   :  { %3843 = vmatprep.mubr.f32.mxu0 %v6913_v6  ;;  %3932 = vmatprep.mubr.f32.mxu1 %v6913_v6  ;;  %v3680_v63 = vadd.f32 %v4885_v30, %v3670_v27  ;;  %v4130_v27 = vld [vmem:[%s7982_s21 + $0x148] sm:$0xff] }
0x1342   :  { %v3679_v26 = vadd.f32 %v4885_v30, %v3669_v52  ;;  %6591 = vmatprep.subr.bf16.mxu0 %v6590_v31  ;;  %v6636_v30 = vpack.c.bf16 %v4128_v49, %v4127_v21  ;;  %v6608_v52 = vpack.c.bf16 %v4098_v25, %v4097_v37  ;;  %v6610_v31 = vpack.c.bf16 %v4116_v28, %v4115_v0 }
0x1343   :  { %6593 = vmatpush3.bf16.msra.mxu0 %v6592_v39  ;;  %v6612_v39 = vpack.c.bf16 %v4100_v36, %v4099_v34  ;;  %v7790_v21 = vrot.slane %v3745_v18, %v3753_v19  ;;  %v7792_v49 = vrot.slane %v3745_v18, %v3761_v5 }
0x1344   :  { %3844 = vmatmul.mubr.f32.gmra.mrb[38].mxu0 %v3679_v26  ;;  %3933 = vmatmul.mubr.f32.gmra.mrb[56].mxu1 %v3679_v26  ;;  %v4129_v26 = vld [vmem:[%s7982_s21 + $0x140] sm:$0xff] }
0x1345   :  { %3849 = vmatprep.mubr.f32.mxu0 %v6913_v6  ;;  %3938 = vmatprep.mubr.f32.mxu1 %v6913_v6  ;;  %v4122_v6 = vld [vmem:[%s7982_s21 + $0x108] sm:$0xff] }
0x1346   :  { %v6624_v41 = vpack.c.bf16 %v4122_v6, %v4121_v40  ;;  %6595 = vmatprep.subr.bf16.mxu0 %v6594_v46  ;;  %v4131_v40 = vld [vmem:[%s7982_s21 + $0x150] sm:$0xff]  ;;  %v4132_v6 = vld [vmem:[%s7982_s21 + $0x158] sm:$0xff]  ;;  %v6614_v46 = vpack.c.bf16 %v4118_v44, %v4117_v42 }
0x1347   :  { %6597 = vmatpush3.bf16.msra.mxu0 %v6596_v51  ;;  %v6616_v51 = vpack.c.bf16 %v4102_v55, %v4101_v10 }
0x1348   :  { %3850 = vmatmul.mubr.f32.gmra.mrb[40].mxu0 %v3680_v63  ;;  %3939 = vmatmul.mubr.f32.gmra.mrb[58].mxu1 %v3680_v63  ;;  %v6640_v63 = vpack.c.bf16 %v4130_v27, %v4129_v26 }
0x1349   :  { %6625 = vmatpush3.bf16.msra.mxu1 %v6624_v41  ;;  %6599 = vmatprep.subr.bf16.mxu0 %v6598_v20  ;;  %v6644_v41 = vpack.c.bf16 %v4132_v6, %v4131_v40  ;;  %v6618_v20 = vpack.c.bf16 %v4120_v3, %v4119_v2 }
0x134a   :  { %6627 = vmatprep.subr.bf16.mxu1 %v6626_v14  ;;  %v6646_v14 = vpack.c.bf16 %v4150_v48, %v4149_v45 }
0x134b   :  { %6601 = vmatpush3.bf16.msra.mxu0 %v6600_v12  ;;  %v4135_v12 = vld [vmem:[%s7982_s21 + $0x170] sm:$0xff] }
0x134c   :  { %6603 = vmatprep.subr.bf16.mxu0 %v6602_v16  ;;  %v3757_v16 = vsub.s32 2, %v7777_v8 }
0x134d   :  { %6629 = vmatpush3.bf16.msra.mxu1 %v6628_v50  ;;  %v6648_v50 = vpack.c.bf16 %v4134_v60, %v4133_v58 }
0x134e   :  { %6631 = vmatprep.subr.bf16.mxu1 %v6630_v54  ;;  %v4103_v54 = vld [vmem:[%s7982_s21 + $0x70] sm:$0xff] }
0x134f   :  { %6605 = vmatpush3.bf16.msra.mxu0 %v6604_v29  ;;  %v6620_v11 = vpack.c.bf16 %v4104_v56, %v4103_v54  ;;  %v7788_v29 = vrot.slane %v3745_v18, %v3757_v16 }
0x1350   :  { %6607 = vmatprep.subr.bf16.mxu0 %v6606_v32 }
0x1351   :  { %6633 = vmatpush3.bf16.msra.mxu1 %v6632_v59  ;;  %v6652_v59 = vpack.c.bf16 %v4136_v13, %v4135_v12 }
0x1352   :  { %6635 = vmatprep.subr.bf16.mxu1 %v6634_v1  ;;  %v7786_v1 = vrot.slane %v3745_v18, %v3749_v62 }
0x1353   :  { %6609 = vmatpush3.bf16.msra.mxu0 %v6608_v52 }
0x1354   :  { %6611 = vmatprep.subr.bf16.mxu0 %v6610_v31 }
0x1355   :  { %6637 = vmatpush3.bf16.msra.mxu1 %v6636_v30 }
0x1356   :  { %6639 = vmatprep.subr.bf16.mxu1 %v6638_v53 }
0x1357   :  { %6613 = vmatpush3.bf16.msra.mxu0 %v6612_v39 }
0x1358   :  { %6615 = vmatprep.subr.bf16.mxu0 %v6614_v46 }
0x1359   :  { %6641 = vmatpush3.bf16.msra.mxu1 %v6640_v63 }
0x135a   :  { %6643 = vmatprep.subr.bf16.mxu1 %v6642_v38 }
0x135b   :  { %6617 = vmatpush3.bf16.msra.mxu0 %v6616_v51 }
0x135c   :  { %6619 = vmatprep.subr.bf16.mxu0 %v6618_v20 }
0x135d   :  { %6645 = vmatpush3.bf16.msra.mxu1 %v6644_v41 }
0x135e   :  { %6647 = vmatprep.subr.bf16.mxu1 %v6646_v14 }
0x135f   :  { %6621 = vmatpush3.bf16.msra.mxu0 %v6620_v11 }
0x1361   :  { %6649 = vmatpush3.bf16.msra.mxu1 %v6648_v50 }
0x1362   :  { %6651 = vmatprep.subr.bf16.mxu1 %v6650_v57 }
0x1365   :  { %6653 = vmatpush3.bf16.msra.mxu1 %v6652_v59 }
0x140f   :  { %v3833_v30 = vpop.f32.mrb[34].mxu0  ;;  %v3922_v33 = vpop.f32.mrb[52].mxu1 }
0x1410   :  { %v7795_v7 = vadd.f32 %v3833_v30, %v7786_v1  ;;  %v7798_v23 = vadd.f32 %v3922_v33, %v7788_v29  ;;  %v3835_v32 = vpop.f32.mrb[35].mxu0  ;;  %v3924_v24 = vpop.f32.mrb[53].mxu1 }
0x1411   :  { %v7801_v37 = vadd.f32 %v3835_v32, %v7790_v21  ;;  %v7804_v25 = vadd.f32 %v3924_v24, %v7792_v49 }
0x1412   :  { %v3945_v53 = vmul.f32 %v7795_v7, %v7795_v7  ;;  %v3947_v52 = vmul.f32 %v7798_v23, %v7798_v23 }
0x1413   :  { %v3946_v26 = vmul.f32 %v7801_v37, %v7801_v37  ;;  %v3948_v27 = vmul.f32 %v7804_v25, %v7804_v25  ;;  %v3839_v63 = vpop.f32.mrb[36].mxu0  ;;  %v3928_v0 = vpop.f32.mrb[54].mxu1 }
0x1414   :  { %v3961_v28 = vmul.f32 %v3945_v53, %v7795_v7  ;;  %v3963_v35 = vmul.f32 %v3947_v52, %v7798_v23  ;;  %v7817_v31 = vadd.f32 %v3839_v63, %v7786_v1  ;;  %v7820_v43 = vadd.f32 %v3928_v0, %v7788_v29  ;;  %v3841_v34 = vpop.f32.mrb[37].mxu0  ;;  %v3930_v36 = vpop.f32.mrb[55].mxu1 }
0x1415   :  { %v3962_v38 = vmul.f32 %v3946_v26, %v7801_v37  ;;  %v3964_v39 = vmul.f32 %v3948_v27, %v7804_v25  ;;  %v7825_v40 = vadd.f32 %v3841_v34, %v7790_v21  ;;  %v7828_v6 = vadd.f32 %v3930_v36, %v7792_v49 }
0x1416   :  { %v3977_v41 = vmul.f32 0.044715, %v3961_v28  ;;  %v3979_v42 = vmul.f32 0.044715, %v3963_v35  ;;  %v3949_v44 = vmul.f32 %v7817_v31, %v7817_v31  ;;  %v3951_v48 = vmul.f32 %v7820_v43, %v7820_v43 }
0x1417   :  { %v3978_v45 = vmul.f32 0.044715, %v3962_v38  ;;  %v3980_v46 = vmul.f32 0.044715, %v3964_v39  ;;  %v3950_v10 = vmul.f32 %v7825_v40, %v7825_v40  ;;  %v3845_v55 = vpop.f32.mrb[38].mxu0  ;;  %v3934_v14 = vpop.f32.mrb[56].mxu1  ;;  %v3952_v60 = vmul.f32 %v7828_v6, %v7828_v6 }
0x1418   :  { %v3993_v51 = vadd.f32 %v3977_v41, %v7795_v7  ;;  %v3965_v58 = vmul.f32 %v3949_v44, %v7817_v31  ;;  %v3847_v50 = vpop.f32.mrb[39].mxu0  ;;  %v3936_v2 = vpop.f32.mrb[57].mxu1  ;;  %v3995_v3 = vadd.f32 %v3979_v42, %v7798_v23  ;;  %v7844_v22 = vadd.f32 %v3845_v55, %v7786_v1 }
0x1419   :  { %v3994_v17 = vadd.f32 %v3978_v45, %v7801_v37  ;;  %v3996_v20 = vadd.f32 %v3980_v46, %v7804_v25  ;;  %v3967_v56 = vmul.f32 %v3951_v48, %v7820_v43  ;;  %v3966_v57 = vmul.f32 %v3950_v10, %v7825_v40 }
0x141a   :  { %v4009_v54 = vmul.f32 0.7978846, %v3993_v51  ;;  %v7849_v11 = vadd.f32 %v3934_v14, %v7788_v29  ;;  %v3981_v12 = vmul.f32 0.044715, %v3965_v58  ;;  %v3968_v13 = vmul.f32 %v3952_v60, %v7828_v6 }
0x141b   :  { %v3851_v59 = vpop.f32.mrb[40].mxu0  ;;  %v3940_v16 = vpop.f32.mrb[58].mxu1  ;;  %v3953_v18 = vmul.f32 %v7844_v22, %v7844_v22  ;;  %v4011_v33 = vmul.f32 0.7978846, %v3995_v3  ;;  %v4010_v32 = vmul.f32 0.7978846, %v3994_v17  ;;  %v7857_v53 = vadd.f32 %v3847_v50, %v7790_v21 }
0x141c   :  { %v3955_v19 = vmul.f32 %v7849_v11, %v7849_v11  ;;  %v3853_v5 = vpop.f32.mrb[41].mxu0  ;;  %v3942_v30 = vpop.f32.mrb[59].mxu1  ;;  %v4012_v24 = vmul.f32 0.7978846, %v3996_v20  ;;  %6785 = vtanh.f32 %v4009_v54  ;;  %v3983_v52 = vmul.f32 0.044715, %v3967_v56 }
0x141d   :  { %v3982_v26 = vmul.f32 0.044715, %v3966_v57  ;;  %v7860_v27 = vadd.f32 %v3936_v2, %v7792_v49  ;;  %v3997_v63 = vadd.f32 %v3981_v12, %v7817_v31  ;;  %v3984_v0 = vmul.f32 0.044715, %v3968_v13 }
0x141e   :  { %v3954_v28 = vmul.f32 %v7857_v53, %v7857_v53  ;;  %v7866_v35 = vadd.f32 %v3851_v59, %v7786_v1  ;;  %v3969_v34 = vmul.f32 %v3953_v18, %v7844_v22  ;;  %v3971_v36 = vmul.f32 %v3955_v19, %v7849_v11 }
0x141f   :  { %v3956_v38 = vmul.f32 %v7860_v27, %v7860_v27  ;;  %v7873_v39 = vadd.f32 %v3940_v16, %v7788_v29  ;;  %v7879_v44 = vadd.f32 %v3853_v5, %v7790_v21  ;;  %v7882_v1 = vadd.f32 %v3942_v30, %v7792_v49 }
0x1420   :  { %v3970_v41 = vmul.f32 %v3954_v28, %v7857_v53  ;;  %v3957_v42 = vmul.f32 %v7866_v35, %v7866_v35  ;;  %6787 = vtanh.f32 %v4011_v33  ;;  %v3998_v45 = vadd.f32 %v3982_v26, %v7825_v40 }
0x1421   :  { %v3972_v46 = vmul.f32 %v3956_v38, %v7860_v27  ;;  %v3959_v29 = vmul.f32 %v7873_v39, %v7873_v39  ;;  %v4000_v48 = vadd.f32 %v3984_v0, %v7828_v6  ;;  %v3958_v55 = vmul.f32 %v7879_v44, %v7879_v44 }
0x1422   :  { %v3986_v10 = vmul.f32 0.044715, %v3970_v41  ;;  %v3960_v21 = vmul.f32 %v7882_v1, %v7882_v1  ;;  %v3999_v49 = vadd.f32 %v3983_v52, %v7820_v43  ;;  %v3985_v14 = vmul.f32 0.044715, %v3969_v34 }
0x1423   :  { %v3988_v51 = vmul.f32 0.044715, %v3972_v46  ;;  %v3973_v58 = vmul.f32 %v3957_v42, %v7866_v35  ;;  %v3987_v60 = vmul.f32 0.044715, %v3971_v36  ;;  %v3975_v50 = vmul.f32 %v3959_v29, %v7873_v39 }
0x1424   :  { %v3974_v2 = vmul.f32 %v3958_v55, %v7879_v44  ;;  %v3976_v3 = vmul.f32 %v3960_v21, %v7882_v1  ;;  %v4014_v17 = vmul.f32 0.7978846, %v3998_v45  ;;  %v4002_v20 = vadd.f32 %v3986_v10, %v7857_v53 }
0x1425   :  { %6789 = vtanh.f32 %v4010_v32  ;;  %v4016_v54 = vmul.f32 0.7978846, %v4000_v48  ;;  %v4004_v56 = vadd.f32 %v3988_v51, %v7860_v27  ;;  %v4013_v13 = vmul.f32 0.7978846, %v3997_v63 }
0x1426   :  { %v3990_v57 = vmul.f32 0.044715, %v3974_v2  ;;  %v6786_v12 = vpop.eup %6785  ;;  %v4001_v59 = vadd.f32 %v3985_v14, %v7844_v22  ;;  %v3989_v16 = vmul.f32 0.044715, %v3973_v58  ;;  %v3992_v18 = vmul.f32 0.044715, %v3976_v3 }
0x1427   :  { %v4015_v19 = vmul.f32 0.7978846, %v3999_v49  ;;  %v4003_v5 = vadd.f32 %v3987_v60, %v7849_v11  ;;  %v3991_v30 = vmul.f32 0.044715, %v3975_v50  ;;  %6791 = vtanh.f32 %v4012_v24 }
0x1428   :  { %v4018_v33 = vmul.f32 0.7978846, %v4002_v20  ;;  %v4006_v52 = vadd.f32 %v3990_v57, %v7879_v44  ;;  %6793 = vtanh.f32 %v4014_v17  ;;  %v4020_v32 = vmul.f32 0.7978846, %v4004_v56 }
0x1429   :  { %v4008_v26 = vadd.f32 %v3992_v18, %v7882_v1  ;;  %6795 = vtanh.f32 %v4016_v54  ;;  %v4017_v28 = vmul.f32 0.7978846, %v4001_v59  ;;  %v4005_v63 = vadd.f32 %v3989_v16, %v7866_v35 }
0x142a   :  { %v6788_v0 = vpop.eup %6787  ;;  %6797 = vtanh.f32 %v4013_v13  ;;  %v4019_v34 = vmul.f32 0.7978846, %v4003_v5  ;;  %v4007_v36 = vadd.f32 %v3991_v30, %v7873_v39  ;;  %v4041_v38 = vadd.f32 1.0, %v6786_v12 }
0x142b   :  { %6799 = vtanh.f32 %v4015_v19  ;;  %v4022_v41 = vmul.f32 0.7978846, %v4006_v52  ;;  %v4024_v24 = vmul.f32 0.7978846, %v4008_v26  ;;  %v4021_v45 = vmul.f32 0.7978846, %v4005_v63 }
0x142c   :  { %6801 = vtanh.f32 %v4018_v33  ;;  %v4043_v46 = vadd.f32 1.0, %v6788_v0  ;;  %v4023_v29 = vmul.f32 0.7978846, %v4007_v36  ;;  %v4057_v10 = vmul.f32 0.5, %v4041_v38 }
0x142d   :  { %6803 = vtanh.f32 %v4020_v32 }
0x142e   :  { %6805 = vtanh.f32 %v4017_v28  ;;  %v4059_v58 = vmul.f32 0.5, %v4043_v46  ;;  %v4073_v3 = vmul.f32 %v4057_v10, %v7795_v7 }
0x142f   :  { %v6790_v42 = vpop.eup %6789  ;;  %6807 = vtanh.f32 %v4019_v34 }
0x1430   :  { %v4042_v48 = vadd.f32 1.0, %v6790_v42  ;;  %6809 = vtanh.f32 %v4022_v41 }
0x1431   :  { %v6792_v55 = vpop.eup %6791  ;;  %6811 = vtanh.f32 %v4024_v24 }
0x1432   :  { %v4058_v21 = vmul.f32 0.5, %v4042_v48  ;;  %v6794_v49 = vpop.eup %6793  ;;  %v4044_v14 = vadd.f32 1.0, %v6792_v55  ;;  %6813 = vtanh.f32 %v4021_v45 }
0x1433   :  { %v6796_v51 = vpop.eup %6795  ;;  %v4046_v50 = vadd.f32 1.0, %v6794_v49  ;;  %6815 = vtanh.f32 %v4023_v29 }
0x1434   :  { %v4074_v60 = vmul.f32 %v4058_v21, %v7801_v37  ;;  %v6798_v2 = vpop.eup %6797  ;;  %v4060_v17 = vmul.f32 0.5, %v4044_v14  ;;  %v4048_v20 = vadd.f32 1.0, %v6796_v51  ;;  %v4075_v37 = vmul.f32 %v4059_v58, %v7798_v23 }
0x1435   :  { %v6800_v54 = vpop.eup %6799  ;;  %v4062_v56 = vmul.f32 0.5, %v4046_v50  ;;  %v4045_v57 = vadd.f32 1.0, %v6798_v2 }
0x1436   :  { %4224 = vmatprep.mubr.f32.mxu0 %v4074_v60  ;;  %v6802_v12 = vpop.eup %6801  ;;  %v4076_v13 = vmul.f32 %v4060_v17, %v7804_v25  ;;  %v4064_v59 = vmul.f32 0.5, %v4048_v20  ;;  %v4047_v16 = vadd.f32 1.0, %v6800_v54  ;;  %v4886_v60 = vld [vmem:[%s7984_s29] ss:$0 sm:$0xff] }
0x1437   :  { %4225 = vmatmul.mubr.f32.vlgmr.msra.gmra.mrb[42].mxu0 %v4073_v3  ;;  %v6804_v18 = vpop.eup %6803  ;;  %v4078_v19 = vmul.f32 %v4062_v56, %v7825_v40  ;;  %v4061_v5 = vmul.f32 0.5, %v4045_v57  ;;  %v4050_v30 = vadd.f32 1.0, %v6802_v12 }
0x1438   :  { %v6806_v7 = vpop.eup %6805  ;;  %4309 = vmatprep.mubr.f32.mxu1 %v4076_v13  ;;  %v4080_v33 = vmul.f32 %v4064_v59, %v7828_v6  ;;  %v4063_v52 = vmul.f32 0.5, %v4047_v16  ;;  %v4052_v32 = vadd.f32 1.0, %v6804_v18 }
0x1439   :  { %v6808_v26 = vpop.eup %6807  ;;  %4310 = vmatmul.mubr.f32.vlgmr.msra.gmra.mrb[60].mxu1 %v4075_v37  ;;  %4229 = vmatprep.mubr.f32.mxu0 %v4078_v19  ;;  %v4077_v25 = vmul.f32 %v4061_v5, %v7817_v31  ;;  %v4066_v0 = vmul.f32 0.5, %v4050_v30  ;;  %v4049_v28 = vadd.f32 1.0, %v6806_v7 }
0x143a   :  { %v6810_v63 = vpop.eup %6809  ;;  %4314 = vmatprep.mubr.f32.mxu1 %v4080_v33  ;;  %v4068_v23 = vmul.f32 0.5, %v4052_v32  ;;  %v4051_v34 = vadd.f32 1.0, %v6808_v26  ;;  %v4079_v36 = vmul.f32 %v4063_v52, %v7820_v43 }
0x143b   :  { %v6812_v40 = vpop.eup %6811  ;;  %4230 = vmatmul.mubr.f32.gmra.mrb[44].mxu0 %v4077_v25  ;;  %v4082_v38 = vmul.f32 %v4066_v0, %v7857_v53  ;;  %v4065_v6 = vmul.f32 0.5, %v4049_v28  ;;  %v4054_v41 = vadd.f32 1.0, %v6810_v63 }
0x143c   :  { %v6814_v24 = vpop.eup %6813  ;;  %v4084_v42 = vmul.f32 %v4068_v23, %v7860_v27  ;;  %v4067_v45 = vmul.f32 0.5, %v4051_v34  ;;  %v4056_v46 = vadd.f32 1.0, %v6812_v40 }
0x143d   :  { %v6816_v31 = vpop.eup %6815  ;;  %4315 = vmatmul.mubr.f32.gmra.mrb[62].mxu1 %v4079_v36  ;;  %4234 = vmatprep.mubr.f32.mxu0 %v4082_v38  ;;  %v4081_v29 = vmul.f32 %v4065_v6, %v7844_v22  ;;  %v4070_v48 = vmul.f32 0.5, %v4054_v41  ;;  %v4053_v10 = vadd.f32 1.0, %v6814_v24 }
0x143e   :  { %4319 = vmatprep.mubr.f32.mxu1 %v4084_v42  ;;  %v4072_v55 = vmul.f32 0.5, %v4056_v46  ;;  %v4055_v43 = vadd.f32 1.0, %v6816_v31  ;;  %v4083_v53 = vmul.f32 %v4067_v45, %v7849_v11 }
0x143f   :  { %4235 = vmatmul.mubr.f32.gmra.mrb[46].mxu0 %v4081_v29  ;;  %v4086_v21 = vmul.f32 %v4070_v48, %v7879_v44  ;;  %v4069_v49 = vmul.f32 0.5, %v4053_v10 }
0x1440   :  { %v4088_v27 = vmul.f32 %v4072_v55, %v7882_v1  ;;  %v4071_v14 = vmul.f32 0.5, %v4055_v43  ;;  %v4400_v43 = vld [vmem:[%s7985_s3] sm:$0xf] }
0x1441   :  { %4320 = vmatmul.mubr.f32.gmra.mrb[64].mxu1 %v4083_v53  ;;  %4239 = vmatprep.mubr.f32.mxu0 %v4086_v21  ;;  %v4085_v51 = vmul.f32 %v4069_v49, %v7866_v35 }
0x1442   :  { %4324 = vmatprep.mubr.f32.mxu1 %v4088_v27  ;;  %v4087_v22 = vmul.f32 %v4071_v14, %v7873_v39  ;;  %5998 = vmatprep.subr.mxu0 %v4400_v43 }
0x1443   :  { %4240 = vmatmul.mubr.f32.gmra.mrb[48].mxu0 %v4085_v51 }
0x1444   :  { %5999 = vmatpush3.xpose.msra.mxu0 %v4400_v43 }
0x1445   :  { %4325 = vmatmul.mubr.f32.gmra.mrb[66].mxu1 %v4087_v22 }
0x150a   :  { %v5278_v58 = vpop.f32.mrb[42].mxu0 }
0x150b   :  { %v5279_v50 = vpop.f32.mrb[43].mxu0 }
0x150c   :  { %v5280_v2 = vadd.f32 %v5279_v50, %v5278_v58  ;;  %v5322_v11 = vpop.f32.mrb[60].mxu1 }
0x150d   :  { %v5323_v44 = vpop.f32.mrb[61].mxu1 }
0x150e   :  { %v4227_v3 = vadd.f32 %v5280_v2, %v4886_v60  ;;  %v5324_v17 = vadd.f32 %v5323_v44, %v5322_v11  ;;  %v5281_v20 = vpop.f32.mrb[44].mxu0  ;;  %v4887_v44 = vld [vmem:[%s7986_s8] ss:$0 sm:$0xff] }
0x150f   :  { %v5282_v1 = vpop.f32.mrb[45].mxu0 }
0x1510   :  { %v4312_v54 = vadd.f32 %v5324_v17, %v4227_v3  ;;  %v5325_v56 = vpop.f32.mrb[62].mxu1  ;;  %v5283_v57 = vadd.f32 %v5282_v1, %v5281_v20  ;;  %v4888_v20 = vld [vmem:[%s7987_s14] ss:$0 sm:$0xff] }
0x1511   :  { %v5326_v12 = vpop.f32.mrb[63].mxu1 }
0x1512   :  { %v4232_v35 = vadd.f32 %v5283_v57, %v4886_v60  ;;  %v5327_v13 = vadd.f32 %v5326_v12, %v5325_v56  ;;  %v5284_v59 = vpop.f32.mrb[46].mxu0  ;;  %v4330_v39 = vadd.f32 %v4312_v54, %v7606_v9 }
0x1513   :  { %v5285_v16 = vpop.f32.mrb[47].mxu0 }
0x1514   :  { %v4317_v18 = vadd.f32 %v5327_v13, %v4232_v35  ;;  %v5328_v37 = vpop.f32.mrb[64].mxu1  ;;  %v5286_v19 = vadd.f32 %v5285_v16, %v5284_v59  ;;  %4336 = vadd.xlane.f32.xlu0 %v4330_v39 }
0x1515   :  { %v5329_v5 = vpop.f32.mrb[65].mxu1 }
0x1516   :  { %v4237_v30 = vadd.f32 %v5286_v19, %v4886_v60  ;;  %v5330_v7 = vadd.f32 %v5329_v5, %v5328_v37  ;;  %v5287_v33 = vpop.f32.mrb[48].mxu0  ;;  %v4331_v52 = vadd.f32 %v4317_v18, %v7604_v4 }
0x1517   :  { %v5288_v32 = vpop.f32.mrb[49].mxu0 }
0x1518   :  { %v4322_v26 = vadd.f32 %v5330_v7, %v4237_v30  ;;  %v5331_v25 = vpop.f32.mrb[66].mxu1  ;;  %v5289_v0 = vadd.f32 %v5288_v32, %v5287_v33  ;;  %4338 = vadd.xlane.f32.xlu1 %v4331_v52 }
0x1519   :  { %v5332_v28 = vpop.f32.mrb[67].mxu1 }
0x151a   :  { %v4242_v63 = vadd.f32 %v5289_v0, %v4886_v60  ;;  %v5333_v23 = vadd.f32 %v5332_v28, %v5331_v25  ;;  %v4332_v9 = vadd.f32 %v4322_v26, %v7612_v47 }
0x151c   :  { %v4327_v34 = vadd.f32 %v5333_v23, %v4242_v63  ;;  %4340 = vadd.xlane.f32.xlu0 %v4332_v9 }
0x151e   :  { %v4333_v40 = vadd.f32 %v4327_v34, %v7610_v61 }
0x1520   :  { %4342 = vadd.xlane.f32.xlu1 %v4333_v40 }
0x15a1   :  { %v4337_v36 = vpop.xlane.xlu0 %4336 }
0x15a2   :  { %v4344_v38 = vmul.f32 0.0078125, %v4337_v36 }
0x15a4   :  { %v4348_v6 = vsub.f32 %v4330_v39, %v4344_v38 }
0x15a5   :  { %v4339_v41 = vpop.xlane.xlu1 %4338 }
0x15a6   :  { %v4345_v4 = vmul.f32 0.0078125, %v4339_v41  ;;  %v4352_v24 = vmul.f32 %v4348_v6, %v4348_v6 }
0x15a8   :  { %v4349_v42 = vsub.f32 %v4331_v52, %v4345_v4  ;;  %4356 = vadd.xlane.f32.xlu0 %v4352_v24 }
0x15a9   :  { %v4341_v45 = vpop.xlane.xlu0 %4340 }
0x15aa   :  { %v4346_v46 = vmul.f32 0.0078125, %v4341_v45  ;;  %v4353_v31 = vmul.f32 %v4349_v42, %v4349_v42 }
0x15ac   :  { %v4350_v29 = vsub.f32 %v4332_v9, %v4346_v46  ;;  %4358 = vadd.xlane.f32.xlu1 %v4353_v31 }
0x15ad   :  { %v4343_v47 = vpop.xlane.xlu1 %4342 }
0x15ae   :  { %v4347_v48 = vmul.f32 0.0078125, %v4343_v47  ;;  %v4354_v10 = vmul.f32 %v4350_v29, %v4350_v29 }
0x15b0   :  { %v4351_v55 = vsub.f32 %v4333_v40, %v4347_v48  ;;  %4360 = vadd.xlane.f32.xlu0 %v4354_v10 }
0x15b2   :  { %v4355_v61 = vmul.f32 %v4351_v55, %v4351_v55 }
0x15b4   :  { %4362 = vadd.xlane.f32.xlu1 %v4355_v61 }
0x1635   :  { %v4357_v53 = vpop.xlane.xlu0 %4356 }
0x1636   :  { %v4364_v21 = vmul.f32 0.0078125, %v4357_v53 }
0x1638   :  { %v4368_v49 = vadd.f32 1e-06, %v4364_v21 }
0x1639   :  { %v4359_v27 = vpop.xlane.xlu1 %4358 }
0x163a   :  { %6817 = vrsqrt.f32 %v4368_v49  ;;  %v4365_v14 = vmul.f32 0.0078125, %v4359_v27 }
0x163c   :  { %v4369_v51 = vadd.f32 1e-06, %v4365_v14 }
0x163d   :  { %v4361_v22 = vpop.xlane.xlu0 %4360 }
0x163e   :  { %6819 = vrsqrt.f32 %v4369_v51  ;;  %v4366_v58 = vmul.f32 0.0078125, %v4361_v22 }
0x1640   :  { %v4370_v60 = vadd.f32 1e-06, %v4366_v58 }
0x1641   :  { %v4363_v50 = vpop.xlane.xlu1 %4362 }
0x1642   :  { %6821 = vrsqrt.f32 %v4370_v60  ;;  %v4367_v2 = vmul.f32 0.0078125, %v4363_v50 }
0x1644   :  { %v6818_v11 = vpop.eup %6817  ;;  %v4371_v3 = vadd.f32 1e-06, %v4367_v2 }
0x1645   :  { %v4376_v17 = vmul.f32 %v6818_v11, %v4348_v6 }
0x1646   :  { %6823 = vrsqrt.f32 %v4371_v3 }
0x1647   :  { %v4386_v1 = vmul.f32 %v4887_v44, %v4376_v17 }
0x1648   :  { %v6820_v54 = vpop.eup %6819 }
0x1649   :  { %v4377_v56 = vmul.f32 %v6820_v54, %v4349_v42  ;;  %v4396_v57 = vadd.f32 %v4888_v20, %v4386_v1 }
0x164b   :  { %6000 = vmatprep.mubr.f32.mxu0 %v4396_v57  ;;  %v4387_v12 = vmul.f32 %v4887_v44, %v4377_v56 }
0x164c   :  { %v6822_v35 = vpop.eup %6821 }
0x164d   :  { %v4397_v13 = vadd.f32 %v4888_v20, %v4387_v12  ;;  %v4378_v59 = vmul.f32 %v6822_v35, %v4350_v29 }
0x164f   :  { %6001 = vmatmul.mubr.f32.vlgmr.msra.gmra.mrb[50].mxu0 %v4397_v13  ;;  %v4388_v39 = vmul.f32 %v4887_v44, %v4378_v59 }
0x1650   :  { %v6824_v16 = vpop.eup %6823 }
0x1651   :  { %v4398_v18 = vadd.f32 %v4888_v20, %v4388_v39  ;;  %v4379_v37 = vmul.f32 %v6824_v16, %v4351_v55 }
0x1653   :  { %6003 = vmatprep.mubr.f32.mxu0 %v4398_v18  ;;  %v4389_v19 = vmul.f32 %v4887_v44, %v4379_v37 }
0x1655   :  { %v4399_v5 = vadd.f32 %v4888_v20, %v4389_v19 }
0x1657   :  { %6004 = vmatmul.mubr.f32.gmra.mrb[52].mxu0 %v4399_v5 }
0x1658   :  { %6842 = shalt.err (!%p6839_p4)
}
0x1659   :  { %s6843_s6 = scalar_lea.hbm %s7086_s27, 128 }
0x165a   :  { %p6844_p5 = scmp.ne.s32.totalorder %s7086_s27, %s6843_s6  ;;  %p6847_p6 = scmp.lt.u32.totalorder %s6843_s6, %s7086_s27 }
0x165c   :  { %p6849_p7 = pnand %p6847_p6, %p6844_p5 }
0x165e   :  { %6852 = shalt.err (!%p6849_p7)
}
0x165f   :  { %s6915_s20 = smov 64   ;;  %s7988_s28 = sld [smem:[#allocation22_spill]]  ;;  %v4488_v30 = vadd.s32 8, %v7777_v8  ;;  %v4490_v7 = vand.u32 127, %v3747_v15  ;;  %vm4497_vm5 = vcmask 31744   ;;  %vm4566_vm7 = vcmask 1041409  }
0x1660   :  { %s6916_s1 = smov 4   ;;  %s7990_s2 = sld [smem:[#allocation21_spill]]  ;;  %v4892_v11 = vld [vmem:[%s7071_s4] ss:$0 sm:$0xff]  ;;  %vm4569_vm8 = vcmask 25600  }
0x1661   :  { %4594 = dma.vmem_to_hbm [thread:$0]  %s4589_s24, 128, %s7086_s27, [#allocation6], %s6915_s20, %s6915_s20, %s6916_s1   ;;  %vm4492_vm4 = vcmp.eq.s32.totalorder %v4488_v30, %v4490_v7  ;;  %vm4491_vm6 = vcmp.eq.s32.totalorder %v7777_v8, %v4490_v7 }
0x1662   :  { %s7989_s27 = sld [smem:[#allocation20_spill]]  ;;  %s7991_s7 = sld [smem:[#allocation23_spill]] }
0x1663   :  { %s6917_s10 = smov [#allocation3]  }
0x1664   :  { %s4577_s11 = sshll.u32 %s6917_s10, 4  ;;  %s4578_s11 = int_to_ptr.vmem [resolvable:$true] %s4577_s11 }
0x1665   :  { %v4525_v63 = vld [vmem:[%s7988_s28] sm:$0x1]  ;;  %s6853_s15 = scalar_lea.vmem %s4578_s11, 32  ;;  %p6858_p9 = scmp.lt.s32.totalorder %s4578_s11, %s4578_s11 }
0x1666   :  { %v4526_v9 = vadd.f32 1e-05, %v4525_v63  ;;  %v4890_v43 = vld [vmem:[%s7990_s2] ss:$0 sm:$0xff]  ;;  %p6854_p8 = scmp.ne.s32.totalorder %s4578_s11, %s6853_s15  ;;  %p6859_p10 = scmp.lt.s32.totalorder %s6853_s15, %s6853_s15 }
0x1668   :  { %6825 = vrsqrt.f32 %v4526_v9  ;;  %v4889_v47 = vld [vmem:[%s7989_s27] ss:$0 sm:$0xff]  ;;  %p6860_p11 = por %p6859_p10, %p6858_p9 }
0x1669   :  { %v4891_v58 = vld [vmem:[%s7991_s7] ss:$0 sm:$0xff] }
0x166a   :  { %p6861_p12 = pnand %p6860_p11, %p6854_p8 }
0x1672   :  { %v6826_v61 = vpop.eup %6825 }
0x1673   :  { %v4541_v27 = vrot.slane %v6826_v61, %v3749_v62 }
0x1722   :  { %v6002_v33 = vpop.f32.mrb[50].mxu0 }
0x1723   :  { %v4494_v52 = vsel %vm4492_vm4, %v6002_v33, 0.0  ;;  %v4467_v32 = vpop.f32.mrb[51].mxu0 }
0x1724   :  { %v4499_v26 = vsel %vm4497_vm5, %v4494_v52, 0.0  ;;  %v4493_v25 = vsel %vm4491_vm6, %v4467_v32, 0.0 }
0x1725   :  { %v4498_v0 = vsel %vm4497_vm5, %v4493_v25, 0.0 }
0x1726   :  { %v4500_v28 = vadd.f32 %v4499_v26, %v4498_v0 }
0x1728   :  { %v4501_v23 = vrot.slane %v4500_v28, 4 }
0x172a   :  { %v4502_v15 = vadd.f32 %v4501_v23, %v4500_v28  ;;  %v6005_v34 = vpop.f32.mrb[52].mxu0 }
0x172b   :  { %v4496_v40 = vsel %vm4492_vm4, %v6005_v34, 0.0  ;;  %v4477_v36 = vpop.f32.mrb[53].mxu0 }
0x172c   :  { %v4503_v38 = vrot.slane %v4502_v15, 2  ;;  %v4508_v6 = vsel %vm4497_vm5, %v4496_v40, 0.0  ;;  %v4495_v41 = vsel %vm4491_vm6, %v4477_v36, 0.0 }
0x172d   :  { %v4507_v4 = vsel %vm4497_vm5, %v4495_v41, 0.0 }
0x172e   :  { %v4504_v24 = vadd.f32 %v4503_v38, %v4502_v15  ;;  %v4509_v42 = vadd.f32 %v4508_v6, %v4507_v4 }
0x1730   :  { %v4505_v45 = vrot.slane %v4504_v24, 1  ;;  %v4510_v46 = vrot.slane %v4509_v42, 4 }
0x1732   :  { %v4506_v31 = vadd.f32 %v4505_v45, %v4504_v24  ;;  %v4511_v29 = vadd.f32 %v4510_v46, %v4509_v42 }
0x1734   :  { %v4512_v48 = vrot.slane %v4511_v29, 2  ;;  %v4523_v10 = vadd.f32 %v4889_v47, %v4506_v31 }
0x1736   :  { %v4513_v55 = vadd.f32 %v4512_v48, %v4511_v29  ;;  %v4535_v49 = vsub.f32 %v4523_v10, %v4890_v43 }
0x1738   :  { %v4514_v53 = vrot.slane %v4513_v55, 1  ;;  %v4543_v22 = vmul.f32 %v4541_v27, %v4535_v49 }
0x173a   :  { %v4515_v21 = vadd.f32 %v4514_v53, %v4513_v55  ;;  %v4552_v50 = vmul.f32 %v4891_v58, %v4543_v22 }
0x173c   :  { %v4524_v14 = vadd.f32 %v4889_v47, %v4515_v21  ;;  %v4561_v44 = vadd.f32 %v4892_v11, %v4552_v50 }
0x173e   :  { %v4536_v51 = vsub.f32 %v4524_v14, %v4890_v43 }
0x1740   :  { %v4544_v60 = vmul.f32 %v4541_v27, %v4536_v51 }
0x1742   :  { %v4553_v2 = vmul.f32 %v4891_v58, %v4544_v60 }
0x1744   :  { %v4562_v3 = vadd.f32 %v4892_v11, %v4553_v2 }
0x1746   :  { %v4565_v17 = vrot.slane %v4562_v3, 7 }
0x1748   :  { %v4567_v20 = vsel %vm4566_vm7, %v4565_v17, %v4561_v44 }
0x1749   :  { %4570 = vst.msk [vmem:[#allocation3] sm:$0x3] %vm4569_vm8, %v4567_v20 }
0x174a   :  { %6864 = shalt.err (!%p6861_p12)
}
0x174b   :  { %s6865_s4 = scalar_lea.hbm %s7076_s12, 32 }
0x174c   :  { %p6866_p13 = scmp.ne.s32.totalorder %s7076_s12, %s6865_s4  ;;  %p6869_p0 = scmp.lt.u32.totalorder %s6865_s4, %s7076_s12 }
0x174e   :  { %p6871_p1 = pnand %p6869_p0, %p6866_p13 }
0x1750   :  { %6874 = shalt.err (!%p6871_p1)
}
0x1751   :  { %4580 = dma.vmem_to_hbm [thread:$0]  %s4578_s11, 32, %s7076_s12, [#allocation4]  }
0x1752   :  { %6875 = dma.done.wait [#allocation4], 32  }
0x1753   :  { %6876 = vsyncadd [#allocation4], 4294967264 }
0x1754   :  { %6877 = dma.done.wait [#allocation6], 128  }
0x1755   :  { %6878 = vsyncadd [#allocation6], 4294967168 }
0x1756   :  { %4603 = vsyncpa [#allocation4], 1 }
0x1757   :  { %4604 = vsyncpa [#allocation6], 1 }

</bundles_post_ra>
